<compile_context>
chip_gen: v7x
topology: tpu7x:2x2x1
jax: 0.10.0
libtpu: 0.0.40
codegen_flags: <defaults>
</compile_context>

<pallas_src>
import functools

import jax
import jax.numpy as jnp
from jax.experimental import pallas as pl
from jax.experimental.pallas import tpu as pltpu

# Static geometry implied by the module (.view(N, 9216) forces 13x13 spatial input).
CIN = 256
COUT = 256
H = W = 13           # conv input / output spatial size
HP = WP = 16         # zero-padded spatial size (1 before, 2 after) used for flattening
M = H * WP           # 208 matmul rows per sample (row index = h*16 + w; w >= 13 are junk)
PH = PW = 6          # pooled spatial size (floor((13-3)/2)+1 = 6)


# ---------------------------------------------------------------------------
# Fused kernel: conv(3x3,p=1) + bias + ReLU + maxpool(3,s=2) + dropout(0.5)
# ---------------------------------------------------------------------------
def _stage1_fused_kernel(x_ref, w_ref, b_ref, rnd_ref, o_ref, conv_ref, *,
                         apply_dropout):
    # x_ref   : (1, HP*WP, CIN)    bf16   flattened zero-padded NHWC image
    # w_ref   : (9, CIN, COUT)     bf16   tap t = kh*3 + kw
    # b_ref   : (1, COUT)          f32
    # rnd_ref : (1, PH, PW, COUT)  uint32 random bits for the dropout mask
    # o_ref   : (1, PH, PW, COUT)  f32    pooled (+dropout) NHWC output
    # conv_ref: (H, WP, COUT)      f32    VMEM scratch holding conv+bias+relu

    # ---- Conv2d(3x3, stride 1, pad 1) as 9 shifted bf16 matmuls, f32 accum ----
    acc = jnp.zeros((M, COUT), jnp.float32)
    for t in range(9):
        kh, kw = t // 3, t % 3
        d = kh * WP + kw
        lhs = x_ref[0, d:d + M, :]                       # (M, CIN) bf16
        acc = acc + jnp.dot(lhs, w_ref[t],
                            preferred_element_type=jnp.float32)
    y = jnp.maximum(acc + b_ref[...], 0.0)               # fused bias + ReLU (f32)
    conv_ref[...] = y.reshape(H, WP, COUT)               # row h*16+w -> [h, w, c]

    # ---- MaxPool2d(kernel=3, stride=2): (13,13) -> (6,6), vectorized ----
    # height direction: whole-row reads along the leading dim + elementwise max
    hrows = []
    for i in range(PH):
        hm = jnp.maximum(jnp.maximum(conv_ref[2 * i], conv_ref[2 * i + 1]),
                         conv_ref[2 * i + 2])            # (WP, COUT)
        hrows.append(hm)
    hmax = jnp.stack(hrows, axis=0)                      # (PH, WP, COUT)
    # width direction: contiguous 3-wide windows, reduce over the window
    cols = []
    for j in range(PW):
        cols.append(jnp.max(hmax[:, 2 * j:2 * j + 3, :], axis=1))   # (PH, COUT)
    pooled = jnp.stack(cols, axis=1)                     # (PH, PW, COUT) f32

    # ---- Dropout(p=0.5), inverted scaling, fused ----
    # TODO(synk): switch to pltpu.prng_seed/prng_random_bits once they lower in
    # interpret mode; for now the uint32 bits come from jax.random (wrapper).
    if apply_dropout:
        keep = rnd_ref[0] < jnp.uint32(1 << 31)          # full-word compare, p=0.5
        pooled = jnp.where(keep, pooled * 2.0, 0.0)

    o_ref[0] = pooled


def _stage1_pallas(x_flat, w_taps, bias, rnd_bits, training):
    n = x_flat.shape[0]
    kernel = functools.partial(_stage1_fused_kernel, apply_dropout=training)
    return pl.pallas_call(
        kernel,
        out_shape=jax.ShapeDtypeStruct((n, PH, PW, COUT), jnp.float32),
        grid=(n,),
        in_specs=[
            pl.BlockSpec((1, HP * WP, CIN), lambda b: (b, 0, 0)),
            pl.BlockSpec((9, CIN, COUT), lambda b: (0, 0, 0)),     # weights resident
            pl.BlockSpec((1, COUT), lambda b: (0, 0)),             # bias resident
            pl.BlockSpec((1, PH, PW, COUT), lambda b: (b, 0, 0, 0)),
        ],
        out_specs=pl.BlockSpec((1, PH, PW, COUT), lambda b: (b, 0, 0, 0)),
        scratch_shapes=[pltpu.VMEM((H, WP, COUT), jnp.float32)],
        compiler_params=pltpu.CompilerParams(
            dimension_semantics=("parallel",),   # batch blocks across TCs (v7x megacore)
        ),
    )(x_flat, w_taps, bias, rnd_bits)


# ---------------------------------------------------------------------------
# Stage1 forward
# ---------------------------------------------------------------------------
@functools.partial(jax.jit, static_argnames=("training",))
def stage1_forward(x_nchw, conv_w, conv_b, rng_key, training=True):
    """x_nchw: [N, 256, 13, 13] f32 -> [N, 9216] f32 (matches torch Stage1)."""
    n = x_nchw.shape[0]

    # NCHW -> NHWC, zero-pad to (16,16) (1 before / 2 after), flatten H,W, cast bf16.
    x = jnp.transpose(x_nchw, (0, 2, 3, 1))                        # (N,13,13,C)
    xp = jnp.pad(x, ((0, 0), (1, 2), (1, 2), (0, 0)))              # (N,16,16,C)
    x_flat = xp.reshape(n, HP * WP, CIN).astype(jnp.bfloat16)

    # torch conv weight (Cout,Cin,kh,kw) -> tap-major (kh*3+kw, Cin, Cout), bf16.
    w_taps = jnp.transpose(conv_w, (2, 3, 1, 0)).reshape(9, CIN, COUT)
    w_taps = w_taps.astype(jnp.bfloat16)
    bias = conv_b.reshape(1, COUT).astype(jnp.float32)

    # uint32 random bits for the dropout keep mask (mask select/scale is in-kernel).
    rnd_bits = jax.random.bits(rng_key, (n, PH, PW, COUT), dtype=jnp.uint32)

    pooled = _stage1_pallas(x_flat, w_taps, bias, rnd_bits, training)  # (N,6,6,256)

    # NHWC pooled -> NCHW flatten order, i.e. torch's out3.view(N, 9216).
    return jnp.transpose(pooled, (0, 3, 1, 2)).reshape(n, COUT * PH * PW)


# ---------------------------------------------------------------------------
# Pure-JAX f32 reference for the deterministic path (dropout off)
# ---------------------------------------------------------------------------
def _reference_eval(x_nchw, conv_w, conv_b):
    out = jax.lax.conv_general_dilated(
        x_nchw, conv_w, window_strides=(1, 1), padding=((1, 1), (1, 1)),
        dimension_numbers=("NCHW", "OIHW", "NCHW"))
    out = jnp.maximum(out + conv_b[None, :, None, None], 0.0)
    out = jax.lax.reduce_window(out, -jnp.inf, jax.lax.max,
                                window_dimensions=(1, 1, 3, 3),
                                window_strides=(1, 1, 2, 2), padding="VALID")
    return out.reshape(out.shape[0], -1)


if __name__ == "__main__":
    key = jax.random.PRNGKey(0)
    kx, kw, kb, kd = jax.random.split(key, 4)

    # Shapes dictated by the module: Conv2d(256->256) plus .view(N, 9216)
    # (pool output 256*6*6) force 13x13 spatial input.
    x = jax.random.normal(kx, (2, CIN, H, W), dtype=jnp.float32)
    conv_w = jax.random.normal(kw, (COUT, CIN, 3, 3), dtype=jnp.float32) * 0.02
    conv_b = jax.random.normal(kb, (COUT,), dtype=jnp.float32) * 0.01

    # Numerical check of the deterministic path (dropout off): bf16-fed MXU conv
    # vs an f32 XLA reference.
    got_eval = jax.block_until_ready(
        stage1_forward(x, conv_w, conv_b, kd, training=False))
    ref_eval = _reference_eval(x, conv_w, conv_b)
    assert got_eval.shape == (2, 9216) and got_eval.dtype == jnp.float32
    assert jnp.allclose(got_eval, ref_eval, atol=8e-2, rtol=5e-2), (
        "max abs err = %f" % float(jnp.max(jnp.abs(got_eval - ref_eval))))

    # Training path (dropout on) -- the actual Stage1.forward semantics.
    out = jax.block_until_ready(
        stage1_forward(x, conv_w, conv_b, kd, training=True))
    assert out.shape == (2, 9216) and out.dtype == jnp.float32
    assert bool(jnp.all(jnp.isfinite(out)))
    print("KERNEL_OK")
</pallas_src>

<mosaic_0001>
module attributes {stable_mosaic.version = 11 : i64} {
  func.func @_stage1_fused_kernel(%arg0: i32, %arg1: memref<1x256x256xbf16, #tpu.memory_space<vmem>>, %arg2: memref<9x256x256xbf16, #tpu.memory_space<vmem>>, %arg3: memref<1x256xf32, #tpu.memory_space<vmem>>, %arg4: memref<1x6x6x256xi32, #tpu.memory_space<vmem>>, %arg5: memref<1x6x6x256xf32, #tpu.memory_space<vmem>>, %arg6: memref<13x16x256xf32, #tpu.memory_space<vmem>>) attributes {dimension_semantics = [#tpu.dimension_semantics<parallel>], iteration_bounds = array<i64: 2>, scalar_prefetch = 0 : i64, scratch_operands = 1 : i64, tpu.core_type = #tpu.core_type<tc>, window_params = [{transform_indices = @transform_0, window_bounds = array<i64: 1, 256, 256>}, {pipeline_mode = #tpu.pipeline_mode<synchronous>, transform_indices = @transform_1, window_bounds = array<i64: 9, 256, 256>}, {pipeline_mode = #tpu.pipeline_mode<synchronous>, transform_indices = @transform_2, window_bounds = array<i64: 1, 256>}, {transform_indices = @transform_3, window_bounds = array<i64: 1, 6, 6, 256>}, {transform_indices = @transform_4, window_bounds = array<i64: 1, 6, 6, 256>}]} {
    %cst = arith.constant 0.000000e+00 : f32
    %0 = vector.broadcast %cst : f32 to vector<208x256xf32>
    %c0 = arith.constant 0 : index
    %c0_0 = arith.constant 0 : index
    %c0_1 = arith.constant 0 : index
    %1 = vector.load %arg1[%c0, %c0_0, %c0_1] : memref<1x256x256xbf16, #tpu.memory_space<vmem>>, vector<1x208x256xbf16>
    %2 = vector.shape_cast %1 : vector<1x208x256xbf16> to vector<208x256xbf16>
    %c0_2 = arith.constant 0 : index
    %c0_3 = arith.constant 0 : index
    %c0_4 = arith.constant 0 : index
    %3 = vector.load %arg2[%c0_2, %c0_3, %c0_4] : memref<9x256x256xbf16, #tpu.memory_space<vmem>>, vector<1x256x256xbf16>
    %4 = vector.shape_cast %3 : vector<1x256x256xbf16> to vector<256x256xbf16>
    %cst_5 = arith.constant dense<0.000000e+00> : vector<208x256xf32>
    %5 = tpu.matmul %2, %4, %cst_5 {dimension_numbers = #tpu.dot_dimension_numbers<[1], [0], [0], [1], [0, 0, 1, 1], [], []>} : vector<208x256xbf16>, vector<256x256xbf16>, vector<208x256xf32> -> vector<208x256xf32>
    %6 = arith.addf %0, %5 : vector<208x256xf32>
    %c0_6 = arith.constant 0 : index
    %c1 = arith.constant 1 : index
    %c0_7 = arith.constant 0 : index
    %7 = vector.load %arg1[%c0_6, %c1, %c0_7] : memref<1x256x256xbf16, #tpu.memory_space<vmem>>, vector<1x208x256xbf16>
    %8 = vector.shape_cast %7 : vector<1x208x256xbf16> to vector<208x256xbf16>
    %c1_8 = arith.constant 1 : index
    %c0_9 = arith.constant 0 : index
    %c0_10 = arith.constant 0 : index
    %9 = vector.load %arg2[%c1_8, %c0_9, %c0_10] : memref<9x256x256xbf16, #tpu.memory_space<vmem>>, vector<1x256x256xbf16>
    %10 = vector.shape_cast %9 : vector<1x256x256xbf16> to vector<256x256xbf16>
    %cst_11 = arith.constant dense<0.000000e+00> : vector<208x256xf32>
    %11 = tpu.matmul %8, %10, %cst_11 {dimension_numbers = #tpu.dot_dimension_numbers<[1], [0], [0], [1], [0, 0, 1, 1], [], []>} : vector<208x256xbf16>, vector<256x256xbf16>, vector<208x256xf32> -> vector<208x256xf32>
    %12 = arith.addf %6, %11 : vector<208x256xf32>
    %c0_12 = arith.constant 0 : index
    %c2 = arith.constant 2 : index
    %c0_13 = arith.constant 0 : index
    %13 = vector.load %arg1[%c0_12, %c2, %c0_13] : memref<1x256x256xbf16, #tpu.memory_space<vmem>>, vector<1x208x256xbf16>
    %14 = vector.shape_cast %13 : vector<1x208x256xbf16> to vector<208x256xbf16>
    %c2_14 = arith.constant 2 : index
    %c0_15 = arith.constant 0 : index
    %c0_16 = arith.constant 0 : index
    %15 = vector.load %arg2[%c2_14, %c0_15, %c0_16] : memref<9x256x256xbf16, #tpu.memory_space<vmem>>, vector<1x256x256xbf16>
    %16 = vector.shape_cast %15 : vector<1x256x256xbf16> to vector<256x256xbf16>
    %cst_17 = arith.constant dense<0.000000e+00> : vector<208x256xf32>
    %17 = tpu.matmul %14, %16, %cst_17 {dimension_numbers = #tpu.dot_dimension_numbers<[1], [0], [0], [1], [0, 0, 1, 1], [], []>} : vector<208x256xbf16>, vector<256x256xbf16>, vector<208x256xf32> -> vector<208x256xf32>
    %18 = arith.addf %12, %17 : vector<208x256xf32>
    %c0_18 = arith.constant 0 : index
    %c16 = arith.constant 16 : index
    %c0_19 = arith.constant 0 : index
    %19 = vector.load %arg1[%c0_18, %c16, %c0_19] : memref<1x256x256xbf16, #tpu.memory_space<vmem>>, vector<1x208x256xbf16>
    %20 = vector.shape_cast %19 : vector<1x208x256xbf16> to vector<208x256xbf16>
    %c3 = arith.constant 3 : index
    %c0_20 = arith.constant 0 : index
    %c0_21 = arith.constant 0 : index
    %21 = vector.load %arg2[%c3, %c0_20, %c0_21] : memref<9x256x256xbf16, #tpu.memory_space<vmem>>, vector<1x256x256xbf16>
    %22 = vector.shape_cast %21 : vector<1x256x256xbf16> to vector<256x256xbf16>
    %cst_22 = arith.constant dense<0.000000e+00> : vector<208x256xf32>
    %23 = tpu.matmul %20, %22, %cst_22 {dimension_numbers = #tpu.dot_dimension_numbers<[1], [0], [0], [1], [0, 0, 1, 1], [], []>} : vector<208x256xbf16>, vector<256x256xbf16>, vector<208x256xf32> -> vector<208x256xf32>
    %24 = arith.addf %18, %23 : vector<208x256xf32>
    %c0_23 = arith.constant 0 : index
    %c17 = arith.constant 17 : index
    %c0_24 = arith.constant 0 : index
    %25 = vector.load %arg1[%c0_23, %c17, %c0_24] : memref<1x256x256xbf16, #tpu.memory_space<vmem>>, vector<1x208x256xbf16>
    %26 = vector.shape_cast %25 : vector<1x208x256xbf16> to vector<208x256xbf16>
    %c4 = arith.constant 4 : index
    %c0_25 = arith.constant 0 : index
    %c0_26 = arith.constant 0 : index
    %27 = vector.load %arg2[%c4, %c0_25, %c0_26] : memref<9x256x256xbf16, #tpu.memory_space<vmem>>, vector<1x256x256xbf16>
    %28 = vector.shape_cast %27 : vector<1x256x256xbf16> to vector<256x256xbf16>
    %cst_27 = arith.constant dense<0.000000e+00> : vector<208x256xf32>
    %29 = tpu.matmul %26, %28, %cst_27 {dimension_numbers = #tpu.dot_dimension_numbers<[1], [0], [0], [1], [0, 0, 1, 1], [], []>} : vector<208x256xbf16>, vector<256x256xbf16>, vector<208x256xf32> -> vector<208x256xf32>
    %30 = arith.addf %24, %29 : vector<208x256xf32>
    %c0_28 = arith.constant 0 : index
    %c18 = arith.constant 18 : index
    %c0_29 = arith.constant 0 : index
    %31 = vector.load %arg1[%c0_28, %c18, %c0_29] : memref<1x256x256xbf16, #tpu.memory_space<vmem>>, vector<1x208x256xbf16>
    %32 = vector.shape_cast %31 : vector<1x208x256xbf16> to vector<208x256xbf16>
    %c5 = arith.constant 5 : index
    %c0_30 = arith.constant 0 : index
    %c0_31 = arith.constant 0 : index
    %33 = vector.load %arg2[%c5, %c0_30, %c0_31] : memref<9x256x256xbf16, #tpu.memory_space<vmem>>, vector<1x256x256xbf16>
    %34 = vector.shape_cast %33 : vector<1x256x256xbf16> to vector<256x256xbf16>
    %cst_32 = arith.constant dense<0.000000e+00> : vector<208x256xf32>
    %35 = tpu.matmul %32, %34, %cst_32 {dimension_numbers = #tpu.dot_dimension_numbers<[1], [0], [0], [1], [0, 0, 1, 1], [], []>} : vector<208x256xbf16>, vector<256x256xbf16>, vector<208x256xf32> -> vector<208x256xf32>
    %36 = arith.addf %30, %35 : vector<208x256xf32>
    %c0_33 = arith.constant 0 : index
    %c32 = arith.constant 32 : index
    %c0_34 = arith.constant 0 : index
    %37 = vector.load %arg1[%c0_33, %c32, %c0_34] : memref<1x256x256xbf16, #tpu.memory_space<vmem>>, vector<1x208x256xbf16>
    %38 = vector.shape_cast %37 : vector<1x208x256xbf16> to vector<208x256xbf16>
    %c6 = arith.constant 6 : index
    %c0_35 = arith.constant 0 : index
    %c0_36 = arith.constant 0 : index
    %39 = vector.load %arg2[%c6, %c0_35, %c0_36] : memref<9x256x256xbf16, #tpu.memory_space<vmem>>, vector<1x256x256xbf16>
    %40 = vector.shape_cast %39 : vector<1x256x256xbf16> to vector<256x256xbf16>
    %cst_37 = arith.constant dense<0.000000e+00> : vector<208x256xf32>
    %41 = tpu.matmul %38, %40, %cst_37 {dimension_numbers = #tpu.dot_dimension_numbers<[1], [0], [0], [1], [0, 0, 1, 1], [], []>} : vector<208x256xbf16>, vector<256x256xbf16>, vector<208x256xf32> -> vector<208x256xf32>
    %42 = arith.addf %36, %41 : vector<208x256xf32>
    %c0_38 = arith.constant 0 : index
    %c33 = arith.constant 33 : index
    %c0_39 = arith.constant 0 : index
    %43 = vector.load %arg1[%c0_38, %c33, %c0_39] : memref<1x256x256xbf16, #tpu.memory_space<vmem>>, vector<1x208x256xbf16>
    %44 = vector.shape_cast %43 : vector<1x208x256xbf16> to vector<208x256xbf16>
    %c7 = arith.constant 7 : index
    %c0_40 = arith.constant 0 : index
    %c0_41 = arith.constant 0 : index
    %45 = vector.load %arg2[%c7, %c0_40, %c0_41] : memref<9x256x256xbf16, #tpu.memory_space<vmem>>, vector<1x256x256xbf16>
    %46 = vector.shape_cast %45 : vector<1x256x256xbf16> to vector<256x256xbf16>
    %cst_42 = arith.constant dense<0.000000e+00> : vector<208x256xf32>
    %47 = tpu.matmul %44, %46, %cst_42 {dimension_numbers = #tpu.dot_dimension_numbers<[1], [0], [0], [1], [0, 0, 1, 1], [], []>} : vector<208x256xbf16>, vector<256x256xbf16>, vector<208x256xf32> -> vector<208x256xf32>
    %48 = arith.addf %42, %47 : vector<208x256xf32>
    %c0_43 = arith.constant 0 : index
    %c34 = arith.constant 34 : index
    %c0_44 = arith.constant 0 : index
    %49 = vector.load %arg1[%c0_43, %c34, %c0_44] : memref<1x256x256xbf16, #tpu.memory_space<vmem>>, vector<1x208x256xbf16>
    %50 = vector.shape_cast %49 : vector<1x208x256xbf16> to vector<208x256xbf16>
    %c8 = arith.constant 8 : index
    %c0_45 = arith.constant 0 : index
    %c0_46 = arith.constant 0 : index
    %51 = vector.load %arg2[%c8, %c0_45, %c0_46] : memref<9x256x256xbf16, #tpu.memory_space<vmem>>, vector<1x256x256xbf16>
    %52 = vector.shape_cast %51 : vector<1x256x256xbf16> to vector<256x256xbf16>
    %cst_47 = arith.constant dense<0.000000e+00> : vector<208x256xf32>
    %53 = tpu.matmul %50, %52, %cst_47 {dimension_numbers = #tpu.dot_dimension_numbers<[1], [0], [0], [1], [0, 0, 1, 1], [], []>} : vector<208x256xbf16>, vector<256x256xbf16>, vector<208x256xf32> -> vector<208x256xf32>
    %54 = arith.addf %48, %53 : vector<208x256xf32>
    %c0_48 = arith.constant 0 : index
    %c0_49 = arith.constant 0 : index
    %55 = vector.load %arg3[%c0_48, %c0_49] : memref<1x256xf32, #tpu.memory_space<vmem>>, vector<1x256xf32>
    %56 = vector.broadcast %55 : vector<1x256xf32> to vector<208x256xf32>
    %57 = arith.addf %54, %56 : vector<208x256xf32>
    %cst_50 = arith.constant 0.000000e+00 : f32
    %58 = vector.broadcast %cst_50 : f32 to vector<208x256xf32>
    %59 = arith.maximumf %57, %58 : vector<208x256xf32>
    %60 = vector.shape_cast %59 : vector<208x256xf32> to vector<13x16x256xf32>
    %c0_51 = arith.constant 0 : index
    %c0_52 = arith.constant 0 : index
    %c0_53 = arith.constant 0 : index
    %61 = vector.load %arg6[%c0_51, %c0_52, %c0_53] : memref<13x16x256xf32, #tpu.memory_space<vmem>>, vector<13x16x256xf32>
    tpu.vector_store %arg6[%c0_51, %c0_52, %c0_53], %60 {strides = array<i32>} : memref<13x16x256xf32, #tpu.memory_space<vmem>>, vector<13x16x256xf32>,
    %c0_54 = arith.constant 0 : index
    %c0_55 = arith.constant 0 : index
    %c0_56 = arith.constant 0 : index
    %62 = vector.load %arg6[%c0_54, %c0_55, %c0_56] : memref<13x16x256xf32, #tpu.memory_space<vmem>>, vector<1x16x256xf32>
    %63 = vector.shape_cast %62 : vector<1x16x256xf32> to vector<16x256xf32>
    %c1_57 = arith.constant 1 : index
    %c0_58 = arith.constant 0 : index
    %c0_59 = arith.constant 0 : index
    %64 = vector.load %arg6[%c1_57, %c0_58, %c0_59] : memref<13x16x256xf32, #tpu.memory_space<vmem>>, vector<1x16x256xf32>
    %65 = vector.shape_cast %64 : vector<1x16x256xf32> to vector<16x256xf32>
    %66 = arith.maximumf %63, %65 : vector<16x256xf32>
    %c2_60 = arith.constant 2 : index
    %c0_61 = arith.constant 0 : index
    %c0_62 = arith.constant 0 : index
    %67 = vector.load %arg6[%c2_60, %c0_61, %c0_62] : memref<13x16x256xf32, #tpu.memory_space<vmem>>, vector<1x16x256xf32>
    %68 = vector.shape_cast %67 : vector<1x16x256xf32> to vector<16x256xf32>
    %69 = arith.maximumf %66, %68 : vector<16x256xf32>
    %c2_63 = arith.constant 2 : index
    %c0_64 = arith.constant 0 : index
    %c0_65 = arith.constant 0 : index
    %70 = vector.load %arg6[%c2_63, %c0_64, %c0_65] : memref<13x16x256xf32, #tpu.memory_space<vmem>>, vector<1x16x256xf32>
    %71 = vector.shape_cast %70 : vector<1x16x256xf32> to vector<16x256xf32>
    %c3_66 = arith.constant 3 : index
    %c0_67 = arith.constant 0 : index
    %c0_68 = arith.constant 0 : index
    %72 = vector.load %arg6[%c3_66, %c0_67, %c0_68] : memref<13x16x256xf32, #tpu.memory_space<vmem>>, vector<1x16x256xf32>
    %73 = vector.shape_cast %72 : vector<1x16x256xf32> to vector<16x256xf32>
    %74 = arith.maximumf %71, %73 : vector<16x256xf32>
    %c4_69 = arith.constant 4 : index
    %c0_70 = arith.constant 0 : index
    %c0_71 = arith.constant 0 : index
    %75 = vector.load %arg6[%c4_69, %c0_70, %c0_71] : memref<13x16x256xf32, #tpu.memory_space<vmem>>, vector<1x16x256xf32>
    %76 = vector.shape_cast %75 : vector<1x16x256xf32> to vector<16x256xf32>
    %77 = arith.maximumf %74, %76 : vector<16x256xf32>
    %c4_72 = arith.constant 4 : index
    %c0_73 = arith.constant 0 : index
    %c0_74 = arith.constant 0 : index
    %78 = vector.load %arg6[%c4_72, %c0_73, %c0_74] : memref<13x16x256xf32, #tpu.memory_space<vmem>>, vector<1x16x256xf32>
    %79 = vector.shape_cast %78 : vector<1x16x256xf32> to vector<16x256xf32>
    %c5_75 = arith.constant 5 : index
    %c0_76 = arith.constant 0 : index
    %c0_77 = arith.constant 0 : index
    %80 = vector.load %arg6[%c5_75, %c0_76, %c0_77] : memref<13x16x256xf32, #tpu.memory_space<vmem>>, vector<1x16x256xf32>
    %81 = vector.shape_cast %80 : vector<1x16x256xf32> to vector<16x256xf32>
    %82 = arith.maximumf %79, %81 : vector<16x256xf32>
    %c6_78 = arith.constant 6 : index
    %c0_79 = arith.constant 0 : index
    %c0_80 = arith.constant 0 : index
    %83 = vector.load %arg6[%c6_78, %c0_79, %c0_80] : memref<13x16x256xf32, #tpu.memory_space<vmem>>, vector<1x16x256xf32>
    %84 = vector.shape_cast %83 : vector<1x16x256xf32> to vector<16x256xf32>
    %85 = arith.maximumf %82, %84 : vector<16x256xf32>
    %c6_81 = arith.constant 6 : index
    %c0_82 = arith.constant 0 : index
    %c0_83 = arith.constant 0 : index
    %86 = vector.load %arg6[%c6_81, %c0_82, %c0_83] : memref<13x16x256xf32, #tpu.memory_space<vmem>>, vector<1x16x256xf32>
    %87 = vector.shape_cast %86 : vector<1x16x256xf32> to vector<16x256xf32>
    %c7_84 = arith.constant 7 : index
    %c0_85 = arith.constant 0 : index
    %c0_86 = arith.constant 0 : index
    %88 = vector.load %arg6[%c7_84, %c0_85, %c0_86] : memref<13x16x256xf32, #tpu.memory_space<vmem>>, vector<1x16x256xf32>
    %89 = vector.shape_cast %88 : vector<1x16x256xf32> to vector<16x256xf32>
    %90 = arith.maximumf %87, %89 : vector<16x256xf32>
    %c8_87 = arith.constant 8 : index
    %c0_88 = arith.constant 0 : index
    %c0_89 = arith.constant 0 : index
    %91 = vector.load %arg6[%c8_87, %c0_88, %c0_89] : memref<13x16x256xf32, #tpu.memory_space<vmem>>, vector<1x16x256xf32>
    %92 = vector.shape_cast %91 : vector<1x16x256xf32> to vector<16x256xf32>
    %93 = arith.maximumf %90, %92 : vector<16x256xf32>
    %c8_90 = arith.constant 8 : index
    %c0_91 = arith.constant 0 : index
    %c0_92 = arith.constant 0 : index
    %94 = vector.load %arg6[%c8_90, %c0_91, %c0_92] : memref<13x16x256xf32, #tpu.memory_space<vmem>>, vector<1x16x256xf32>
    %95 = vector.shape_cast %94 : vector<1x16x256xf32> to vector<16x256xf32>
    %c9 = arith.constant 9 : index
    %c0_93 = arith.constant 0 : index
    %c0_94 = arith.constant 0 : index
    %96 = vector.load %arg6[%c9, %c0_93, %c0_94] : memref<13x16x256xf32, #tpu.memory_space<vmem>>, vector<1x16x256xf32>
    %97 = vector.shape_cast %96 : vector<1x16x256xf32> to vector<16x256xf32>
    %98 = arith.maximumf %95, %97 : vector<16x256xf32>
    %c10 = arith.constant 10 : index
    %c0_95 = arith.constant 0 : index
    %c0_96 = arith.constant 0 : index
    %99 = vector.load %arg6[%c10, %c0_95, %c0_96] : memref<13x16x256xf32, #tpu.memory_space<vmem>>, vector<1x16x256xf32>
    %100 = vector.shape_cast %99 : vector<1x16x256xf32> to vector<16x256xf32>
    %101 = arith.maximumf %98, %100 : vector<16x256xf32>
    %c10_97 = arith.constant 10 : index
    %c0_98 = arith.constant 0 : index
    %c0_99 = arith.constant 0 : index
    %102 = vector.load %arg6[%c10_97, %c0_98, %c0_99] : memref<13x16x256xf32, #tpu.memory_space<vmem>>, vector<1x16x256xf32>
    %103 = vector.shape_cast %102 : vector<1x16x256xf32> to vector<16x256xf32>
    %c11 = arith.constant 11 : index
    %c0_100 = arith.constant 0 : index
    %c0_101 = arith.constant 0 : index
    %104 = vector.load %arg6[%c11, %c0_100, %c0_101] : memref<13x16x256xf32, #tpu.memory_space<vmem>>, vector<1x16x256xf32>
    %105 = vector.shape_cast %104 : vector<1x16x256xf32> to vector<16x256xf32>
    %106 = arith.maximumf %103, %105 : vector<16x256xf32>
    %c12 = arith.constant 12 : index
    %c0_102 = arith.constant 0 : index
    %c0_103 = arith.constant 0 : index
    %107 = vector.load %arg6[%c12, %c0_102, %c0_103] : memref<13x16x256xf32, #tpu.memory_space<vmem>>, vector<1x16x256xf32>
    %108 = vector.shape_cast %107 : vector<1x16x256xf32> to vector<16x256xf32>
    %109 = arith.maximumf %106, %108 : vector<16x256xf32>
    %110 = vector.shape_cast %69 : vector<16x256xf32> to vector<1x16x256xf32>
    %111 = vector.shape_cast %77 : vector<16x256xf32> to vector<1x16x256xf32>
    %112 = vector.shape_cast %85 : vector<16x256xf32> to vector<1x16x256xf32>
    %113 = vector.shape_cast %93 : vector<16x256xf32> to vector<1x16x256xf32>
    %114 = vector.shape_cast %101 : vector<16x256xf32> to vector<1x16x256xf32>
    %115 = vector.shape_cast %109 : vector<16x256xf32> to vector<1x16x256xf32>
    %116 = tpu.concatenate %110, %111, %112, %113, %114, %115 in 0 : vector<1x16x256xf32>, vector<1x16x256xf32>, vector<1x16x256xf32>, vector<1x16x256xf32>, vector<1x16x256xf32>, vector<1x16x256xf32> -> vector<6x16x256xf32>
    %117 = vector.extract_strided_slice %116 {offsets = [0, 0, 0], sizes = [6, 3, 256], strides = [1, 1, 1]} : vector<6x16x256xf32> to vector<6x3x256xf32>
    %cst_104 = arith.constant dense<0xFF800000> : vector<6x256xf32>
    %118 = vector.multi_reduction <maximumf>, %117, %cst_104 [1] : vector<6x3x256xf32> to vector<6x256xf32>
    %119 = vector.extract_strided_slice %116 {offsets = [0, 2, 0], sizes = [6, 3, 256], strides = [1, 1, 1]} : vector<6x16x256xf32> to vector<6x3x256xf32>
    %cst_105 = arith.constant dense<0xFF800000> : vector<6x256xf32>
    %120 = vector.multi_reduction <maximumf>, %119, %cst_105 [1] : vector<6x3x256xf32> to vector<6x256xf32>
    %121 = vector.extract_strided_slice %116 {offsets = [0, 4, 0], sizes = [6, 3, 256], strides = [1, 1, 1]} : vector<6x16x256xf32> to vector<6x3x256xf32>
    %cst_106 = arith.constant dense<0xFF800000> : vector<6x256xf32>
    %122 = vector.multi_reduction <maximumf>, %121, %cst_106 [1] : vector<6x3x256xf32> to vector<6x256xf32>
    %123 = vector.extract_strided_slice %116 {offsets = [0, 6, 0], sizes = [6, 3, 256], strides = [1, 1, 1]} : vector<6x16x256xf32> to vector<6x3x256xf32>
    %cst_107 = arith.constant dense<0xFF800000> : vector<6x256xf32>
    %124 = vector.multi_reduction <maximumf>, %123, %cst_107 [1] : vector<6x3x256xf32> to vector<6x256xf32>
    %125 = vector.extract_strided_slice %116 {offsets = [0, 8, 0], sizes = [6, 3, 256], strides = [1, 1, 1]} : vector<6x16x256xf32> to vector<6x3x256xf32>
    %cst_108 = arith.constant dense<0xFF800000> : vector<6x256xf32>
    %126 = vector.multi_reduction <maximumf>, %125, %cst_108 [1] : vector<6x3x256xf32> to vector<6x256xf32>
    %127 = vector.extract_strided_slice %116 {offsets = [0, 10, 0], sizes = [6, 3, 256], strides = [1, 1, 1]} : vector<6x16x256xf32> to vector<6x3x256xf32>
    %cst_109 = arith.constant dense<0xFF800000> : vector<6x256xf32>
    %128 = vector.multi_reduction <maximumf>, %127, %cst_109 [1] : vector<6x3x256xf32> to vector<6x256xf32>
    %129 = vector.shape_cast %118 : vector<6x256xf32> to vector<6x1x256xf32>
    %130 = vector.shape_cast %120 : vector<6x256xf32> to vector<6x1x256xf32>
    %131 = vector.shape_cast %122 : vector<6x256xf32> to vector<6x1x256xf32>
    %132 = vector.shape_cast %124 : vector<6x256xf32> to vector<6x1x256xf32>
    %133 = vector.shape_cast %126 : vector<6x256xf32> to vector<6x1x256xf32>
    %134 = vector.shape_cast %128 : vector<6x256xf32> to vector<6x1x256xf32>
    %135 = tpu.concatenate %129, %130, %131, %132, %133, %134 in 1 : vector<6x1x256xf32>, vector<6x1x256xf32>, vector<6x1x256xf32>, vector<6x1x256xf32>, vector<6x1x256xf32>, vector<6x1x256xf32> -> vector<6x6x256xf32>
    %c0_110 = arith.constant 0 : index
    %c0_111 = arith.constant 0 : index
    %c0_112 = arith.constant 0 : index
    %c0_113 = arith.constant 0 : index
    %136 = vector.load %arg5[%c0_110, %c0_111, %c0_112, %c0_113] : memref<1x6x6x256xf32, #tpu.memory_space<vmem>>, vector<1x6x6x256xf32>
    %137 = vector.shape_cast %136 : vector<1x6x6x256xf32> to vector<6x6x256xf32>
    %138 = vector.shape_cast %135 : vector<6x6x256xf32> to vector<1x6x6x256xf32>
    tpu.vector_store %arg5[%c0_110, %c0_111, %c0_112, %c0_113], %138 {strides = array<i32>} : memref<1x6x6x256xf32, #tpu.memory_space<vmem>>, vector<1x6x6x256xf32>,
    return
  }
  func.func @transform_0(%arg0: i32) -> (i32, i32, i32) {
    %c0_i32 = arith.constant 0 : i32
    %c0_i32_0 = arith.constant 0 : i32
    %c0_i32_1 = arith.constant 0 : i32
    return %arg0, %c0_i32, %c0_i32_0 : i32, i32, i32
  }
  func.func @transform_1(%arg0: i32) -> (i32, i32, i32) {
    %c0_i32 = arith.constant 0 : i32
    %c0_i32_0 = arith.constant 0 : i32
    %c0_i32_1 = arith.constant 0 : i32
    %c0_i32_2 = arith.constant 0 : i32
    return %c0_i32, %c0_i32_0, %c0_i32_1 : i32, i32, i32
  }
  func.func @transform_2(%arg0: i32) -> (i32, i32) {
    %c0_i32 = arith.constant 0 : i32
    %c0_i32_0 = arith.constant 0 : i32
    %c0_i32_1 = arith.constant 0 : i32
    return %c0_i32, %c0_i32_0 : i32, i32
  }
  func.func @transform_3(%arg0: i32) -> (i32, i32, i32, i32) {
    %c0_i32 = arith.constant 0 : i32
    %c0_i32_0 = arith.constant 0 : i32
    %c0_i32_1 = arith.constant 0 : i32
    %c0_i32_2 = arith.constant 0 : i32
    return %arg0, %c0_i32, %c0_i32_0, %c0_i32_1 : i32, i32, i32, i32
  }
  func.func @transform_4(%arg0: i32) -> (i32, i32, i32, i32) {
    %c0_i32 = arith.constant 0 : i32
    %c0_i32_0 = arith.constant 0 : i32
    %c0_i32_1 = arith.constant 0 : i32
    %c0_i32_2 = arith.constant 0 : i32
    return %arg0, %c0_i32, %c0_i32_0, %c0_i32_1 : i32, i32, i32, i32
  }
}

</mosaic_0001>

<bundles_post_ra>
// kernel: stage1_forward.1
= control target key start
LH: loop header
LB: loop body
LE: loop exit
PB: predicated region body
PF: predicated region fallthrough
CT: control target
= control target key end

     0   :  { %s8205_s15 = smov 0   ;;  %s10490_s0 = inlined_call_operand.vmem [shape: bf16[2,256,256], index: 0, kind: input, shape index: {}]   ;;  %s10491_s1 = inlined_call_operand.vmem [shape: bf16[9,256,256], index: 1, kind: input, shape index: {}]   ;;  %s10492_s2 = inlined_call_operand.vmem [shape: f32[1,256], index: 2, kind: input, shape index: {}]   ;;  %s10493_s3 = inlined_call_operand.vmem [shape: u32[2,6,6,256], index: 3, kind: input, shape index: {}]   ;;  %s10494_s4 = inlined_call_operand.vmem [shape: f32[2,6,6,256], index: 4, kind: output, shape index: {}]  }
   0x1 LB: > { %s6472_s16 = sadd.s32 4294967295, %s8178_s15   ;;  %p6476_p0 = scmp.ge.s32.totalorder %s8178_s15, 1  ;;  %s8178_s15 = sphi %s8205_s15, %s14_s15  }
   0x2   : > { %p172_p1 = scmp.lt.s32.totalorder %s8178_s15, 3 }
   0x4   : > { %p173_p2 = pnand %p6476_p0, %p172_p1 }
   0x6   : > { %176 = sbr.rel (%p173_p2) target bundleno = 920 (0x398), region = 36 }
   0xd   : > { %v7626_v0 = vld [vmem:[%s10491_s1 + $0x104] ss:$8 sps:$4 sm:$0xff]   ;;  %v7630_v2 = vld [vmem:[%s10491_s1 + $0x100] ss:$8 sps:$4 sm:$0xff]   ;;  %v7632_v4 = vld [vmem:[%s10491_s1 + $0x114] ss:$8 sps:$4 sm:$0xff]  }
   0xe   : > { %v7628_v1 = vld [vmem:[%s10491_s1 + $0x404] ss:$8 sps:$4 sm:$0xff]   ;;  %822 = vmatprep.subr.bf16.mxu1 %v7626_v0  ;;  %v7631_v3 = vld [vmem:[%s10491_s1 + $0x400] ss:$8 sps:$4 sm:$0xff]   ;;  %v7634_v5 = vld [vmem:[%s10491_s1 + $0x414] ss:$8 sps:$4 sm:$0xff]  }
   0xf   : > { %2964 = vmatprep.subr.bf16.mxu0 %v7628_v1  ;;  %823 = vmatpush1.bf16.msra.mxu1 %v7630_v2  ;;  %v7636_v6 = vld [vmem:[%s10491_s1 + $0x110] ss:$8 sps:$4 sm:$0xff]   ;;  %v7638_v8 = vld [vmem:[%s10491_s1 + $0x124] ss:$8 sps:$4 sm:$0xff]   ;;  %v7642_v10 = vld [vmem:[%s10491_s1 + $0x120] ss:$8 sps:$4 sm:$0xff]  }
  0x10   : > { %2965 = vmatpush1.bf16.msra.mxu0 %v7631_v3  ;;  %824 = vmatprep.subr.bf16.mxu1 %v7632_v4  ;;  %v7637_v7 = vld [vmem:[%s10491_s1 + $0x410] ss:$8 sps:$4 sm:$0xff]   ;;  %v7640_v9 = vld [vmem:[%s10491_s1 + $0x424] ss:$8 sps:$4 sm:$0xff]   ;;  %v7643_v11 = vld [vmem:[%s10491_s1 + $0x420] ss:$8 sps:$4 sm:$0xff]  }
  0x11   : > { %2966 = vmatprep.subr.bf16.mxu0 %v7634_v5  ;;  %v7644_v12 = vld [vmem:[%s10491_s1 + $0x134] ss:$8 sps:$4 sm:$0xff]   ;;  %v7648_v14 = vld [vmem:[%s10491_s1 + $0x130] ss:$8 sps:$4 sm:$0xff]   ;;  %v7650_v16 = vld [vmem:[%s10491_s1 + $0x144] ss:$8 sps:$4 sm:$0xff]  }
  0x12   : > { %v7646_v13 = vld [vmem:[%s10491_s1 + $0x434] ss:$8 sps:$4 sm:$0xff]   ;;  %v7649_v15 = vld [vmem:[%s10491_s1 + $0x430] ss:$8 sps:$4 sm:$0xff]   ;;  %v7652_v17 = vld [vmem:[%s10491_s1 + $0x444] ss:$8 sps:$4 sm:$0xff]  }
  0x13   : > { %825 = vmatpush1.bf16.msra.mxu1 %v7636_v6  ;;  %v7654_v18 = vld [vmem:[%s10491_s1 + $0x140] ss:$8 sps:$4 sm:$0xff]   ;;  %v7656_v20 = vld [vmem:[%s10491_s1 + $0x154] ss:$8 sps:$4 sm:$0xff]   ;;  %v7660_v22 = vld [vmem:[%s10491_s1 + $0x150] ss:$8 sps:$4 sm:$0xff]  }
  0x14   : > { %2967 = vmatpush1.bf16.msra.mxu0 %v7637_v7  ;;  %826 = vmatprep.subr.bf16.mxu1 %v7638_v8  ;;  %v7655_v19 = vld [vmem:[%s10491_s1 + $0x440] ss:$8 sps:$4 sm:$0xff]   ;;  %v7658_v21 = vld [vmem:[%s10491_s1 + $0x454] ss:$8 sps:$4 sm:$0xff]   ;;  %v7661_v23 = vld [vmem:[%s10491_s1 + $0x450] ss:$8 sps:$4 sm:$0xff]  }
  0x15   : > { %2968 = vmatprep.subr.bf16.mxu0 %v7640_v9  ;;  %v7662_v24 = vld [vmem:[%s10491_s1 + $0x164] ss:$8 sps:$4 sm:$0xff]   ;;  %v7666_v26 = vld [vmem:[%s10491_s1 + $0x160] ss:$8 sps:$4 sm:$0xff]   ;;  %v7668_v28 = vld [vmem:[%s10491_s1 + $0x174] ss:$8 sps:$4 sm:$0xff]  }
  0x16   : > { %v7664_v25 = vld [vmem:[%s10491_s1 + $0x464] ss:$8 sps:$4 sm:$0xff]   ;;  %v7667_v27 = vld [vmem:[%s10491_s1 + $0x460] ss:$8 sps:$4 sm:$0xff]   ;;  %v7670_v29 = vld [vmem:[%s10491_s1 + $0x474] ss:$8 sps:$4 sm:$0xff]  }
  0x17   : > { %827 = vmatpush1.bf16.msra.mxu1 %v7642_v10  ;;  %v7672_v30 = vld [vmem:[%s10491_s1 + $0x170] ss:$8 sps:$4 sm:$0xff]   ;;  %v7674_v32 = vld [vmem:[%s10491_s1 + $0x184] ss:$8 sps:$4 sm:$0xff]   ;;  %p203_p3 = scmp.lt.s32.totalorder %s6472_s16, 1  ;;  %vm1373_vm1 = vcmask 1046528  }
  0x18   : > { %2969 = vmatpush1.bf16.msra.mxu0 %v7643_v11  ;;  %828 = vmatprep.subr.bf16.mxu1 %v7644_v12  ;;  %v7673_v31 = vld [vmem:[%s10491_s1 + $0x470] ss:$8 sps:$4 sm:$0xff]   ;;  %v7676_v33 = vld [vmem:[%s10491_s1 + $0x484] ss:$8 sps:$4 sm:$0xff]   ;;  %v7678_v34 = vld [vmem:[%s10491_s1 + $0x180] ss:$8 sps:$4 sm:$0xff]  }
  0x19   : > { %2970 = vmatprep.subr.bf16.mxu0 %v7646_v13  ;;  %v7679_v35 = vld [vmem:[%s10491_s1 + $0x480] ss:$8 sps:$4 sm:$0xff]   ;;  %v7680_v36 = vld [vmem:[%s10491_s1 + $0x194] ss:$8 sps:$4 sm:$0xff]   ;;  %s10573_s16 = smov (!%p203_p3, %s6472_s16), 1  ;;  %vm5797_vm2 = vcmask 1042432  }
  0x1a   : > { %v7682_v37 = vld [vmem:[%s10491_s1 + $0x494] ss:$8 sps:$4 sm:$0xff]   ;;  %v7684_v38 = vld [vmem:[%s10491_s1 + $0x190] ss:$8 sps:$4 sm:$0xff]   ;;  %v7686_v40 = vld [vmem:[%s10491_s1 + $0x1a4] ss:$8 sps:$4 sm:$0xff]  }
  0x1b   : > { %829 = vmatpush1.bf16.msra.mxu1 %v7648_v14  ;;  %v7685_v39 = vld [vmem:[%s10491_s1 + $0x490] ss:$8 sps:$4 sm:$0xff]   ;;  %s7168_s23 = sshll.u32 %s10573_s16, 8  ;;  %v7688_v41 = vld [vmem:[%s10491_s1 + $0x4a4] ss:$8 sps:$4 sm:$0xff]   ;;  %vm5882_vm3 = vcmask 1044482  }
  0x1c   : > { %2971 = vmatpush1.bf16.msra.mxu0 %v7649_v15  ;;  %830 = vmatprep.subr.bf16.mxu1 %v7650_v16  ;;  %v7690_v42 = vld [vmem:[%s10491_s1 + $0x1a0] ss:$8 sps:$4 sm:$0xff]   ;;  %s8355_s6 = scalar_lea.vmem %s10490_s0, %s7168_s23  ;;  %v7692_v44 = vld [vmem:[%s10491_s1 + $0x1b4] ss:$8 sps:$4 sm:$0xff]   ;;  %v7696_v46 = vld [vmem:[%s10491_s1 + $0x1b0] ss:$8 sps:$4 sm:$0xff]  }
  0x1d   : > { %2972 = vmatprep.subr.bf16.mxu0 %v7652_v17  ;;  %v7691_v43 = vld [vmem:[%s10491_s1 + $0x4a0] ss:$8 sps:$4 sm:$0xff]   ;;  %v7694_v45 = vld [vmem:[%s10491_s1 + $0x4b4] ss:$8 sps:$4 sm:$0xff]   ;;  %v7697_v47 = vld [vmem:[%s10491_s1 + $0x4b0] ss:$8 sps:$4 sm:$0xff]  }
  0x1e   : > { %v218_v48 = vld [vmem:[%s8355_s6] sm:$0xff]  ;;  %v219_v50 = vld [vmem:[%s8355_s6 + $0x8] sm:$0xff]  ;;  %v220_v51 = vld [vmem:[%s8355_s6 + $0x10] sm:$0xff]  ;;  %vm419_vm0 = vsmask.f32 7424  ;;  %vm5967_vm4 = vcmask 1046532  }
  0x1f   : > { %831 = vmatpush1.bf16.msra.mxu1 %v7654_v18  ;;  %v7698_v49 = vld [vmem:[%s10491_s1 + $0x1c4] ss:$8 sps:$4 sm:$0xff]   ;;  %v221_v52 = vld [vmem:[%s8355_s6 + $0x18] sm:$0xff]  ;;  %v8376_v53 = vcombine.high %v218_v48, %v219_v50  ;;  %v7702_v61 = vld [vmem:[%s10491_s1 + $0x1c0] ss:$8 sps:$4 sm:$0xff]   ;;  %v8397_v2 = vcombine.low %v218_v48, %v219_v50  ;;  %vm6052_vm5 = vcmask 1047558  }
  0x20   : > { %2973 = vmatpush1.bf16.msra.mxu0 %v7655_v19  ;;  %832 = vmatprep.subr.bf16.mxu1 %v7656_v20  ;;  %v8378_v54 = vcombine.high %v220_v51, %v221_v52  ;;  %v8381_v55 = vld [vmem:[%s8355_s6 + $0x24] ss:$8 sps:$4 sm:$0xff]   ;;  %v7703_v63 = vld [vmem:[%s10491_s1 + $0x4c0] ss:$8 sps:$4 sm:$0xff]   ;;  %v8399_v3 = vcombine.low %v220_v51, %v221_v52  ;;  %v7704_v4 = vld [vmem:[%s10491_s1 + $0x1d4] ss:$8 sps:$4 sm:$0xff]  }
  0x21   : > { %2974 = vmatprep.subr.bf16.mxu0 %v7658_v21  ;;  %v7700_v56 = vld [vmem:[%s10491_s1 + $0x4c4] ss:$8 sps:$4 sm:$0xff]   ;;  %v433_v57 = vshrl.u32 %v8376_v53, 16  ;;  %v435_v58 = vshll.u32 %v8376_v53, 16  ;;  %v2582_v62 = vshll.u32 %v8381_v55, 16  ;;  %v423_v14 = vshll.u32 %v8397_v2, 16 }
  0x22   : > { %v440_v59 = vshll.u32 %v8378_v54, 16  ;;  %v2575_v60 = vshrl.u32 %v8378_v54, 16  ;;  %v7706_v5 = vld [vmem:[%s10491_s1 + $0x4d4] ss:$8 sps:$4 sm:$0xff]   ;;  %v7708_v7 = vld [vmem:[%s10491_s1 + $0x1d0] ss:$8 sps:$4 sm:$0xff]  }
  0x23   : > { %833 = vmatpush1.bf16.msra.mxu1 %v7660_v22  ;;  %v437_v0 = vrot.slane %v435_v58, 1  ;;  %v2584_v6 = vrot.slane %v2582_v62, 1  ;;  %v7709_v10 = vld [vmem:[%s10491_s1 + $0x4d0] ss:$8 sps:$4 sm:$0xff]   ;;  %v7710_v11 = vld [vmem:[%s10491_s1 + $0x1e4] ss:$8 sps:$4 sm:$0xff]  }
  0x24   : > { %2975 = vmatpush1.bf16.msra.mxu0 %v7661_v23  ;;  %834 = vmatprep.subr.bf16.mxu1 %v7662_v24  ;;  %v442_v1 = vrot.slane %v440_v59, 1  ;;  %v428_v15 = vshll.u32 %v8399_v3, 16  ;;  %v7728_v16 = vld [vmem:[%s8355_s6 + $0x20] ss:$8 sps:$4 sm:$0xff]   ;;  %v7712_v17 = vld [vmem:[%s10491_s1 + $0x4e4] ss:$8 sps:$4 sm:$0xff]  }
  0x25   : > { %2976 = vmatprep.subr.bf16.mxu0 %v7664_v25  ;;  %v438_v8 = vor.u32 %v437_v0, %v433_v57  ;;  %v7714_v18 = vld [vmem:[%s10491_s1 + $0x1e0] ss:$8 sps:$4 sm:$0xff]   ;;  %v7732_v19 = vld [vmem:[%s8355_s6 + $0x34] ss:$8 sps:$4 sm:$0xff]   ;;  %v421_v22 = vshrl.u32 %v8397_v2, 16  ;;  %v425_v23 = vrot.slane %v423_v14, 1 }
  0x26   : > { %v2580_v9 = vor.u32 %v2575_v60, %v442_v1  ;;  %v7715_v20 = vld [vmem:[%s10491_s1 + $0x4e0] ss:$8 sps:$4 sm:$0xff]   ;;  %v7716_v21 = vld [vmem:[%s10491_s1 + $0x1f4] ss:$8 sps:$4 sm:$0xff]   ;;  %v430_v24 = vrot.slane %v428_v15, 1  ;;  %v2563_v25 = vshrl.u32 %v8399_v3, 16 }
  0x27   : > { %835 = vmatpush1.bf16.msra.mxu1 %v7666_v26  ;;  %v443_v12 = vsel %vm419_vm0, %v438_v8, %v442_v1  ;;  %v2570_v26 = vshll.u32 %v7728_v16, 16  ;;  %v7734_v48 = vld [vmem:[%s10491_s1 + $0x510] ss:$8 sps:$4 sm:$0xff]   ;;  %v2610_v50 = vshrl.u32 %v7732_v19, 16  ;;  %v7743_v52 = vld [vmem:[%s10491_s1 + $0x524] ss:$8 sps:$4 sm:$0xff]  }
  0x28   : > { %2977 = vmatpush1.bf16.msra.mxu0 %v7667_v27  ;;  %836 = vmatprep.subr.bf16.mxu1 %v7668_v28  ;;  %v2585_v13 = vsel %vm419_vm0, %v2580_v9, %v2584_v6  ;;  %v7718_v27 = vld [vmem:[%s10491_s1 + $0x4f4] ss:$8 sps:$4 sm:$0xff]   ;;  %v7720_v28 = vld [vmem:[%s10491_s1 + $0x1f0] ss:$8 sps:$4 sm:$0xff]   ;;  %v7746_v58 = vld [vmem:[%s8355_s6 + $0x40] ss:$8 sps:$4 sm:$0xff]  }
  0x29   : > { %2978 = vmatprep.subr.bf16.mxu0 %v7670_v29  ;;  %854 = vmatprep.mubr.bf16.mxu1 %v443_v12  ;;  %v2594_v29 = vshrl.u32 %v8381_v55, 16  ;;  %v7749_v55 = vld [vmem:[%s10491_s1 + $0x14] ss:$8 sps:$4 sm:$0xff]   ;;  %v7747_v62 = vld [vmem:[%s10491_s1 + $0x10] ss:$8 sps:$4 sm:$0xff]   ;;  %vm6054_vm6 = vcmask 1040384  }
  0x2a   : > { %2996 = vmatprep.mubr.bf16.mxu0 %v2585_v13  ;;  %v7756_v59 = vld [vmem:[%s8355_s6 + $0x54] ss:$8 sps:$4 sm:$0xff]   ;;  %v7741_v0 = vld [vmem:[%s10491_s1 + $0x520] ss:$8 sps:$4 sm:$0xff]   ;;  %v7750_v9 = vld [vmem:[%s10491_s1 + $0x530] ss:$8 sps:$4 sm:$0xff]  }
  0x2b   : > { %837 = vmatpush1.bf16.msra.mxu1 %v7672_v30  ;;  %v2598_v30 = vshll.u32 %v7732_v19, 16  ;;  %v8498_v12 = vld [vmem:[%s8355_s6 + $0x50] ss:$8 sps:$4 sm:$0xff]   ;;  %v7765_v19 = vld [vmem:[%s8355_s6 + $0x64] ss:$8 sps:$4 sm:$0xff]   ;;  %vm6342_vm7 = vcmask 1041408  }
  0x2c   : > { %2979 = vmatpush1.bf16.msra.mxu0 %v7673_v31  ;;  %838 = vmatprep.subr.bf16.mxu1 %v7674_v32  ;;  %v7721_v31 = vld [vmem:[%s10491_s1 + $0x4f0] ss:$8 sps:$4 sm:$0xff]   ;;  %v426_v32 = vor.u32 %v425_v23, %v421_v22  ;;  %v2622_v22 = vshll.u32 %v8498_v12, 16  ;;  %v7759_v23 = vld [vmem:[%s10491_s1 + $0x540] ss:$8 sps:$4 sm:$0xff]   ;;  %vm6367_vm8 = vcmask 1043456  }
  0x2d   : > { %2980 = vmatprep.subr.bf16.mxu0 %v7676_v33  ;;  %v2568_v33 = vor.u32 %v2563_v25, %v430_v24  ;;  %v7762_v25 = vld [vmem:[%s10491_s1 + $0x30] ss:$8 sps:$4 sm:$0xff]   ;;  %vm6380_vm9 = vcmask 1044480   ;;  %s7617_s3 = smul.u32 96, %s10573_s16 }
  0x2f   : > { %839 = vmatpush1.bf16.msra.mxu1 %v7678_v34  ;;  %v2572_v34 = vrot.slane %v2570_v26, 1  ;;  %v2642_v26 = vshrl.u32 %v7756_v59, 16  ;;  %s10078_s19 = scalar_lea.vmem %s10494_s4, %s7617_s3 }
  0x30   : > { %2981 = vmatpush1.bf16.msra.mxu0 %v7679_v35  ;;  %840 = vmatprep.subr.bf16.mxu1 %v7680_v36  ;;  %v7731_v35 = vld [vmem:[%s10491_s1 + $0x504] ss:$8 sps:$4 sm:$0xff]   ;;  %v7737_v36 = vld [vmem:[%s8355_s6 + $0x30] ss:$8 sps:$4 sm:$0xff]  }
  0x31   : > { %2982 = vmatprep.subr.bf16.mxu0 %v7682_v37  ;;  %v7740_v37 = vld [vmem:[%s10491_s1 + $0x4] ss:$8 sps:$4 sm:$0xff]   ;;  %v2602_v1 = vshrl.u32 %v7737_v36, 16 }
  0x33   : > { %841 = vmatpush1.bf16.msra.mxu1 %v7684_v38  ;;  %v2596_v38 = vor.u32 %v2594_v29, %v2584_v6  ;;  %v7773_v29 = vld [vmem:[%s10491_s1 + $0x44] ss:$8 sps:$4 sm:$0xff]  }
  0x34   : > { %2983 = vmatpush1.bf16.msra.mxu0 %v7685_v39  ;;  %842 = vmatprep.subr.bf16.mxu1 %v7686_v40  ;;  %v2600_v39 = vrot.slane %v2598_v30, 1  ;;  %v7744_v40 = vld [vmem:[%s8355_s6 + $0x44] ss:$8 sps:$4 sm:$0xff]   ;;  %v8523_v30 = vld [vmem:[%s8355_s6 + $0x60] ss:$8 sps:$4 sm:$0xff]  }
  0x35   : > { %2984 = vmatprep.subr.bf16.mxu0 %v7688_v41  ;;  %v431_v41 = vsel %vm419_vm0, %v426_v32, %v430_v24  ;;  %v2614_v51 = vshll.u32 %v7744_v40, 16  ;;  %v2626_v6 = vshrl.u32 %v7744_v40, 16 }
  0x36   : > { %v2612_v60 = vor.u32 %v2610_v50, %v2600_v39  ;;  %v8555_v50 = vld [vmem:[%s8355_s6 + $0x70] ss:$8 sps:$4 sm:$0xff]  }
  0x37   : > { %843 = vmatpush1.bf16.msra.mxu1 %v7690_v42  ;;  %v2573_v42 = vsel %vm419_vm0, %v2568_v33, %v2572_v34  ;;  %v2624_v33 = vrot.slane %v2622_v22, 1 }
  0x38   : > { %2985 = vmatpush1.bf16.msra.mxu0 %v7691_v43  ;;  %844 = vmatprep.subr.bf16.mxu1 %v7692_v44  ;;  %v7729_v43 = vld [vmem:[%s10491_s1 + $0x500] ss:$8 sps:$4 sm:$0xff]   ;;  %v2586_v44 = vshrl.u32 %v7728_v16, 16  ;;  %v7764_v16 = vld [vmem:[%s10491_s1 + $0x34] ss:$8 sps:$4 sm:$0xff]  }
  0x39   : > { %2986 = vmatprep.subr.bf16.mxu0 %v7694_v45  ;;  %v2590_v45 = vshll.u32 %v7737_v36, 16 }
  0x3b   : > { %845 = vmatpush1.bf16.msra.mxu1 %v7696_v46  ;;  %v7736_v46 = vld [vmem:[%s10491_s1 + $0x514] ss:$8 sps:$4 sm:$0xff]   ;;  %v2592_v57 = vrot.slane %v2590_v45, 1 }
  0x3c   : > { %2987 = vmatpush1.bf16.msra.mxu0 %v7697_v47  ;;  %846 = vmatprep.subr.bf16.mxu1 %v7698_v49  ;;  %v2601_v47 = vsel %vm419_vm0, %v2596_v38, %v2600_v39  ;;  %v7738_v49 = vld [vmem:[%s10491_s1] ss:$8 sps:$4 sm:$0xff]   ;;  %v7778_v38 = vld [vmem:[%s10491_s1 + $0x564] ss:$8 sps:$4 sm:$0xff]   ;;  %v7782_v39 = vld [vmem:[%s10491_s1 + $0x54] ss:$8 sps:$4 sm:$0xff]  }
  0x3d   : > { %2988 = vmatprep.subr.bf16.mxu0 %v7700_v56  ;;  %v2588_v56 = vor.u32 %v2586_v44, %v2572_v34  ;;  %v2604_v14 = vor.u32 %v2602_v1, %v2592_v57  ;;  %v7771_v34 = vld [vmem:[%s10491_s1 + $0x40] ss:$8 sps:$4 sm:$0xff]  }
  0x3e   : > { %v7792_v1 = vld [vmem:[%s10491_s1 + $0x580] ss:$8 sps:$4 sm:$0xff]  }
  0x3f   : > { %847 = vmatpush1.bf16.msra.mxu1 %v7702_v61  ;;  %v2616_v61 = vrot.slane %v2614_v51, 1 }
  0x40   : > { %2989 = vmatpush1.bf16.msra.mxu0 %v7703_v63  ;;  %848 = vmatprep.subr.bf16.mxu1 %v7704_v4  ;;  %v2593_v63 = vsel %vm419_vm0, %v2588_v56, %v2592_v57  ;;  %v2606_v4 = vshll.u32 %v7746_v58, 16 }
  0x41   : > { %2990 = vmatprep.subr.bf16.mxu0 %v7706_v5  ;;  %v7752_v5 = vld [vmem:[%s10491_s1 + $0x534] ss:$8 sps:$4 sm:$0xff]   ;;  %v2617_v8 = vsel %vm419_vm0, %v2612_v60, %v2616_v61  ;;  %v7794_v60 = vld [vmem:[%s10491_s1 + $0x584] ss:$8 sps:$4 sm:$0xff]  }
  0x42   : > { %v2608_v15 = vrot.slane %v2606_v4, 1 }
  0x43   : > { %849 = vmatpush1.bf16.msra.mxu1 %v7708_v7  ;;  %v2630_v7 = vshll.u32 %v7756_v59, 16  ;;  %v7789_v59 = vld [vmem:[%s10491_s1 + $0x60] ss:$8 sps:$4 sm:$0xff]  }
  0x44   : > { %2991 = vmatpush1.bf16.msra.mxu0 %v7709_v10  ;;  %850 = vmatprep.subr.bf16.mxu1 %v7710_v11  ;;  %v7753_v10 = vld [vmem:[%s10491_s1 + $0x20] ss:$8 sps:$4 sm:$0xff]   ;;  %v7755_v11 = vld [vmem:[%s10491_s1 + $0x24] ss:$8 sps:$4 sm:$0xff]  }
  0x45   : > { %2992 = vmatprep.subr.bf16.mxu0 %v7712_v17  ;;  %v2628_v17 = vor.u32 %v2626_v6, %v2616_v61  ;;  %v7799_v61 = vld [vmem:[%s10491_s1 + $0x74] ss:$8 sps:$4 sm:$0xff]  }
  0x47   : > { %851 = vmatpush1.bf16.msra.mxu1 %v7714_v18  ;;  %v2632_v18 = vrot.slane %v2630_v7, 1  ;;  %v7797_v7 = vld [vmem:[%s10491_s1 + $0x70] ss:$8 sps:$4 sm:$0xff]  }
  0x48   : > { %2993 = vmatpush1.bf16.msra.mxu0 %v7715_v20  ;;  %852 = vmatprep.subr.bf16.mxu1 %v7716_v21  ;;  %v2609_v20 = vsel %vm419_vm0, %v2604_v14, %v2608_v15  ;;  %v2618_v21 = vshrl.u32 %v7746_v58, 16  ;;  %v7786_v58 = vld [vmem:[%s8355_s6 + $0x84] ss:$8 sps:$4 sm:$0xff]  }
  0x49   : > { %2994 = vmatprep.subr.bf16.mxu0 %v7718_v27  ;;  %v2633_v24 = vsel %vm419_vm0, %v2628_v17, %v2632_v18  ;;  %v2646_v27 = vshll.u32 %v7765_v19, 16  ;;  %v2678_v6 = vshll.u32 %v7786_v58, 16  ;;  %v7804_v17 = vld [vmem:[%s10491_s1 + $0x80] ss:$8 sps:$4 sm:$0xff]  }
  0x4a   : > { %v2620_v32 = vor.u32 %v2618_v21, %v2608_v15  ;;  %v2666_v21 = vshrl.u32 %v8555_v50, 16 }
  0x4b   : > { %853 = vmatpush1.bf16.msra.mxu1 %v7720_v28  ;;  %v7770_v28 = vld [vmem:[%s10491_s1 + $0x554] ss:$8 sps:$4 sm:$0xff]   ;;  %v2648_v36 = vrot.slane %v2646_v27, 1  ;;  %v2680_v15 = vrot.slane %v2678_v6, 1  ;;  %v7813_v27 = vld [vmem:[%s10491_s1 + $0x90] ss:$8 sps:$4 sm:$0xff]  }
  0x4c   : > { %2995 = vmatpush1.bf16.msra.mxu0 %v7721_v31  ;;  %1171 = vmatprep.subr.bf16.mxu1 %v7740_v37  ;;  %v7768_v31 = vld [vmem:[%s10491_s1 + $0x550] ss:$8 sps:$4 sm:$0xff]   ;;  %v7774_v37 = vld [vmem:[%s8355_s6 + $0x74] ss:$8 sps:$4 sm:$0xff]   ;;  %v2625_v40 = vsel %vm419_vm0, %v2620_v32, %v2624_v33 }
  0x4d   : > { %3458 = vmatprep.subr.bf16.mxu0 %v7731_v35  ;;  %v2644_v35 = vor.u32 %v2642_v26, %v2632_v18  ;;  %v2662_v45 = vshll.u32 %v7774_v37, 16  ;;  %v7812_v18 = vld [vmem:[%s10491_s1 + $0x5a4] ss:$8 sps:$4 sm:$0xff]   ;;  %v2690_v26 = vshrl.u32 %v7786_v58, 16 }
  0x4e   : > { %855 = vmatmul.mubr.bf16.vlgmr.msra.gmra.mrb[0].mxu1 %v431_v41  ;;  %v2634_v41 = vshrl.u32 %v8498_v12, 16 }
  0x4f   : > { %2997 = vmatmul.mubr.bf16.vlgmr.msra.gmra.mrb[0].mxu0 %v2573_v42  ;;  %864 = vmatprep.mubr.bf16.mxu1 %v2585_v13  ;;  %v7761_v13 = vld [vmem:[%s10491_s1 + $0x544] ss:$8 sps:$4 sm:$0xff]   ;;  %v2649_v44 = vsel %vm419_vm0, %v2644_v35, %v2648_v36  ;;  %v2664_v57 = vrot.slane %v2662_v45, 1  ;;  %v2692_v35 = vor.u32 %v2690_v26, %v2680_v15 }
  0x50   : > { %3459 = vmatpush1.bf16.msra.mxu0 %v7729_v43  ;;  %3006 = vmatprep.mubr.bf16.mxu0 %v2601_v47  ;;  %v2658_v43 = vshrl.u32 %v7765_v19, 16  ;;  %v2636_v51 = vor.u32 %v2634_v41, %v2624_v33  ;;  %v7815_v19 = vld [vmem:[%s10491_s1 + $0x94] ss:$8 sps:$4 sm:$0xff]  }
  0x51   : > { %3460 = vmatprep.subr.bf16.mxu0 %v7736_v46  ;;  %1172 = vmatpush1.bf16.msra.mxu1 %v7738_v49  ;;  %v7776_v46 = vld [vmem:[%s10491_s1 + $0x560] ss:$8 sps:$4 sm:$0xff]   ;;  %v7791_v49 = vld [vmem:[%s10491_s1 + $0x64] ss:$8 sps:$4 sm:$0xff]  }
  0x52   : > { %1173 = vmatprep.subr.bf16.mxu1 %v7749_v55  ;;  %v7783_v55 = vld [vmem:[%s10491_s1 + $0x570] ss:$8 sps:$4 sm:$0xff]   ;;  %v2660_v56 = vor.u32 %v2658_v43, %v2648_v36 }
  0x53   : > { %v7819_v36 = vld [vmem:[%s10491_s1 + $0x5b0] ss:$8 sps:$4 sm:$0xff]  }
  0x54   : > { %3461 = vmatpush1.bf16.msra.mxu0 %v7734_v48  ;;  %v7785_v48 = vld [vmem:[%s10491_s1 + $0x574] ss:$8 sps:$4 sm:$0xff]   ;;  %v2665_v4 = vsel %vm419_vm0, %v2660_v56, %v2664_v57  ;;  %v7834_v56 = vld [vmem:[%s10491_s1 + $0x5d0] ss:$8 sps:$4 sm:$0xff]  }
  0x55   : > { %3462 = vmatprep.subr.bf16.mxu0 %v7743_v52  ;;  %1174 = vmatpush1.bf16.msra.mxu1 %v7747_v62 }
  0x56   : > { %865 = vmatmul.mubr.bf16.gmra.mrb[4].mxu1 %v2573_v42  ;;  %1175 = vmatprep.subr.bf16.mxu1 %v7755_v11  ;;  %v2638_v42 = vshll.u32 %v8523_v30, 16 }
  0x57   : > { %3007 = vmatmul.mubr.bf16.gmra.mrb[4].mxu0 %v2593_v63  ;;  %874 = vmatprep.mubr.bf16.mxu1 %v2601_v47  ;;  %v7780_v47 = vld [vmem:[%s10491_s1 + $0x50] ss:$8 sps:$4 sm:$0xff]  }
  0x58   : > { %3463 = vmatpush1.bf16.msra.mxu0 %v7741_v0  ;;  %3016 = vmatprep.mubr.bf16.mxu0 %v2617_v8  ;;  %v2640_v52 = vrot.slane %v2638_v42, 1  ;;  %v2654_v0 = vshll.u32 %v8555_v50, 16  ;;  %v8658_v50 = vld [vmem:[%s8355_s6 + $0xa0] ss:$8 sps:$4 sm:$0xff]  }
  0x59   : > { %3464 = vmatprep.subr.bf16.mxu0 %v7752_v5  ;;  %1176 = vmatpush1.bf16.msra.mxu1 %v7753_v10  ;;  %v2674_v5 = vshrl.u32 %v7774_v37, 16  ;;  %v8587_v10 = vld [vmem:[%s8355_s6 + $0x80] ss:$8 sps:$4 sm:$0xff]  }
  0x5a   : > { %1177 = vmatprep.subr.bf16.mxu1 %v7764_v16  ;;  %v2641_v62 = vsel %vm419_vm0, %v2636_v51, %v2640_v52  ;;  %v2656_v12 = vrot.slane %v2654_v0, 1  ;;  %v7801_v16 = vld [vmem:[%s10491_s1 + $0x590] ss:$8 sps:$4 sm:$0xff]   ;;  %v2670_v22 = vshll.u32 %v8587_v10, 16  ;;  %v7822_v37 = vld [vmem:[%s10491_s1 + $0xa0] ss:$8 sps:$4 sm:$0xff]  }
  0x5b   : > { %v2676_v14 = vor.u32 %v2674_v5, %v2664_v57  ;;  %v2682_v41 = vshrl.u32 %v8587_v10, 16  ;;  %v2702_v0 = vshll.u32 %v8658_v50, 16  ;;  %v8694_v10 = vld [vmem:[%s8355_s6 + $0xb0] ss:$8 sps:$4 sm:$0xff]  }
  0x5c   : > { %3465 = vmatpush1.bf16.msra.mxu0 %v7750_v9  ;;  %v7806_v9 = vld [vmem:[%s10491_s1 + $0x84] ss:$8 sps:$4 sm:$0xff]   ;;  %v2672_v32 = vrot.slane %v2670_v22, 1  ;;  %v2714_v22 = vshrl.u32 %v8658_v50, 16 }
  0x5d   : > { %3466 = vmatprep.subr.bf16.mxu0 %v7761_v13  ;;  %1178 = vmatpush1.bf16.msra.mxu1 %v7762_v25  ;;  %v8590_v13 = vld [vmem:[%s8355_s6 + $0x94] ss:$8 sps:$4 sm:$0xff]   ;;  %v2681_v25 = vsel %vm419_vm0, %v2676_v14, %v2680_v15  ;;  %v7852_v14 = vld [vmem:[%s10491_s1 + $0xe0] ss:$8 sps:$4 sm:$0xff]  }
  0x5e   : > { %875 = vmatmul.mubr.bf16.gmra.mrb[8].mxu1 %v2593_v63  ;;  %1179 = vmatprep.subr.bf16.mxu1 %v7773_v29  ;;  %v2650_v63 = vshrl.u32 %v8523_v30, 16  ;;  %v7824_v29 = vld [vmem:[%s10491_s1 + $0xa4] ss:$8 sps:$4 sm:$0xff]   ;;  %v8622_v30 = vld [vmem:[%s8355_s6 + $0x90] ss:$8 sps:$4 sm:$0xff]   ;;  %v2706_v43 = vshrl.u32 %v8590_v13, 16  ;;  %v2684_v51 = vor.u32 %v2682_v41, %v2672_v32 }
  0x5f   : > { %3017 = vmatmul.mubr.bf16.gmra.mrb[8].mxu0 %v2609_v20  ;;  %884 = vmatprep.mubr.bf16.mxu1 %v2617_v8  ;;  %v7803_v8 = vld [vmem:[%s10491_s1 + $0x594] ss:$8 sps:$4 sm:$0xff]   ;;  %v2686_v42 = vshll.u32 %v8622_v30, 16 }
  0x60   : > { %3026 = vmatprep.mubr.bf16.mxu0 %v2633_v24  ;;  %3467 = vmatpush1.bf16.msra.mxu0 %v7759_v23  ;;  %v2652_v11 = vor.u32 %v2650_v63, %v2640_v52  ;;  %v2694_v23 = vshll.u32 %v8590_v13, 16  ;;  %v2698_v63 = vshrl.u32 %v8622_v30, 16  ;;  %v8697_v13 = vld [vmem:[%s8355_s6 + $0xc4] ss:$8 sps:$4 sm:$0xff]  }
  0x61   : > { %3468 = vmatprep.subr.bf16.mxu0 %v7770_v28  ;;  %1180 = vmatpush1.bf16.msra.mxu1 %v7771_v34  ;;  %v7821_v28 = vld [vmem:[%s10491_s1 + $0x5b4] ss:$8 sps:$4 sm:$0xff]   ;;  %v8625_v34 = vld [vmem:[%s8355_s6 + $0xa4] ss:$8 sps:$4 sm:$0xff]   ;;  %v2688_v52 = vrot.slane %v2686_v42, 1  ;;  %v2742_v26 = vshll.u32 %v8697_v13, 16 }
  0x62   : > { %1181 = vmatprep.subr.bf16.mxu1 %v7782_v39  ;;  %v2696_v33 = vrot.slane %v2694_v23, 1  ;;  %v7833_v39 = vld [vmem:[%s10491_s1 + $0xb4] ss:$8 sps:$4 sm:$0xff]   ;;  %v2718_v23 = vshll.u32 %v8694_v10, 16  ;;  %v7872_v30 = vld [vmem:[%s10491_s1 + $0x204] ss:$8 sps:$4 sm:$0xff]  }
  0x63   : > { %v2730_v42 = vshrl.u32 %v8694_v10, 16 }
  0x64   : > { %3469 = vmatpush1.bf16.msra.mxu0 %v7768_v31  ;;  %v2668_v31 = vor.u32 %v2666_v21, %v2656_v12  ;;  %v2697_v45 = vsel %vm419_vm0, %v2692_v35, %v2696_v33  ;;  %v2708_v57 = vor.u32 %v2706_v43, %v2696_v33  ;;  %v8728_v33 = vld [vmem:[%s8355_s6 + $0xc0] ss:$8 sps:$4 sm:$0xff]  }
  0x65   : > { %3470 = vmatprep.subr.bf16.mxu0 %v7778_v38  ;;  %1182 = vmatpush1.bf16.msra.mxu1 %v7780_v47  ;;  %v7827_v38 = vld [vmem:[%s10491_s1 + $0x5c4] ss:$8 sps:$4 sm:$0xff]   ;;  %v7831_v47 = vld [vmem:[%s10491_s1 + $0xb0] ss:$8 sps:$4 sm:$0xff]  }
  0x66   : > { %885 = vmatmul.mubr.bf16.gmra.mrb[12].mxu1 %v2609_v20  ;;  %1183 = vmatprep.subr.bf16.mxu1 %v7791_v49  ;;  %v2657_v20 = vsel %vm419_vm0, %v2652_v11, %v2656_v12  ;;  %v7841_v49 = vld [vmem:[%s10491_s1 + $0xc4] ss:$8 sps:$4 sm:$0xff]   ;;  %v2700_v11 = vor.u32 %v2698_v63, %v2688_v52  ;;  %v2704_v12 = vrot.slane %v2702_v0, 1 }
  0x67   : > { %3027 = vmatmul.mubr.bf16.gmra.mrb[12].mxu0 %v2625_v40  ;;  %894 = vmatprep.mubr.bf16.mxu1 %v2633_v24  ;;  %v7810_v24 = vld [vmem:[%s10491_s1 + $0x5a0] ss:$8 sps:$4 sm:$0xff]  }
  0x68   : > { %3036 = vmatprep.mubr.bf16.mxu0 %v2649_v44  ;;  %3471 = vmatpush1.bf16.msra.mxu0 %v7776_v46  ;;  %v2710_v46 = vshll.u32 %v8625_v34, 16  ;;  %v2705_v21 = vsel %vm419_vm0, %v2700_v11, %v2704_v12 }
  0x69   : > { %3472 = vmatprep.subr.bf16.mxu0 %v7785_v48  ;;  %1184 = vmatpush1.bf16.msra.mxu1 %v7789_v59  ;;  %v7836_v48 = vld [vmem:[%s10491_s1 + $0x5d4] ss:$8 sps:$4 sm:$0xff]   ;;  %v7839_v59 = vld [vmem:[%s10491_s1 + $0xc0] ss:$8 sps:$4 sm:$0xff]  }
  0x6a   : > { %1185 = vmatprep.subr.bf16.mxu1 %v7799_v61  ;;  %v2712_v58 = vrot.slane %v2710_v46, 1  ;;  %v7848_v61 = vld [vmem:[%s10491_s1 + $0xd4] ss:$8 sps:$4 sm:$0xff]  }
  0x6c   : > { %3473 = vmatpush1.bf16.msra.mxu0 %v7783_v55  ;;  %v8661_v55 = vld [vmem:[%s8355_s6 + $0xb4] ss:$8 sps:$4 sm:$0xff]   ;;  %v2713_v5 = vsel %vm419_vm0, %v2708_v57, %v2712_v58 }
  0x6d   : > { %3474 = vmatprep.subr.bf16.mxu0 %v7794_v60  ;;  %1186 = vmatpush1.bf16.msra.mxu1 %v7797_v7  ;;  %v7845_v60 = vld [vmem:[%s10491_s1 + $0x5e4] ss:$8 sps:$4 sm:$0xff]   ;;  %v2726_v6 = vshll.u32 %v8661_v55, 16  ;;  %v7846_v7 = vld [vmem:[%s10491_s1 + $0xd0] ss:$8 sps:$4 sm:$0xff]  }
  0x6e   : > { %895 = vmatmul.mubr.bf16.gmra.mrb[16].mxu1 %v2625_v40  ;;  %1187 = vmatprep.subr.bf16.mxu1 %v7806_v9  ;;  %v2673_v40 = vsel %vm419_vm0, %v2668_v31, %v2672_v32  ;;  %v7858_v9 = vld [vmem:[%s10491_s1 + $0x5f4] ss:$8 sps:$4 sm:$0xff]   ;;  %v2716_v31 = vor.u32 %v2714_v22, %v2704_v12  ;;  %v2720_v32 = vrot.slane %v2718_v23, 1 }
  0x6f   : > { %3037 = vmatmul.mubr.bf16.gmra.mrb[16].mxu0 %v2641_v62  ;;  %904 = vmatprep.mubr.bf16.mxu1 %v2649_v44  ;;  %v7825_v44 = vld [vmem:[%s10491_s1 + $0x5c0] ss:$8 sps:$4 sm:$0xff]  }
  0x70   : > { %3046 = vmatprep.mubr.bf16.mxu0 %v2665_v4  ;;  %3475 = vmatpush1.bf16.msra.mxu0 %v7792_v1  ;;  %v2722_v1 = vshrl.u32 %v8625_v34, 16  ;;  %v2721_v43 = vsel %vm419_vm0, %v2716_v31, %v2720_v32 }
  0x71   : > { %3476 = vmatprep.subr.bf16.mxu0 %v7803_v8  ;;  %1188 = vmatpush1.bf16.msra.mxu1 %v7804_v17  ;;  %v7854_v8 = vld [vmem:[%s10491_s1 + $0xe4] ss:$8 sps:$4 sm:$0xff]   ;;  %v7856_v17 = vld [vmem:[%s10491_s1 + $0x5f0] ss:$8 sps:$4 sm:$0xff]  }
  0x72   : > { %1189 = vmatprep.subr.bf16.mxu1 %v7815_v19  ;;  %v2724_v15 = vor.u32 %v2722_v1, %v2712_v58  ;;  %v7866_v19 = vld [vmem:[%s10491_s1 + $0x604] ss:$8 sps:$4 sm:$0xff]  }
  0x74   : > { %3477 = vmatpush1.bf16.msra.mxu0 %v7801_v16  ;;  %v2728_v16 = vrot.slane %v2726_v6, 1 }
  0x75   : > { %3478 = vmatprep.subr.bf16.mxu0 %v7812_v18  ;;  %1190 = vmatpush1.bf16.msra.mxu1 %v7813_v27  ;;  %v7861_v18 = vld [vmem:[%s10491_s1 + $0xf4] ss:$8 sps:$4 sm:$0xff]  }
  0x76   : > { %905 = vmatmul.mubr.bf16.gmra.mrb[20].mxu1 %v2641_v62  ;;  %1191 = vmatprep.subr.bf16.mxu1 %v7824_v29  ;;  %v2689_v62 = vsel %vm419_vm0, %v2684_v51, %v2688_v52  ;;  %v8719_v27 = vld [vmem:[%s8355_s6 + $0xd4] ss:$8 sps:$4 sm:$0xff]  }
  0x77   : > { %3047 = vmatmul.mubr.bf16.gmra.mrb[20].mxu0 %v2657_v20  ;;  %914 = vmatprep.mubr.bf16.mxu1 %v2665_v4  ;;  %v7843_v4 = vld [vmem:[%s10491_s1 + $0x5e0] ss:$8 sps:$4 sm:$0xff]   ;;  %v3266_v35 = vrot.slane %v8719_v27, 1  ;;  %v276_v51 = vld [vmem:[%s8355_s6 + $0xd0] sm:$0x11] }
  0x78   : > { %3056 = vmatprep.mubr.bf16.mxu0 %v2681_v25  ;;  %3479 = vmatpush1.bf16.msra.mxu0 %v7810_v24  ;;  %v2738_v24 = vshrl.u32 %v8661_v55, 16 }
  0x79   : > { %3480 = vmatprep.subr.bf16.mxu0 %v7821_v28  ;;  %1192 = vmatpush1.bf16.msra.mxu1 %v7822_v37  ;;  %v7859_v28 = vld [vmem:[%s10491_s1 + $0xf0] ss:$8 sps:$4 sm:$0xff]  }
  0x7a   : > { %1193 = vmatprep.subr.bf16.mxu1 %v7833_v39  ;;  %v2740_v37 = vor.u32 %v2738_v24, %v2728_v16  ;;  %v8732_v39 = vld [vmem:[%s8355_s6 + $0xd0] ss:$8 sps:$4 sm:$0xff]  }
  0x7b   : > { %v2750_v63 = vshll.u32 %v8732_v39, 16 }
  0x7c   : > { %3481 = vmatpush1.bf16.msra.mxu0 %v7819_v36 }
  0x7d   : > { %3482 = vmatprep.subr.bf16.mxu0 %v7827_v38  ;;  %1194 = vmatpush1.bf16.msra.mxu1 %v7831_v47  ;;  %v2744_v38 = vrot.slane %v2742_v26, 1 }
  0x7e   : > { %915 = vmatmul.mubr.bf16.gmra.mrb[24].mxu1 %v2657_v20  ;;  %1195 = vmatprep.subr.bf16.mxu1 %v7841_v49  ;;  %v2419_v20 = vld [vmem:[%s8355_s6 + $0xe0] sm:$0x11]  ;;  %v2758_v49 = vshll.u32 %v8719_v27, 16 }
  0x7f   : > { %3057 = vmatmul.mubr.bf16.gmra.mrb[24].mxu0 %v2673_v40  ;;  %924 = vmatprep.mubr.bf16.mxu1 %v2681_v25  ;;  %v2729_v25 = vsel %vm419_vm0, %v2724_v15, %v2728_v16  ;;  %v6819_v29 = vcombine.high %v2419_v20, %v2419_v20  ;;  %v2745_v47 = vsel %vm419_vm0, %v2740_v37, %v2744_v38 }
  0x80   : > { %3066 = vmatprep.mubr.bf16.mxu0 %v2697_v45  ;;  %3483 = vmatpush1.bf16.msra.mxu0 %v7825_v44  ;;  %v2734_v44 = vshll.u32 %v8728_v33, 16 }
  0x81   : > { %3484 = vmatprep.subr.bf16.mxu0 %v7836_v48  ;;  %1196 = vmatpush1.bf16.msra.mxu1 %v7839_v59  ;;  %v3270_v36 = vrot.slane %v6819_v29, 1  ;;  %v2754_v48 = vshrl.u32 %v8697_v13, 16  ;;  %v2760_v59 = vrot.slane %v2758_v49, 1  ;;  %v7867_v49 = vld [vmem:[%s10491_s1 + $0x610] ss:$8 sps:$4 sm:$0xff]  }
  0x82   : > { %1197 = vmatprep.subr.bf16.mxu1 %v7848_v61  ;;  %v2736_v57 = vrot.slane %v2734_v44, 1 }
  0x83   : > { %v8737_v41 = vsel %vm1373_vm1, %v3266_v35, %v3270_v36  ;;  %v2756_v58 = vor.u32 %v2754_v48, %v2744_v38  ;;  %v8153_v38 = vld [vmem:[%s8355_s6 + $0x20] ss:$8 sps:$4 sm:$0xff]  }
  0x84   : > { %3485 = vmatpush1.bf16.msra.mxu0 %v7834_v56  ;;  %v2732_v56 = vor.u32 %v2730_v42, %v2720_v32  ;;  %v7864_v42 = vld [vmem:[%s10491_s1 + $0x600] ss:$8 sps:$4 sm:$0xff]  }
  0x85   : > { %3486 = vmatprep.subr.bf16.mxu0 %v7845_v60  ;;  %1198 = vmatpush1.bf16.msra.mxu1 %v7846_v7  ;;  %v8752_v60 = vcombine.high %v276_v51, %v276_v51  ;;  %v2761_v0 = vsel %vm419_vm0, %v2756_v58, %v2760_v59  ;;  %v2752_v7 = vrot.slane %v2750_v63, 1  ;;  %v7881_v63 = vld [vmem:[%s10491_s1 + $0x634] ss:$8 sps:$4 sm:$0xff]  }
  0x86   : > { %925 = vmatmul.mubr.bf16.gmra.mrb[28].mxu1 %v2673_v40  ;;  %1199 = vmatprep.subr.bf16.mxu1 %v7854_v8  ;;  %v6818_v40 = vcombine.low %v2419_v20, %v2419_v20  ;;  %v2737_v61 = vsel %vm419_vm0, %v2732_v56, %v2736_v57  ;;  %v8760_v8 = vcombine.low %v276_v51, %v276_v51  ;;  %v7878_v51 = vld [vmem:[%s10491_s1 + $0x214] ss:$8 sps:$4 sm:$0xff]   ;;  %v8805_v56 = vld [vmem:[%s8355_s6 + $0x30] ss:$8 sps:$4 sm:$0xff]  }
  0x87   : > { %3067 = vmatmul.mubr.bf16.gmra.mrb[28].mxu0 %v2689_v62  ;;  %934 = vmatprep.mubr.bf16.mxu1 %v2697_v45  ;;  %v3264_v45 = vrot.slane %v8732_v39, 1  ;;  %v632_v1 = vshll.u32 %v8752_v60, 16 }
  0x88   : > { %3076 = vmatprep.mubr.bf16.mxu0 %v2713_v5  ;;  %3487 = vmatpush1.bf16.msra.mxu0 %v7843_v4  ;;  %v3268_v46 = vrot.slane %v6818_v40, 1  ;;  %v2770_v4 = vshrl.u32 %v8719_v27, 16  ;;  %v624_v16 = vshll.u32 %v8760_v8, 16 }
  0x89   : > { %3488 = vmatprep.subr.bf16.mxu0 %v7858_v9  ;;  %1200 = vmatpush1.bf16.msra.mxu1 %v7852_v14  ;;  %v634_v9 = vrot.slane %v632_v1, 1  ;;  %v3179_v14 = vld [vmem:[%s8355_s6 + $0x10] sm:$0xee]  ;;  %v7884_v1 = vld [vmem:[%s10491_s1 + $0x224] ss:$8 sps:$4 sm:$0xff]  }
  0x8a   : > { %1201 = vmatprep.subr.bf16.mxu1 %v7861_v18  ;;  %v8750_v52 = vsel %vm1373_vm1, %v3264_v45, %v3268_v46  ;;  %v2772_v11 = vor.u32 %v2770_v4, %v2760_v59  ;;  %v2766_v18 = vshll.u32 %v6818_v40, 16  ;;  %v626_v23 = vrot.slane %v624_v16, 1  ;;  %v7869_v46 = vld [vmem:[%s10491_s1 + $0x614] ss:$8 sps:$4 sm:$0xff]   ;;  %v7873_v59 = vld [vmem:[%s10491_s1 + $0x620] ss:$8 sps:$4 sm:$0xff]  }
  0x8b   : > { %v8778_v40 = vrot.slane %v8153_v38, 1  ;;  %v7885_v16 = vld [vmem:[%s10491_s1 + $0x640] ss:$8 sps:$4 sm:$0xff]  }
  0x8c   : > { %3489 = vmatpush1.bf16.msra.mxu0 %v7856_v17  ;;  %v2762_v17 = vshrl.u32 %v8732_v39, 16 }
  0x8d   : > { %4022 = vmatprep.subr.bf16.mxu0 %v7866_v19  ;;  %1202 = vmatpush1.bf16.msra.mxu1 %v7859_v28  ;;  %v635_v19 = vsel %vm419_vm0, %v2756_v58, %v634_v9  ;;  %v8152_v28 = vld [vmem:[%s8355_s6 + $0x24] ss:$8 sps:$4 sm:$0xff]   ;;  %v7876_v58 = vld [vmem:[%s10491_s1 + $0x210] ss:$8 sps:$4 sm:$0xff]  }
  0x8e   : > { %935 = vmatmul.mubr.bf16.gmra.mrb[32].mxu1 %v2689_v62  ;;  %1614 = vmatprep.subr.bf16.mxu1 %v7872_v30  ;;  %v2746_v62 = vshrl.u32 %v8728_v33, 16  ;;  %v2764_v24 = vor.u32 %v2762_v17, %v2752_v7  ;;  %v7879_v9 = vld [vmem:[%s10491_s1 + $0x630] ss:$8 sps:$4 sm:$0xff]  }
  0x8f   : > { %3077 = vmatmul.mubr.bf16.gmra.mrb[32].mxu0 %v2705_v21  ;;  %944 = vmatprep.mubr.bf16.mxu1 %v2713_v5  ;;  %v2774_v5 = vshll.u32 %v6819_v29, 16  ;;  %v8770_v29 = vrot.slane %v8152_v28, 1  ;;  %v7888_v17 = vld [vmem:[%s10491_s1 + $0x230] ss:$8 sps:$4 sm:$0xff]  }
  0x90   : > { %3086 = vmatprep.mubr.bf16.mxu0 %v2729_v25  ;;  %v2748_v6 = vor.u32 %v2746_v62, %v2736_v57  ;;  %v3224_v57 = vrot.slane %v8805_v56, 1 }
  0x91   : > { %v2776_v12 = vrot.slane %v2774_v5, 1  ;;  %v7882_v5 = vld [vmem:[%s10491_s1 + $0x220] ss:$8 sps:$4 sm:$0xff]  }
  0x92   : > { %v2753_v15 = vsel %vm419_vm0, %v2748_v6, %v2752_v7  ;;  %v627_v30 = vsel %vm419_vm0, %v2748_v6, %v626_v23  ;;  %v8841_v6 = vld [vmem:[%s8355_s6 + $0x40] ss:$8 sps:$4 sm:$0xff]  }
  0x93   : > { %v2777_v20 = vsel %vm419_vm0, %v2772_v11, %v2776_v12  ;;  %v3228_v7 = vrot.slane %v8841_v6, 1  ;;  %v7890_v11 = vld [vmem:[%s10491_s1 + $0x234] ss:$8 sps:$4 sm:$0xff]   ;;  %v7894_v23 = vld [vmem:[%s10491_s1 + $0x240] ss:$8 sps:$4 sm:$0xff]  }
  0x94   : > { %v8852_v12 = vld [vmem:[%s8355_s6 + $0x54] ss:$8 sps:$4 sm:$0xff]  }
  0x96   : > { %945 = vmatmul.mubr.bf16.gmra.mrb[36].mxu1 %v2705_v21  ;;  %v8151_v21 = vld [vmem:[%s8355_s6 + $0x18] sm:$0xff] }
  0x97   : > { %3087 = vmatmul.mubr.bf16.gmra.mrb[36].mxu0 %v2721_v43  ;;  %954 = vmatprep.mubr.bf16.mxu1 %v2729_v25  ;;  %v6885_v22 = vcombine.high %v3179_v14, %v8151_v21  ;;  %v2768_v25 = vrot.slane %v2766_v18, 1  ;;  %v6884_v32 = vcombine.low %v3179_v14, %v8151_v21  ;;  %v3234_v14 = vrot.slane %v8852_v12, 1  ;;  %v7896_v21 = vld [vmem:[%s10491_s1 + $0x244] ss:$8 sps:$4 sm:$0xff]  }
  0x98   : > { %3096 = vmatprep.mubr.bf16.mxu0 %v2745_v47  ;;  %v8865_v18 = vsel %vm1373_vm1, %v3224_v57, %v3228_v7 }
  0x99   : > { %v3221_v26 = vrot.slane %v6885_v22, 1  ;;  %v2769_v31 = vsel %vm419_vm0, %v2764_v24, %v2768_v25  ;;  %v3218_v37 = vrot.slane %v6884_v32, 1  ;;  %v7891_v22 = vld [vmem:[%s10491_s1 + $0x650] ss:$8 sps:$4 sm:$0xff]   ;;  %v7897_v32 = vld [vmem:[%s10491_s1 + $0x660] ss:$8 sps:$4 sm:$0xff]  }
  0x9a   : > { %v8885_v24 = vld [vmem:[%s8355_s6 + $0x50] ss:$8 sps:$4 sm:$0xff]  }
  0x9b   : > { %v3223_v36 = vsel %vm1373_vm1, %v3221_v26, %v8770_v29  ;;  %v3232_v25 = vrot.slane %v8885_v24, 1  ;;  %v7899_v26 = vld [vmem:[%s10491_s1 + $0x664] ss:$8 sps:$4 sm:$0xff]  }
  0x9e   : > { %955 = vmatmul.mubr.bf16.gmra.mrb[40].mxu1 %v2721_v43  ;;  %v8154_v43 = vld [vmem:[%s8355_s6 + $0x34] ss:$8 sps:$4 sm:$0xff]  }
  0x9f   : > { %3097 = vmatmul.mubr.bf16.gmra.mrb[40].mxu0 %v2737_v61  ;;  %964 = vmatprep.mubr.bf16.mxu1 %v2745_v47  ;;  %v3226_v44 = vrot.slane %v8154_v43, 1  ;;  %v3220_v47 = vsel %vm1373_vm1, %v3218_v37, %v8778_v40  ;;  %v8905_v37 = vsel %vm1373_vm1, %v3228_v7, %v3232_v25  ;;  %v7915_v7 = vld [vmem:[%s10491_s1 + $0x690] ss:$8 sps:$4 sm:$0xff]  }
  0xa0   : > { %3106 = vmatprep.mubr.bf16.mxu0 %v2761_v0  ;;  %v8827_v0 = vsel %vm1373_vm1, %v8778_v40, %v3224_v57 }
  0xa1   : > { %v8794_v48 = vsel %vm1373_vm1, %v8770_v29, %v3226_v44 }
  0xa6   : > { %965 = vmatmul.mubr.bf16.gmra.mrb[44].mxu1 %v2737_v61  ;;  %v8819_v61 = vld [vmem:[%s8355_s6 + $0x44] ss:$8 sps:$4 sm:$0xff]  }
  0xa7   : > { %3107 = vmatmul.mubr.bf16.gmra.mrb[44].mxu0 %v2753_v15  ;;  %974 = vmatprep.mubr.bf16.mxu1 %v635_v19  ;;  %v3230_v62 = vrot.slane %v8819_v61, 1  ;;  %v7887_v15 = vld [vmem:[%s10491_s1 + $0x644] ss:$8 sps:$4 sm:$0xff]   ;;  %v7893_v19 = vld [vmem:[%s10491_s1 + $0x654] ss:$8 sps:$4 sm:$0xff]  }
  0xa8   : > { %3116 = vmatprep.mubr.bf16.mxu0 %v2777_v20 }
  0xa9   : > { %v8833_v4 = vsel %vm1373_vm1, %v3226_v44, %v3230_v62  ;;  %v8871_v20 = vsel %vm1373_vm1, %v3230_v62, %v3234_v14  ;;  %v7903_v44 = vld [vmem:[%s10491_s1 + $0x670] ss:$8 sps:$4 sm:$0xff]  }
  0xae   : > { %975 = vmatmul.mubr.bf16.gmra.mrb[48].mxu1 %v627_v30  ;;  %v8895_v30 = vld [vmem:[%s8355_s6 + $0x64] ss:$8 sps:$4 sm:$0xff]  }
  0xaf   : > { %3117 = vmatmul.mubr.bf16.gmra.mrb[48].mxu0 %v2769_v31  ;;  %1203 = vmatprep.mubr.bf16.mxu1 %v8376_v53  ;;  %v7870_v53 = vld [vmem:[%s10491_s1 + $0x200] ss:$8 sps:$4 sm:$0xff]   ;;  %v3238_v31 = vrot.slane %v8895_v30, 1 }
  0xb0   : > { %3490 = vmatprep.mubr.bf16.mxu0 %v3223_v36  ;;  %v7900_v36 = vld [vmem:[%s10491_s1 + $0x250] ss:$8 sps:$4 sm:$0xff]  }
  0xb6   : > { %1204 = vmatmul.mubr.bf16.vlgmr.msra.gmra.mrb[0].mxu1 %v8397_v2  ;;  %v7875_v2 = vld [vmem:[%s10491_s1 + $0x624] ss:$8 sps:$4 sm:$0xff]  }
  0xb7   : > { %3491 = vmatmul.mubr.bf16.vlgmr.msra.gmra.mrb[0].mxu0 %v3220_v47  ;;  %1213 = vmatprep.mubr.bf16.mxu1 %v8378_v54  ;;  %v8927_v47 = vld [vmem:[%s8355_s6 + $0x60] ss:$8 sps:$4 sm:$0xff]  }
  0xb8   : > { %4023 = vmatpush1.bf16.msra.mxu0 %v7864_v42  ;;  %3500 = vmatprep.mubr.bf16.mxu0 %v8794_v48  ;;  %v8911_v42 = vsel %vm1373_vm1, %v3234_v14, %v3238_v31 }
  0xb9   : > { %4024 = vmatprep.subr.bf16.mxu0 %v7869_v46  ;;  %1615 = vmatpush1.bf16.msra.mxu1 %v7870_v53  ;;  %v7906_v46 = vld [vmem:[%s10491_s1 + $0x260] ss:$8 sps:$4 sm:$0xff]   ;;  %v3236_v53 = vrot.slane %v8927_v47, 1 }
  0xba   : > { %1616 = vmatprep.subr.bf16.mxu1 %v7878_v51  ;;  %v7914_v51 = vld [vmem:[%s10491_s1 + $0x274] ss:$8 sps:$4 sm:$0xff]  }
  0xbc   : > { %4025 = vmatpush1.bf16.msra.mxu0 %v7867_v49  ;;  %v7911_v49 = vld [vmem:[%s10491_s1 + $0x684] ss:$8 sps:$4 sm:$0xff]  }
  0xbd   : > { %4026 = vmatprep.subr.bf16.mxu0 %v7875_v2  ;;  %1617 = vmatpush1.bf16.msra.mxu1 %v7876_v58  ;;  %v7909_v2 = vld [vmem:[%s10491_s1 + $0x680] ss:$8 sps:$4 sm:$0xff]   ;;  %v7912_v58 = vld [vmem:[%s10491_s1 + $0x270] ss:$8 sps:$4 sm:$0xff]  }
  0xbe   : > { %1214 = vmatmul.mubr.bf16.gmra.mrb[4].mxu1 %v8399_v3  ;;  %1618 = vmatprep.subr.bf16.mxu1 %v7884_v1  ;;  %v8961_v1 = vld [vmem:[%s8355_s6 + $0x70] ss:$8 sps:$4 sm:$0xff]  }
  0xbf   : > { %3501 = vmatmul.mubr.bf16.gmra.mrb[4].mxu0 %v8827_v0  ;;  %1223 = vmatprep.mubr.bf16.mxu1 %v8152_v28  ;;  %v7902_v28 = vld [vmem:[%s10491_s1 + $0x254] ss:$8 sps:$4 sm:$0xff]  }
  0xc0   : > { %4027 = vmatpush1.bf16.msra.mxu0 %v7873_v59  ;;  %3510 = vmatprep.mubr.bf16.mxu0 %v8833_v4  ;;  %v8947_v59 = vsel %vm1373_vm1, %v3232_v25, %v3236_v53 }
  0xc1   : > { %4028 = vmatprep.subr.bf16.mxu0 %v7881_v63  ;;  %1619 = vmatpush1.bf16.msra.mxu1 %v7882_v5  ;;  %v7920_v63 = vld [vmem:[%s10491_s1 + $0x284] ss:$8 sps:$4 sm:$0xff]   ;;  %v3240_v5 = vrot.slane %v8961_v1, 1 }
  0xc2   : > { %1620 = vmatprep.subr.bf16.mxu1 %v7890_v11  ;;  %v8976_v11 = vld [vmem:[%s8355_s6 + $0x84] ss:$8 sps:$4 sm:$0xff]  }
  0xc3   : > { %v3246_v14 = vrot.slane %v8976_v11, 1 }
  0xc4   : > { %4029 = vmatpush1.bf16.msra.mxu0 %v7879_v9  ;;  %v7918_v9 = vld [vmem:[%s10491_s1 + $0x280] ss:$8 sps:$4 sm:$0xff]  }
  0xc5   : > { %4030 = vmatprep.subr.bf16.mxu0 %v7887_v15  ;;  %1621 = vmatpush1.bf16.msra.mxu1 %v7888_v17  ;;  %v8983_v15 = vsel %vm1373_vm1, %v3236_v53, %v3240_v5  ;;  %v7921_v17 = vld [vmem:[%s10491_s1 + $0x6a0] ss:$8 sps:$4 sm:$0xff]   ;;  %v7944_v53 = vld [vmem:[%s10491_s1 + $0x2c4] ss:$8 sps:$4 sm:$0xff]  }
  0xc6   : > { %1224 = vmatmul.mubr.bf16.gmra.mrb[8].mxu1 %v8153_v38  ;;  %1622 = vmatprep.subr.bf16.mxu1 %v7896_v21  ;;  %v7905_v38 = vld [vmem:[%s10491_s1 + $0x674] ss:$8 sps:$4 sm:$0xff]  }
  0xc7   : > { %3511 = vmatmul.mubr.bf16.gmra.mrb[8].mxu0 %v8865_v18  ;;  %1233 = vmatprep.mubr.bf16.mxu1 %v8154_v43  ;;  %v7908_v43 = vld [vmem:[%s10491_s1 + $0x264] ss:$8 sps:$4 sm:$0xff]   ;;  %v7929_v21 = vld [vmem:[%s10491_s1 + $0x6b4] ss:$8 sps:$4 sm:$0xff]  }
  0xc8   : > { %3520 = vmatprep.mubr.bf16.mxu0 %v8871_v20  ;;  %4031 = vmatpush1.bf16.msra.mxu0 %v7885_v16 }
  0xc9   : > { %4032 = vmatprep.subr.bf16.mxu0 %v7893_v19  ;;  %1623 = vmatpush1.bf16.msra.mxu1 %v7894_v23  ;;  %v7924_v19 = vld [vmem:[%s10491_s1 + $0x290] ss:$8 sps:$4 sm:$0xff]   ;;  %v9005_v23 = vld [vmem:[%s8355_s6 + $0x80] ss:$8 sps:$4 sm:$0xff]  }
  0xca   : > { %1624 = vmatprep.subr.bf16.mxu1 %v7902_v28  ;;  %v3244_v25 = vrot.slane %v9005_v23, 1 }
  0xcc   : > { %4033 = vmatpush1.bf16.msra.mxu0 %v7891_v22  ;;  %v7932_v22 = vld [vmem:[%s10491_s1 + $0x2a4] ss:$8 sps:$4 sm:$0xff]  }
  0xcd   : > { %4034 = vmatprep.subr.bf16.mxu0 %v7899_v26  ;;  %1625 = vmatpush1.bf16.msra.mxu1 %v7900_v36  ;;  %v9009_v26 = vld [vmem:[%s8355_s6 + $0x94] ss:$8 sps:$4 sm:$0xff]   ;;  %v9025_v36 = vsel %vm1373_vm1, %v3240_v5, %v3244_v25  ;;  %v7948_v5 = vld [vmem:[%s10491_s1 + $0x2d0] ss:$8 sps:$4 sm:$0xff]  }
  0xce   : > { %1234 = vmatmul.mubr.bf16.gmra.mrb[12].mxu1 %v8805_v56  ;;  %v8937_v56 = vld [vmem:[%s8355_s6 + $0x74] ss:$8 sps:$4 sm:$0xff]   ;;  %1626 = vmatprep.subr.bf16.mxu1 %v7908_v43  ;;  %v3250_v28 = vrot.slane %v9009_v26, 1  ;;  %v7933_v43 = vld [vmem:[%s10491_s1 + $0x6c0] ss:$8 sps:$4 sm:$0xff]  }
  0xcf   : > { %3521 = vmatmul.mubr.bf16.gmra.mrb[12].mxu0 %v8905_v37  ;;  %1243 = vmatprep.mubr.bf16.mxu1 %v8819_v61  ;;  %v3242_v57 = vrot.slane %v8937_v56, 1  ;;  %v7917_v61 = vld [vmem:[%s10491_s1 + $0x694] ss:$8 sps:$4 sm:$0xff]  }
  0xd0   : > { %3530 = vmatprep.mubr.bf16.mxu0 %v8911_v42  ;;  %4035 = vmatpush1.bf16.msra.mxu0 %v7897_v32  ;;  %v7938_v32 = vld [vmem:[%s10491_s1 + $0x2b4] ss:$8 sps:$4 sm:$0xff]  }
  0xd1   : > { %4036 = vmatprep.subr.bf16.mxu0 %v7905_v38  ;;  %v8953_v62 = vsel %vm1373_vm1, %v3238_v31, %v3242_v57  ;;  %1627 = vmatpush1.bf16.msra.mxu1 %v7906_v46  ;;  %v8986_v16 = vsel %vm1373_vm1, %v3242_v57, %v3246_v14  ;;  %v7935_v31 = vld [vmem:[%s10491_s1 + $0x6c4] ss:$8 sps:$4 sm:$0xff]   ;;  %v9028_v38 = vsel %vm1373_vm1, %v3246_v14, %v3250_v28  ;;  %v7941_v46 = vld [vmem:[%s10491_s1 + $0x6d4] ss:$8 sps:$4 sm:$0xff]   ;;  %v3254_v57 = vrot.slane %v8625_v34, 1 }
  0xd2   : > { %1628 = vmatprep.subr.bf16.mxu1 %v7914_v51  ;;  %v7950_v34 = vld [vmem:[%s10491_s1 + $0x2d4] ss:$8 sps:$4 sm:$0xff]   ;;  %v3258_v14 = vrot.slane %v8661_v55, 1 }
  0xd4   : > { %4037 = vmatpush1.bf16.msra.mxu0 %v7903_v44  ;;  %v7936_v44 = vld [vmem:[%s10491_s1 + $0x2b0] ss:$8 sps:$4 sm:$0xff]  }
  0xd5   : > { %4038 = vmatprep.subr.bf16.mxu0 %v7911_v49  ;;  %1629 = vmatpush1.bf16.msra.mxu1 %v7912_v58  ;;  %v8167_v49 = vld [vmem:[%s8355_s6 + $0x90] ss:$8 sps:$4 sm:$0xff]  }
  0xd6   : > { %1244 = vmatmul.mubr.bf16.gmra.mrb[16].mxu1 %v8841_v6  ;;  %v7923_v6 = vld [vmem:[%s10491_s1 + $0x6a4] ss:$8 sps:$4 sm:$0xff]   ;;  %1630 = vmatprep.subr.bf16.mxu1 %v7920_v63  ;;  %v3248_v51 = vrot.slane %v8167_v49, 1  ;;  %v7945_v63 = vld [vmem:[%s10491_s1 + $0x6e0] ss:$8 sps:$4 sm:$0xff]  }
  0xd7   : > { %3531 = vmatmul.mubr.bf16.gmra.mrb[16].mxu0 %v8947_v59  ;;  %1253 = vmatprep.mubr.bf16.mxu1 %v8852_v12  ;;  %v7926_v12 = vld [vmem:[%s10491_s1 + $0x294] ss:$8 sps:$4 sm:$0xff]  }
  0xd8   : > { %3540 = vmatprep.mubr.bf16.mxu0 %v8953_v62  ;;  %4039 = vmatpush1.bf16.msra.mxu0 %v7909_v2  ;;  %v7939_v2 = vld [vmem:[%s10491_s1 + $0x6d0] ss:$8 sps:$4 sm:$0xff]   ;;  %v9061_v58 = vsel %vm1373_vm1, %v3244_v25, %v3248_v51  ;;  %v9114_v25 = vrot.slane %v8697_v13, 1 }
  0xd9   : > { %4040 = vmatprep.subr.bf16.mxu0 %v7917_v61  ;;  %1631 = vmatpush1.bf16.msra.mxu1 %v7918_v9  ;;  %v9064_v61 = vsel %vm1373_vm1, %v3250_v28, %v3254_v57  ;;  %v7956_v9 = vld [vmem:[%s10491_s1 + $0x6f4] ss:$8 sps:$4 sm:$0xff]  }
  0xda   : > { %1632 = vmatprep.subr.bf16.mxu1 %v7926_v12  ;;  %v7951_v12 = vld [vmem:[%s10491_s1 + $0x2e0] ss:$8 sps:$4 sm:$0xff]  }
  0xdc   : > { %4041 = vmatpush1.bf16.msra.mxu0 %v7915_v7  ;;  %v7953_v7 = vld [vmem:[%s10491_s1 + $0x2e4] ss:$8 sps:$4 sm:$0xff]  }
  0xdd   : > { %4042 = vmatprep.subr.bf16.mxu0 %v7923_v6  ;;  %1633 = vmatpush1.bf16.msra.mxu1 %v7924_v19  ;;  %v3252_v6 = vrot.slane %v8658_v50, 1  ;;  %v7966_v50 = vld [vmem:[%s10491_s1 + $0x704] ss:$8 sps:$4 sm:$0xff]   ;;  %v7957_v19 = vld [vmem:[%s10491_s1 + $0x2f0] ss:$8 sps:$4 sm:$0xff]  }
  0xde   : > { %1254 = vmatmul.mubr.bf16.gmra.mrb[20].mxu1 %v8885_v24  ;;  %v7927_v24 = vld [vmem:[%s10491_s1 + $0x6b0] ss:$8 sps:$4 sm:$0xff]   ;;  %1634 = vmatprep.subr.bf16.mxu1 %v7932_v22  ;;  %v3256_v22 = vrot.slane %v8694_v10, 1 }
  0xdf   : > { %3541 = vmatmul.mubr.bf16.gmra.mrb[20].mxu0 %v8983_v15  ;;  %1263 = vmatprep.mubr.bf16.mxu1 %v8895_v30  ;;  %v7930_v30 = vld [vmem:[%s10491_s1 + $0x2a0] ss:$8 sps:$4 sm:$0xff]   ;;  %v9097_v55 = vsel %vm1373_vm1, %v3248_v51, %v3252_v6 }
  0xe0   : > { %3550 = vmatprep.mubr.bf16.mxu0 %v8986_v16  ;;  %4043 = vmatpush1.bf16.msra.mxu0 %v7921_v17  ;;  %v9100_v17 = vsel %vm1373_vm1, %v3254_v57, %v3258_v14  ;;  %v9117_v28 = vsel %vm1373_vm1, %v3252_v6, %v3256_v22  ;;  %v3673_v51 = vld [vmem:[%s8355_s6 + $0x20] sm:$0xff]  ;;  %v9152_v57 = vld [vmem:[%s8355_s6 + $0x28] sm:$0xff] }
  0xe1   : > { %4044 = vmatprep.subr.bf16.mxu0 %v7929_v21  ;;  %1635 = vmatpush1.bf16.msra.mxu1 %v7930_v30  ;;  %v7975_v21 = vld [vmem:[%s10491_s1 + $0x304] ss:$8 sps:$4 sm:$0xff]   ;;  %v7976_v6 = vld [vmem:[%s10491_s1 + $0x720] ss:$8 sps:$4 sm:$0xff]  }
  0xe2   : > { %1636 = vmatprep.subr.bf16.mxu1 %v7938_v32  ;;  %v8169_v32 = vld [vmem:[%s8355_s6 + $0xa0] ss:$8 sps:$4 sm:$0xff]  }
  0xe4   : > { %4045 = vmatpush1.bf16.msra.mxu0 %v7927_v24  ;;  %v9127_v24 = vrot.slane %v8728_v33, 1 }
  0xe5   : > { %4046 = vmatprep.subr.bf16.mxu0 %v7935_v31  ;;  %1637 = vmatpush1.bf16.msra.mxu1 %v7936_v44  ;;  %v3267_v31 = vsel %vm1373_vm1, %v9114_v25, %v3266_v35  ;;  %v1334_v44 = vld [vmem:[%s8355_s6] sm:$0xee] }
  0xe6   : > { %1264 = vmatmul.mubr.bf16.gmra.mrb[24].mxu1 %v8927_v47  ;;  %v7942_v47 = vld [vmem:[%s10491_s1 + $0x2c0] ss:$8 sps:$4 sm:$0xff]   ;;  %1638 = vmatprep.subr.bf16.mxu1 %v7944_v53  ;;  %v9131_v30 = vsel %vm1373_vm1, %v3256_v22, %v9127_v24 }
  0xe7   : > { %3551 = vmatmul.mubr.bf16.gmra.mrb[24].mxu0 %v9025_v36  ;;  %1273 = vmatprep.mubr.bf16.mxu1 %v8937_v56  ;;  %v7947_v56 = vld [vmem:[%s10491_s1 + $0x6e4] ss:$8 sps:$4 sm:$0xff]   ;;  %v7994_v22 = vld [vmem:[%s10491_s1 + $0x740] ss:$8 sps:$4 sm:$0xff]  }
  0xe8   : > { %3560 = vmatprep.mubr.bf16.mxu0 %v9028_v38  ;;  %4047 = vmatpush1.bf16.msra.mxu0 %v7933_v43  ;;  %v8170_v43 = vld [vmem:[%s8355_s6 + $0xb4] ss:$8 sps:$4 sm:$0xff]   ;;  %v8171_v53 = vld [vmem:[%s8355_s6 + $0x8] sm:$0xff] }
  0xe9   : > { %4048 = vmatprep.subr.bf16.mxu0 %v7941_v46  ;;  %1639 = vmatpush1.bf16.msra.mxu1 %v7942_v47  ;;  %v3265_v46 = vsel %vm1373_vm1, %v9127_v24, %v3264_v45  ;;  %v6637_v27 = vcombine.high %v1334_v44, %v8171_v53  ;;  %v6636_v39 = vcombine.low %v1334_v44, %v8171_v53  ;;  %v7964_v47 = vld [vmem:[%s10491_s1 + $0x700] ss:$8 sps:$4 sm:$0xff]   ;;  %v9264_v53 = vld [vmem:[%s8355_s6 + $0x64] ss:$8 sps:$4 sm:$0xff]  }
  0xea   : > { %1640 = vmatprep.subr.bf16.mxu1 %v7950_v34  ;;  %v7984_v34 = vld [vmem:[%s10491_s1 + $0x314] ss:$8 sps:$4 sm:$0xff]   ;;  %v8006_v44 = vld [vmem:[%s10491_s1 + $0x340] ss:$8 sps:$4 sm:$0xff]  }
  0xeb   : > { %v1377_v35 = vrot.slane %v6637_v27, 1  ;;  %v8011_v27 = vld [vmem:[%s10491_s1 + $0x760] ss:$8 sps:$4 sm:$0xff]  }
  0xec   : > { %4049 = vmatpush1.bf16.msra.mxu0 %v7939_v2  ;;  %v9155_v2 = vcombine.high %v3673_v51, %v9152_v57 }
  0xed   : > { %4050 = vmatprep.subr.bf16.mxu0 %v7947_v56  ;;  %1641 = vmatpush1.bf16.msra.mxu1 %v7948_v5  ;;  %v7971_v56 = vld [vmem:[%s10491_s1 + $0x714] ss:$8 sps:$4 sm:$0xff]   ;;  %v7982_v5 = vld [vmem:[%s10491_s1 + $0x310] ss:$8 sps:$4 sm:$0xff]  }
  0xee   : > { %1274 = vmatmul.mubr.bf16.gmra.mrb[28].mxu1 %v8961_v1  ;;  %v7954_v1 = vld [vmem:[%s10491_s1 + $0x6f0] ss:$8 sps:$4 sm:$0xff]   ;;  %1642 = vmatprep.subr.bf16.mxu1 %v7953_v7 }
  0xef   : > { %3561 = vmatmul.mubr.bf16.gmra.mrb[28].mxu0 %v9061_v58  ;;  %1283 = vmatprep.mubr.bf16.mxu1 %v8976_v11  ;;  %v7959_v11 = vld [vmem:[%s10491_s1 + $0x2f4] ss:$8 sps:$4 sm:$0xff]   ;;  %v9195_v7 = vld [vmem:[%s8355_s6 + $0x30] ss:$8 sps:$4 sm:$0xff]  }
  0xf0   : > { %3570 = vmatprep.mubr.bf16.mxu0 %v9064_v61  ;;  %4051 = vmatpush1.bf16.msra.mxu0 %v7945_v63  ;;  %v7978_v63 = vld [vmem:[%s10491_s1 + $0x724] ss:$8 sps:$4 sm:$0xff]  }
  0xf1   : > { %4052 = vmatprep.subr.bf16.mxu0 %v7956_v9  ;;  %1643 = vmatpush1.bf16.msra.mxu1 %v7951_v12  ;;  %v7987_v12 = vld [vmem:[%s10491_s1 + $0x734] ss:$8 sps:$4 sm:$0xff]  }
  0xf2   : > { %1644 = vmatprep.subr.bf16.mxu1 %v7959_v11  ;;  %v7985_v11 = vld [vmem:[%s10491_s1 + $0x730] ss:$8 sps:$4 sm:$0xff]  }
  0xf4   : > { %4053 = vmatpush1.bf16.msra.mxu0 %v7954_v1  ;;  %v7990_v1 = vld [vmem:[%s10491_s1 + $0x324] ss:$8 sps:$4 sm:$0xff]  }
  0xf5   : > { %4808 = vmatprep.subr.bf16.mxu0 %v7966_v50  ;;  %1645 = vmatpush1.bf16.msra.mxu1 %v7957_v19  ;;  %v7999_v50 = vld [vmem:[%s10491_s1 + $0x334] ss:$8 sps:$4 sm:$0xff]   ;;  %v7996_v19 = vld [vmem:[%s10491_s1 + $0x744] ss:$8 sps:$4 sm:$0xff]  }
  0xf6   : > { %1284 = vmatmul.mubr.bf16.gmra.mrb[32].mxu1 %v9005_v23  ;;  %2178 = vmatprep.subr.bf16.mxu1 %v7975_v21  ;;  %v9121_v23 = vsel %vm1373_vm1, %v3258_v14, %v9114_v25  ;;  %v9203_v14 = vld [vmem:[%s8355_s6 + $0x44] ss:$8 sps:$4 sm:$0xff]   ;;  %v9227_v21 = vld [vmem:[%s8355_s6 + $0x40] ss:$8 sps:$4 sm:$0xff]  }
  0xf7   : > { %3571 = vmatmul.mubr.bf16.gmra.mrb[32].mxu0 %v9097_v55  ;;  %1293 = vmatprep.mubr.bf16.mxu1 %v9009_v26  ;;  %v8168_v26 = vld [vmem:[%s8355_s6 + $0xa4] ss:$8 sps:$4 sm:$0xff]  }
  0xf8   : > { %3580 = vmatprep.mubr.bf16.mxu0 %v9100_v17 }
  0xfe   : > { %1294 = vmatmul.mubr.bf16.gmra.mrb[36].mxu1 %v8167_v49  ;;  %v1378_v49 = vrot.slane %v8378_v54, 1  ;;  %v1375_v54 = vrot.slane %v8399_v3, 1  ;;  %v7973_v3 = vld [vmem:[%s10491_s1 + $0x300] ss:$8 sps:$4 sm:$0xff]  }
  0xff   : > { %3581 = vmatmul.mubr.bf16.gmra.mrb[36].mxu0 %v9117_v28  ;;  %1303 = vmatprep.mubr.bf16.mxu1 %v8168_v26  ;;  %v7997_v26 = vld [vmem:[%s10491_s1 + $0x330] ss:$8 sps:$4 sm:$0xff]  }
 0x100   : > { %3590 = vmatprep.mubr.bf16.mxu0 %v9121_v23  ;;  %v1379_v45 = vsel %vm1373_vm1, %v1377_v35, %v1378_v49  ;;  %v1381_v9 = vsel %vm1373_vm1, %v1375_v54, %v8778_v40  ;;  %v7988_v40 = vld [vmem:[%s10491_s1 + $0x320] ss:$8 sps:$4 sm:$0xff]   ;;  %v8015_v35 = vld [vmem:[%s10491_s1 + $0x350] ss:$8 sps:$4 sm:$0xff]  }
 0x106   : > { %1304 = vmatmul.mubr.bf16.gmra.mrb[40].mxu1 %v8169_v32  ;;  %v8008_v32 = vld [vmem:[%s10491_s1 + $0x344] ss:$8 sps:$4 sm:$0xff]  }
 0x107   : > { %3591 = vmatmul.mubr.bf16.gmra.mrb[40].mxu0 %v9131_v30  ;;  %1313 = vmatprep.mubr.bf16.mxu1 %v8170_v43  ;;  %v8003_v43 = vld [vmem:[%s10491_s1 + $0x750] ss:$8 sps:$4 sm:$0xff]  }
 0x108   : > { %3600 = vmatprep.mubr.bf16.mxu0 %v3267_v31  ;;  %v8005_v31 = vld [vmem:[%s10491_s1 + $0x754] ss:$8 sps:$4 sm:$0xff]  }
 0x10e   : > { %1314 = vmatmul.mubr.bf16.gmra.mrb[44].mxu1 %v8694_v10  ;;  %v1374_v10 = vrot.slane %v6636_v39, 1  ;;  %v8018_v39 = vld [vmem:[%s10491_s1 + $0x770] ss:$8 sps:$4 sm:$0xff]  }
 0x10f   : > { %3601 = vmatmul.mubr.bf16.gmra.mrb[44].mxu0 %v3265_v46  ;;  %1323 = vmatprep.mubr.bf16.mxu1 %v8697_v13  ;;  %v9163_v13 = vcombine.low %v3673_v51, %v9152_v57  ;;  %v9261_v46 = vld [vmem:[%s8355_s6 + $0x50] ss:$8 sps:$4 sm:$0xff]   ;;  %v8026_v51 = vld [vmem:[%s10491_s1 + $0x364] ss:$8 sps:$4 sm:$0xff]  }
 0x110   : > { %3610 = vmatprep.mubr.bf16.mxu0 %v8737_v41  ;;  %v1376_v41 = vsel %vm1373_vm1, %v1374_v10, %v1375_v54  ;;  %v9295_v10 = vld [vmem:[%s8355_s6 + $0x60] ss:$8 sps:$4 sm:$0xff]   ;;  %v9298_v54 = vld [vmem:[%s8355_s6 + $0x74] ss:$8 sps:$4 sm:$0xff]  }
 0x116   : > { %1324 = vmatmul.mubr.bf16.gmra.mrb[48].mxu1 %v8728_v33  ;;  %v1383_v33 = vsel %vm1373_vm1, %v1378_v49, %v8770_v29  ;;  %v7969_v29 = vld [vmem:[%s10491_s1 + $0x710] ss:$8 sps:$4 sm:$0xff]   ;;  %v8020_v49 = vld [vmem:[%s10491_s1 + $0x774] ss:$8 sps:$4 sm:$0xff]  }
 0x117   : > { %3611 = vmatmul.mubr.bf16.gmra.mrb[48].mxu0 %v8750_v52  ;;  %1646 = vmatprep.mubr.bf16.mxu1 %v1379_v45  ;;  %v9172_v52 = vld [vmem:[%s8355_s6 + $0x34] ss:$8 sps:$4 sm:$0xff]   ;;  %v8024_v45 = vld [vmem:[%s10491_s1 + $0x360] ss:$8 sps:$4 sm:$0xff]  }
 0x118   : > { %4054 = vmatprep.mubr.bf16.mxu0 %v9155_v2 }
 0x11e   : > { %1647 = vmatmul.mubr.bf16.vlgmr.msra.gmra.mrb[0].mxu1 %v1376_v41  ;;  %v8027_v41 = vld [vmem:[%s10491_s1 + $0x780] ss:$8 sps:$4 sm:$0xff]  }
 0x11f   : > { %4055 = vmatmul.mubr.bf16.vlgmr.msra.gmra.mrb[0].mxu0 %v9163_v13  ;;  %1656 = vmatprep.mubr.bf16.mxu1 %v1383_v33  ;;  %v8038_v33 = vld [vmem:[%s10491_s1 + $0x794] ss:$8 sps:$4 sm:$0xff]  }
 0x120   : > { %4809 = vmatpush1.bf16.msra.mxu0 %v7964_v47  ;;  %4064 = vmatprep.mubr.bf16.mxu0 %v9172_v52  ;;  %v8032_v47 = vld [vmem:[%s10491_s1 + $0x370] ss:$8 sps:$4 sm:$0xff]  }
 0x121   : > { %4810 = vmatprep.subr.bf16.mxu0 %v7971_v56  ;;  %2179 = vmatpush1.bf16.msra.mxu1 %v7973_v3  ;;  %v8041_v56 = vld [vmem:[%s10491_s1 + $0x384] ss:$8 sps:$4 sm:$0xff]   ;;  %v8036_v3 = vld [vmem:[%s10491_s1 + $0x790] ss:$8 sps:$4 sm:$0xff]  }
 0x122   : > { %2180 = vmatprep.subr.bf16.mxu1 %v7984_v34  ;;  %v8039_v34 = vld [vmem:[%s10491_s1 + $0x380] ss:$8 sps:$4 sm:$0xff]  }
 0x124   : > { %4811 = vmatpush1.bf16.msra.mxu0 %v7969_v29  ;;  %v9329_v29 = vld [vmem:[%s8355_s6 + $0x70] ss:$8 sps:$4 sm:$0xff]  }
 0x125   : > { %4812 = vmatprep.subr.bf16.mxu0 %v7978_v63  ;;  %2181 = vmatpush1.bf16.msra.mxu1 %v7982_v5  ;;  %v9332_v63 = vld [vmem:[%s8355_s6 + $0x84] ss:$8 sps:$4 sm:$0xff]   ;;  %v8045_v5 = vld [vmem:[%s10491_s1 + $0x7a0] ss:$8 sps:$4 sm:$0xff]  }
 0x126   : > { %1657 = vmatmul.mubr.bf16.gmra.mrb[4].mxu1 %v1381_v9  ;;  %2182 = vmatprep.subr.bf16.mxu1 %v7990_v1  ;;  %v8048_v9 = vld [vmem:[%s10491_s1 + $0x390] ss:$8 sps:$4 sm:$0xff]  }
 0x127   : > { %4065 = vmatmul.mubr.bf16.gmra.mrb[4].mxu0 %v9195_v7  ;;  %1666 = vmatprep.mubr.bf16.mxu1 %v8794_v48  ;;  %v9230_v48 = vld [vmem:[%s8355_s6 + $0x54] ss:$8 sps:$4 sm:$0xff]   ;;  %v8054_v1 = vld [vmem:[%s10491_s1 + $0x7b0] ss:$8 sps:$4 sm:$0xff]  }
 0x128   : > { %4813 = vmatpush1.bf16.msra.mxu0 %v7976_v6  ;;  %4074 = vmatprep.mubr.bf16.mxu0 %v9203_v14  ;;  %v8056_v6 = vld [vmem:[%s10491_s1 + $0x7b4] ss:$8 sps:$4 sm:$0xff]  }
 0x129   : > { %4814 = vmatprep.subr.bf16.mxu0 %v7987_v12  ;;  %2183 = vmatpush1.bf16.msra.mxu1 %v7988_v40  ;;  %v8059_v12 = vld [vmem:[%s10491_s1 + $0x3a4] ss:$8 sps:$4 sm:$0xff]   ;;  %v8057_v40 = vld [vmem:[%s10491_s1 + $0x3a0] ss:$8 sps:$4 sm:$0xff]  }
 0x12a   : > { %2184 = vmatprep.subr.bf16.mxu1 %v7999_v50  ;;  %v9366_v50 = vld [vmem:[%s8355_s6 + $0x94] ss:$8 sps:$4 sm:$0xff]  }
 0x12c   : > { %4815 = vmatpush1.bf16.msra.mxu0 %v7985_v11  ;;  %v9363_v11 = vld [vmem:[%s8355_s6 + $0x80] ss:$8 sps:$4 sm:$0xff]  }
 0x12d   : > { %4816 = vmatprep.subr.bf16.mxu0 %v7996_v19  ;;  %2185 = vmatpush1.bf16.msra.mxu1 %v7997_v26  ;;  %v8060_v19 = vld [vmem:[%s10491_s1 + $0x7c0] ss:$8 sps:$4 sm:$0xff]   ;;  %v8071_v26 = vld [vmem:[%s10491_s1 + $0x7d4] ss:$8 sps:$4 sm:$0xff]  }
 0x12e   : > { %1667 = vmatmul.mubr.bf16.gmra.mrb[8].mxu1 %v8827_v0  ;;  %2186 = vmatprep.subr.bf16.mxu1 %v8008_v32  ;;  %v8013_v0 = vld [vmem:[%s10491_s1 + $0x764] ss:$8 sps:$4 sm:$0xff]   ;;  %v8069_v32 = vld [vmem:[%s10491_s1 + $0x7d0] ss:$8 sps:$4 sm:$0xff]  }
 0x12f   : > { %4075 = vmatmul.mubr.bf16.gmra.mrb[8].mxu0 %v9227_v21  ;;  %1676 = vmatprep.mubr.bf16.mxu1 %v8833_v4  ;;  %v8017_v4 = vld [vmem:[%s10491_s1 + $0x354] ss:$8 sps:$4 sm:$0xff]  }
 0x130   : > { %4084 = vmatprep.mubr.bf16.mxu0 %v9230_v48  ;;  %4817 = vmatpush1.bf16.msra.mxu0 %v7994_v22  ;;  %v8066_v22 = vld [vmem:[%s10491_s1 + $0x3b0] ss:$8 sps:$4 sm:$0xff]  }
 0x131   : > { %4818 = vmatprep.subr.bf16.mxu0 %v8005_v31  ;;  %2187 = vmatpush1.bf16.msra.mxu1 %v8006_v44  ;;  %v8076_v31 = vld [vmem:[%s10491_s1 + $0x3c4] ss:$8 sps:$4 sm:$0xff]   ;;  %v9397_v44 = vld [vmem:[%s8355_s6 + $0x90] ss:$8 sps:$4 sm:$0xff]  }
 0x132   : > { %2188 = vmatprep.subr.bf16.mxu1 %v8017_v4  ;;  %v8078_v4 = vld [vmem:[%s10491_s1 + $0x7e0] ss:$8 sps:$4 sm:$0xff]  }
 0x134   : > { %4819 = vmatpush1.bf16.msra.mxu0 %v8003_v43  ;;  %v8074_v43 = vld [vmem:[%s10491_s1 + $0x3c0] ss:$8 sps:$4 sm:$0xff]  }
 0x135   : > { %4820 = vmatprep.subr.bf16.mxu0 %v8013_v0  ;;  %2189 = vmatpush1.bf16.msra.mxu1 %v8015_v35  ;;  %v9400_v0 = vld [vmem:[%s8355_s6 + $0xa4] ss:$8 sps:$4 sm:$0xff]  }
 0x136   : > { %1677 = vmatmul.mubr.bf16.gmra.mrb[12].mxu1 %v8865_v18  ;;  %2190 = vmatprep.subr.bf16.mxu1 %v8026_v51  ;;  %v8029_v18 = vld [vmem:[%s10491_s1 + $0x784] ss:$8 sps:$4 sm:$0xff]   ;;  %v8086_v51 = vld [vmem:[%s10491_s1 + $0x3e0] ss:$8 sps:$4 sm:$0xff]  }
 0x137   : > { %4085 = vmatmul.mubr.bf16.gmra.mrb[12].mxu0 %v9261_v46  ;;  %1686 = vmatprep.mubr.bf16.mxu1 %v8871_v20  ;;  %v8034_v20 = vld [vmem:[%s10491_s1 + $0x374] ss:$8 sps:$4 sm:$0xff]   ;;  %v8088_v35 = vld [vmem:[%s10491_s1 + $0x3e4] ss:$8 sps:$4 sm:$0xff]  }
 0x138   : > { %4094 = vmatprep.mubr.bf16.mxu0 %v9264_v53  ;;  %4821 = vmatpush1.bf16.msra.mxu0 %v8011_v27  ;;  %v8081_v27 = vld [vmem:[%s10491_s1 + $0x3d0] ss:$8 sps:$4 sm:$0xff]  }
 0x139   : > { %4822 = vmatprep.subr.bf16.mxu0 %v8020_v49  ;;  %2191 = vmatpush1.bf16.msra.mxu1 %v8024_v45  ;;  %v8092_v49 = vld [vmem:[%s10491_s1 + $0x7f4] ss:$8 sps:$4 sm:$0xff]   ;;  %v9431_v45 = vld [vmem:[%s8355_s6 + $0xa0] ss:$8 sps:$4 sm:$0xff]  }
 0x13a   : > { %2192 = vmatprep.subr.bf16.mxu1 %v8034_v20  ;;  %v8093_v20 = vld [vmem:[%s10491_s1 + $0x3f0] ss:$8 sps:$4 sm:$0xff]  }
 0x13c   : > { %4823 = vmatpush1.bf16.msra.mxu0 %v8018_v39  ;;  %v8090_v39 = vld [vmem:[%s10491_s1 + $0x7f0] ss:$8 sps:$4 sm:$0xff]  }
 0x13d   : > { %4824 = vmatprep.subr.bf16.mxu0 %v8029_v18  ;;  %2193 = vmatpush1.bf16.msra.mxu1 %v8032_v47  ;;  %v9434_v18 = vld [vmem:[%s8355_s6 + $0xb4] ss:$8 sps:$4 sm:$0xff]   ;;  %v9447_v47 = vld [vmem:[%s8355_s6 + $0xc4] ss:$8 sps:$4 sm:$0xff]  }
 0x13e   : > { %1687 = vmatmul.mubr.bf16.gmra.mrb[16].mxu1 %v8905_v37  ;;  %2194 = vmatprep.subr.bf16.mxu1 %v8041_v56  ;;  %v8047_v37 = vld [vmem:[%s10491_s1 + $0x7a4] ss:$8 sps:$4 sm:$0xff]  }
 0x13f   : > { %4095 = vmatmul.mubr.bf16.gmra.mrb[16].mxu0 %v9295_v10  ;;  %1696 = vmatprep.mubr.bf16.mxu1 %v8911_v42  ;;  %v8050_v42 = vld [vmem:[%s10491_s1 + $0x394] ss:$8 sps:$4 sm:$0xff]   ;;  %v9469_v56 = vld [vmem:[%s8355_s6 + $0xe4] ss:$8 sps:$4 sm:$0xff]  }
 0x140   : > { %4104 = vmatprep.mubr.bf16.mxu0 %v9298_v54  ;;  %4825 = vmatpush1.bf16.msra.mxu0 %v8027_v41  ;;  %v9444_v41 = vld [vmem:[%s8355_s6 + $0xb0] ss:$8 sps:$4 sm:$0xff]  }
 0x141   : > { %4826 = vmatprep.subr.bf16.mxu0 %v8038_v33  ;;  %2195 = vmatpush1.bf16.msra.mxu1 %v8039_v34  ;;  %v4421_v33 = vshll.u32 %v9155_v2, 16 }
 0x142   : > { %2196 = vmatprep.subr.bf16.mxu1 %v8050_v42 }
 0x143   : > { %v4423_v34 = vrot.slane %v4421_v33, 1  ;;  %v4446_v33 = vshrl.u32 %v9227_v21, 16 }
 0x144   : > { %4827 = vmatpush1.bf16.msra.mxu0 %v8036_v3 }
 0x145   : > { %4828 = vmatprep.subr.bf16.mxu0 %v8047_v37  ;;  %2197 = vmatpush1.bf16.msra.mxu1 %v8048_v9  ;;  %v4409_v37 = vshll.u32 %v9163_v13, 16  ;;  %v9481_v9 = vld [vmem:[%s8355_s6 + $0xe0] ss:$8 sps:$4 sm:$0xff]  }
 0x146   : > { %1697 = vmatmul.mubr.bf16.gmra.mrb[20].mxu1 %v8947_v59  ;;  %2198 = vmatprep.subr.bf16.mxu1 %v8059_v12  ;;  %v8062_v59 = vld [vmem:[%s10491_s1 + $0x7c4] ss:$8 sps:$4 sm:$0xff]  }
 0x147   : > { %4105 = vmatmul.mubr.bf16.gmra.mrb[20].mxu0 %v9329_v29  ;;  %1706 = vmatprep.mubr.bf16.mxu1 %v8953_v62  ;;  %v8068_v62 = vld [vmem:[%s10491_s1 + $0x3b4] ss:$8 sps:$4 sm:$0xff]   ;;  %v4411_v12 = vrot.slane %v4409_v37, 1 }
 0x148   : > { %4114 = vmatprep.mubr.bf16.mxu0 %v9332_v63  ;;  %4829 = vmatpush1.bf16.msra.mxu0 %v8045_v5 }
 0x149   : > { %4830 = vmatprep.subr.bf16.mxu0 %v8056_v6  ;;  %2199 = vmatpush1.bf16.msra.mxu1 %v8057_v40  ;;  %v8098_v6 = vld [vmem:[%s8355_s6 + $0x14] ss:$8 sps:$4 sm:$0xff]  }
 0x14a   : > { %2200 = vmatprep.subr.bf16.mxu1 %v8068_v62 }
 0x14c   : > { %4831 = vmatpush1.bf16.msra.mxu0 %v8054_v1  ;;  %v4414_v1 = vshll.u32 %v9195_v7, 16 }
 0x14d   : > { %4832 = vmatprep.subr.bf16.mxu0 %v8062_v59  ;;  %2201 = vmatpush1.bf16.msra.mxu1 %v8066_v22  ;;  %v4442_v59 = vshll.u32 %v9203_v14, 16 }
 0x14e   : > { %1707 = vmatmul.mubr.bf16.gmra.mrb[24].mxu1 %v8983_v15  ;;  %2202 = vmatprep.subr.bf16.mxu1 %v8076_v31  ;;  %v8080_v15 = vld [vmem:[%s10491_s1 + $0x7e4] ss:$8 sps:$4 sm:$0xff]  }
 0x14f   : > { %4115 = vmatmul.mubr.bf16.gmra.mrb[24].mxu0 %v9363_v11  ;;  %1716 = vmatprep.mubr.bf16.mxu1 %v8986_v16  ;;  %v8083_v16 = vld [vmem:[%s10491_s1 + $0x3d4] ss:$8 sps:$4 sm:$0xff]   ;;  %v4444_v22 = vrot.slane %v4442_v59, 1  ;;  %v4486_v59 = vshrl.u32 %v9264_v53, 16 }
 0x150   : > { %4124 = vmatprep.mubr.bf16.mxu0 %v9366_v50  ;;  %4833 = vmatpush1.bf16.msra.mxu0 %v8060_v19 }
 0x151   : > { %4834 = vmatprep.subr.bf16.mxu0 %v8071_v26  ;;  %2203 = vmatpush1.bf16.msra.mxu1 %v8074_v43  ;;  %v8096_v26 = vld [vmem:[%s8355_s6 + $0x10] ss:$8 sps:$4 sm:$0xff]   ;;  %v4430_v43 = vshrl.u32 %v9195_v7, 16 }
 0x152   : > { %2204 = vmatprep.subr.bf16.mxu1 %v8083_v16  ;;  %v8104_v16 = vld [vmem:[%s10491_s1 + $0x814] ss:$8 sps:$4 sm:$0xff]  }
 0x154   : > { %4835 = vmatpush1.bf16.msra.mxu0 %v8069_v32  ;;  %v8099_v32 = vld [vmem:[%s10491_s1 + $0x800] ss:$8 sps:$4 sm:$0xff]  }
 0x155   : > { %4836 = vmatprep.subr.bf16.mxu0 %v8080_v15  ;;  %2205 = vmatpush1.bf16.msra.mxu1 %v8081_v27  ;;  %v4434_v15 = vshll.u32 %v9227_v21, 16  ;;  %v4454_v27 = vshrl.u32 %v9203_v14, 16 }
 0x156   : > { %1717 = vmatmul.mubr.bf16.gmra.mrb[28].mxu1 %v9025_v36  ;;  %2206 = vmatprep.subr.bf16.mxu1 %v8088_v35  ;;  %v8095_v36 = vld [vmem:[%s10491_s1 + $0x3f4] ss:$8 sps:$4 sm:$0xff]   ;;  %v4458_v35 = vshll.u32 %v9230_v48, 16 }
 0x157   : > { %4125 = vmatmul.mubr.bf16.gmra.mrb[28].mxu0 %v9397_v44  ;;  %1726 = vmatprep.mubr.bf16.mxu1 %v9028_v38  ;;  %v8101_v38 = vld [vmem:[%s10491_s1 + $0x804] ss:$8 sps:$4 sm:$0xff]  }
 0x158   : > { %4134 = vmatprep.mubr.bf16.mxu0 %v9400_v0  ;;  %4837 = vmatpush1.bf16.msra.mxu0 %v8078_v4 }
 0x159   : > { %4838 = vmatprep.subr.bf16.mxu0 %v8092_v49  ;;  %2207 = vmatpush1.bf16.msra.mxu1 %v8086_v51  ;;  %v8102_v49 = vld [vmem:[%s10491_s1 + $0x810] ss:$8 sps:$4 sm:$0xff]  }
 0x15a   : > { %2208 = vmatprep.subr.bf16.mxu1 %v8095_v36  ;;  %v8107_v36 = vld [vmem:[%s10491_s1 + $0x824] ss:$8 sps:$4 sm:$0xff]  }
 0x15c   : > { %4839 = vmatpush1.bf16.msra.mxu0 %v8090_v39  ;;  %v4436_v39 = vrot.slane %v4434_v15, 1 }
 0x15d   : > { %5302 = vmatprep.subr.bf16.mxu0 %v8101_v38  ;;  %2209 = vmatpush1.bf16.msra.mxu1 %v8093_v20  ;;  %v4460_v20 = vrot.slane %v4458_v35, 1  ;;  %v4502_v35 = vshrl.u32 %v9298_v54, 16 }
 0x15e   : > { %1727 = vmatmul.mubr.bf16.gmra.mrb[32].mxu1 %v9061_v58  ;;  %7169 = vmatprep.subr.bf16.mxu1 %v8101_v38  ;;  %v9454_v58 = vld [vmem:[%s8355_s6 + $0xc0] ss:$8 sps:$4 sm:$0xff]   ;;  %v4456_v38 = vor.u32 %v4454_v27, %v4444_v22  ;;  %v4448_v37 = vor.u32 %v4446_v33, %v4436_v39  ;;  %v8125_v33 = vld [vmem:[%s10491_s1 + $0x884] ss:$8 sps:$4 sm:$0xff]  }
 0x15f   : > { %4135 = vmatmul.mubr.bf16.gmra.mrb[32].mxu0 %v9431_v45  ;;  %1736 = vmatprep.mubr.bf16.mxu1 %v9064_v61  ;;  %v9457_v61 = vld [vmem:[%s8355_s6 + $0xd4] ss:$8 sps:$4 sm:$0xff]  }
 0x160   : > { %4144 = vmatprep.mubr.bf16.mxu0 %v9434_v18 }
 0x166   : > { %1737 = vmatmul.mubr.bf16.gmra.mrb[36].mxu1 %v9097_v55  ;;  %v1426_v55 = vrot.slane %v8752_v60, 1  ;;  %v1424_v60 = vrot.slane %v8760_v8, 1  ;;  %v4438_v8 = vshrl.u32 %v9172_v52, 16 }
 0x167   : > { %4145 = vmatmul.mubr.bf16.gmra.mrb[36].mxu0 %v9444_v41  ;;  %1746 = vmatprep.mubr.bf16.mxu1 %v9100_v17  ;;  %v9466_v17 = vld [vmem:[%s8355_s6 + $0xd0] ss:$8 sps:$4 sm:$0xff]  }
 0x168   : > { %4154 = vmatprep.mubr.bf16.mxu0 %v9447_v47  ;;  %v1427_v3 = vsel %vm1373_vm1, %v9114_v25, %v1426_v55  ;;  %v1425_v25 = vsel %vm1373_vm1, %v9127_v24, %v1424_v60  ;;  %v4416_v24 = vrot.slane %v4414_v1, 1  ;;  %v4461_v60 = vsel %vm419_vm0, %v4456_v38, %v4460_v20 }
 0x169   : > { %v4466_v1 = vshll.u32 %v9295_v10, 16 }
 0x16a   : > { %v4432_v51 = vor.u32 %v4430_v43, %v4416_v24  ;;  %v8119_v43 = vld [vmem:[%s10491_s1 + $0x864] ss:$8 sps:$4 sm:$0xff]  }
 0x16c   : > { %v4437_v55 = vsel %vm419_vm0, %v4432_v51, %v4436_v39  ;;  %v8117_v51 = vld [vmem:[%s10491_s1 + $0x860] ss:$8 sps:$4 sm:$0xff]   ;;  %v8122_v39 = vld [vmem:[%s10491_s1 + $0x874] ss:$8 sps:$4 sm:$0xff]  }
 0x16e   : > { %1747 = vmatmul.mubr.bf16.gmra.mrb[40].mxu1 %v9117_v28  ;;  %v4419_v28 = vshrl.u32 %v9155_v2, 16 }
 0x16f   : > { %4155 = vmatmul.mubr.bf16.gmra.mrb[40].mxu0 %v9454_v58  ;;  %1756 = vmatprep.mubr.bf16.mxu1 %v9121_v23  ;;  %v4426_v23 = vshll.u32 %v9172_v52, 16 }
 0x170   : > { %4164 = vmatprep.mubr.bf16.mxu0 %v9457_v61  ;;  %v4424_v42 = vor.u32 %v4423_v34, %v4419_v28  ;;  %v8110_v28 = vld [vmem:[%s10491_s1 + $0x834] ss:$8 sps:$4 sm:$0xff]   ;;  %v4470_v34 = vshrl.u32 %v9230_v48, 16 }
 0x171   : > { %v4428_v5 = vrot.slane %v4426_v23, 1  ;;  %v4474_v23 = vshll.u32 %v9264_v53, 16 }
 0x173   : > { %v4429_v40 = vsel %vm419_vm0, %v4424_v42, %v4428_v5  ;;  %v4440_v19 = vor.u32 %v4438_v8, %v4428_v5  ;;  %v8108_v5 = vld [vmem:[%s10491_s1 + $0x830] ss:$8 sps:$4 sm:$0xff]   ;;  %v8111_v8 = vld [vmem:[%s10491_s1 + $0x840] ss:$8 sps:$4 sm:$0xff]  }
 0x175   : > { %v4445_v4 = vsel %vm419_vm0, %v4440_v19, %v4444_v22  ;;  %v4468_v22 = vrot.slane %v4466_v1, 1  ;;  %v8131_v1 = vld [vmem:[%s10491_s1 + $0x8a4] ss:$8 sps:$4 sm:$0xff]  }
 0x176   : > { %1757 = vmatmul.mubr.bf16.gmra.mrb[44].mxu1 %v9131_v30  ;;  %v4407_v30 = vshrl.u32 %v9163_v13, 16 }
 0x177   : > { %4165 = vmatmul.mubr.bf16.gmra.mrb[44].mxu0 %v9466_v17  ;;  %1766 = vmatprep.mubr.bf16.mxu1 %v1427_v3  ;;  %v4450_v3 = vshll.u32 %v9261_v46, 16 }
 0x178   : > { %4174 = vmatprep.mubr.bf16.mxu0 %v9469_v56  ;;  %v4412_v62 = vor.u32 %v4411_v12, %v4407_v30  ;;  %v8113_v30 = vld [vmem:[%s10491_s1 + $0x844] ss:$8 sps:$4 sm:$0xff]   ;;  %v4462_v12 = vshrl.u32 %v9261_v46, 16 }
 0x179   : > { %v4452_v42 = vrot.slane %v4450_v3, 1 }
 0x17a   : > { %v4417_v31 = vsel %vm419_vm0, %v4412_v62, %v4416_v24  ;;  %v4490_v62 = vshll.u32 %v9298_v54, 16  ;;  %v8116_v24 = vld [vmem:[%s10491_s1 + $0x854] ss:$8 sps:$4 sm:$0xff]  }
 0x17b   : > { %v4464_v19 = vor.u32 %v4462_v12, %v4452_v42  ;;  %v8126_v12 = vld [vmem:[%s10491_s1 + $0x890] ss:$8 sps:$4 sm:$0xff]  }
 0x17d   : > { %v4469_v15 = vsel %vm419_vm0, %v4464_v19, %v4468_v22  ;;  %v4538_v19 = vshll.u32 %v9400_v0, 16 }
 0x17e   : > { %1767 = vmatmul.mubr.bf16.gmra.mrb[48].mxu1 %v1425_v25  ;;  %v4472_v25 = vor.u32 %v4470_v34, %v4460_v20  ;;  %v4498_v34 = vshll.u32 %v9363_v11, 16 }
 0x17f   : > { %4175 = vmatmul.mubr.bf16.gmra.mrb[48].mxu0 %v9481_v9  ;;  %2210 = vmatprep.mubr.bf16.mxu1 %v8098_v6  ;;  %v4476_v6 = vrot.slane %v4474_v23, 1 }
 0x180   : > { %4840 = vmatprep.mubr.bf16.mxu0 %v4429_v40 }
 0x181   : > { %v4477_v40 = vsel %vm419_vm0, %v4472_v25, %v4476_v6 }
 0x186   : > { %2211 = vmatmul.mubr.bf16.vlgmr.msra.gmra.mrb[0].mxu1 %v8096_v26  ;;  %v4488_v26 = vor.u32 %v4486_v59, %v4476_v6  ;;  %v4500_v6 = vrot.slane %v4498_v34, 1  ;;  %v4514_v59 = vshll.u32 %v9397_v44, 16  ;;  %v8143_v34 = vld [vmem:[%s10491_s1 + $0x8e4] ss:$8 sps:$4 sm:$0xff]  }
 0x187   : > { %4841 = vmatmul.mubr.bf16.vlgmr.msra.gmra.mrb[0].mxu0 %v4417_v31  ;;  %2220 = vmatprep.mubr.bf16.mxu1 %v9155_v2  ;;  %v8105_v2 = vld [vmem:[%s10491_s1 + $0x820] ss:$8 sps:$4 sm:$0xff]   ;;  %v4492_v31 = vrot.slane %v4490_v62, 1 }
 0x188   : > { %5303 = vmatpush1.bf16.msra.mxu0 %v8099_v32  ;;  %4850 = vmatprep.mubr.bf16.mxu0 %v4445_v4  ;;  %v4482_v4 = vshll.u32 %v9329_v29, 16 }
 0x189   : > { %5304 = vmatprep.subr.bf16.mxu0 %v8104_v16  ;;  %7185 = vmatpush1.bf16.msra.mxu1 %v8099_v32  ;;  %v8114_v32 = vld [vmem:[%s10491_s1 + $0x850] ss:$8 sps:$4 sm:$0xff]   ;;  %v4493_v27 = vsel %vm419_vm0, %v4488_v26, %v4492_v31  ;;  %v4504_v20 = vor.u32 %v4502_v35, %v4492_v31  ;;  %v8134_v26 = vld [vmem:[%s10491_s1 + $0x8b4] ss:$8 sps:$4 sm:$0xff]   ;;  %v4526_v35 = vshrl.u32 %v9397_v44, 16 }
 0x18a   : > { %7170 = vmatprep.subr.bf16.mxu1 %v8104_v16  ;;  %v4478_v16 = vshrl.u32 %v9295_v10, 16  ;;  %v4484_v38 = vrot.slane %v4482_v4, 1  ;;  %v8137_v4 = vld [vmem:[%s10491_s1 + $0x8c4] ss:$8 sps:$4 sm:$0xff]  }
 0x18c   : > { %5305 = vmatpush1.bf16.msra.mxu0 %v8102_v49 }
 0x18d   : > { %5306 = vmatprep.subr.bf16.mxu0 %v8107_v36  ;;  %7186 = vmatpush1.bf16.msra.mxu1 %v8102_v49  ;;  %v4506_v49 = vshll.u32 %v9332_v63, 16 }
 0x18e   : > { %2221 = vmatmul.mubr.bf16.gmra.mrb[4].mxu1 %v9163_v13  ;;  %7171 = vmatprep.subr.bf16.mxu1 %v8107_v36  ;;  %v4453_v13 = vsel %vm419_vm0, %v4448_v37, %v4452_v42  ;;  %v4480_v36 = vor.u32 %v4478_v16, %v4468_v22  ;;  %v4522_v37 = vshll.u32 %v9366_v50, 16  ;;  %v8123_v42 = vld [vmem:[%s10491_s1 + $0x880] ss:$8 sps:$4 sm:$0xff]   ;;  %v8132_v16 = vld [vmem:[%s10491_s1 + $0x8b0] ss:$8 sps:$4 sm:$0xff]  }
 0x18f   : > { %4851 = vmatmul.mubr.bf16.gmra.mrb[4].mxu0 %v4437_v55  ;;  %2230 = vmatprep.mubr.bf16.mxu1 %v9172_v52  ;;  %v4508_v55 = vrot.slane %v4506_v49, 1  ;;  %v8129_v22 = vld [vmem:[%s10491_s1 + $0x8a0] ss:$8 sps:$4 sm:$0xff]   ;;  %v4530_v49 = vshll.u32 %v9431_v45, 16 }
 0x190   : > { %5307 = vmatpush1.bf16.msra.mxu0 %v8105_v2  ;;  %4860 = vmatprep.mubr.bf16.mxu0 %v4461_v60  ;;  %v4485_v3 = vsel %vm419_vm0, %v4480_v36, %v4484_v38  ;;  %v4518_v60 = vshrl.u32 %v9332_v63, 16  ;;  %v4554_v36 = vshll.u32 %v9434_v18, 16 }
 0x191   : > { %5308 = vmatprep.subr.bf16.mxu0 %v8110_v28  ;;  %7187 = vmatpush1.bf16.msra.mxu1 %v8105_v2  ;;  %v8120_v2 = vld [vmem:[%s10491_s1 + $0x870] ss:$8 sps:$4 sm:$0xff]   ;;  %v4509_v23 = vsel %vm419_vm0, %v4504_v20, %v4508_v55  ;;  %v8140_v20 = vld [vmem:[%s10491_s1 + $0x8d4] ss:$8 sps:$4 sm:$0xff]  }
 0x192   : > { %7172 = vmatprep.subr.bf16.mxu1 %v8110_v28  ;;  %v4494_v28 = vshrl.u32 %v9329_v29, 16 }
 0x194   : > { %5309 = vmatpush1.bf16.msra.mxu0 %v8108_v5  ;;  %v4496_v25 = vor.u32 %v4494_v28, %v4484_v38  ;;  %v8135_v38 = vld [vmem:[%s10491_s1 + $0x8c0] ss:$8 sps:$4 sm:$0xff]   ;;  %v8138_v28 = vld [vmem:[%s10491_s1 + $0x8d0] ss:$8 sps:$4 sm:$0xff]  }
 0x195   : > { %5310 = vmatprep.subr.bf16.mxu0 %v8113_v30  ;;  %7188 = vmatpush1.bf16.msra.mxu1 %v8108_v5  ;;  %v8128_v5 = vld [vmem:[%s10491_s1 + $0x894] ss:$8 sps:$4 sm:$0xff]  }
 0x196   : > { %2231 = vmatmul.mubr.bf16.gmra.mrb[8].mxu1 %v9195_v7  ;;  %7173 = vmatprep.subr.bf16.mxu1 %v8113_v30  ;;  %v4520_v30 = vor.u32 %v4518_v60, %v4508_v55  ;;  %v4542_v60 = vshrl.u32 %v9431_v45, 16 }
 0x197   : > { %4861 = vmatmul.mubr.bf16.gmra.mrb[8].mxu0 %v4453_v13  ;;  %2240 = vmatprep.mubr.bf16.mxu1 %v9203_v14  ;;  %v4524_v13 = vrot.slane %v4522_v37, 1  ;;  %v4546_v37 = vshll.u32 %v9444_v41, 16 }
 0x198   : > { %4870 = vmatprep.mubr.bf16.mxu0 %v4477_v40  ;;  %5311 = vmatpush1.bf16.msra.mxu0 %v8111_v8  ;;  %v4501_v40 = vsel %vm419_vm0, %v4496_v25, %v4500_v6  ;;  %v4570_v25 = vshll.u32 %v9447_v47, 16 }
 0x199   : > { %5312 = vmatprep.subr.bf16.mxu0 %v8116_v24  ;;  %7189 = vmatpush1.bf16.msra.mxu1 %v8111_v8  ;;  %v4510_v8 = vshrl.u32 %v9363_v11, 16  ;;  %v4525_v62 = vsel %vm419_vm0, %v4520_v30, %v4524_v13  ;;  %v8148_v30 = vld [vmem:[%s10491_s1 + $0x8f4] ss:$8 sps:$4 sm:$0xff]  }
 0x19a   : > { %7174 = vmatprep.subr.bf16.mxu1 %v8116_v24  ;;  %v4534_v24 = vshrl.u32 %v9366_v50, 16 }
 0x19b   : > { %v4512_v31 = vor.u32 %v4510_v8, %v4500_v6  ;;  %v8141_v6 = vld [vmem:[%s10491_s1 + $0x8e0] ss:$8 sps:$4 sm:$0xff]   ;;  %v8146_v8 = vld [vmem:[%s10491_s1 + $0x8f0] ss:$8 sps:$4 sm:$0xff]  }
 0x19c   : > { %5313 = vmatpush1.bf16.msra.mxu0 %v8114_v32 }
 0x19d   : > { %5314 = vmatprep.subr.bf16.mxu0 %v8119_v43  ;;  %7190 = vmatpush1.bf16.msra.mxu1 %v8114_v32  ;;  %v4516_v32 = vrot.slane %v4514_v59, 1 }
 0x19e   : > { %2241 = vmatmul.mubr.bf16.gmra.mrb[12].mxu1 %v9227_v21  ;;  %7175 = vmatprep.subr.bf16.mxu1 %v8119_v43  ;;  %v4536_v43 = vor.u32 %v4534_v24, %v4524_v13  ;;  %v4562_v24 = vshll.u32 %v9454_v58, 16 }
 0x19f   : > { %4871 = vmatmul.mubr.bf16.gmra.mrb[12].mxu0 %v4469_v15  ;;  %2250 = vmatprep.mubr.bf16.mxu1 %v9230_v48  ;;  %v4540_v15 = vrot.slane %v4538_v19, 1  ;;  %v4528_v55 = vor.u32 %v4526_v35, %v4516_v32 }
 0x1a0   : > { %4880 = vmatprep.mubr.bf16.mxu0 %v4493_v27  ;;  %5315 = vmatpush1.bf16.msra.mxu0 %v8117_v51  ;;  %v4517_v27 = vsel %vm419_vm0, %v4512_v31, %v4516_v32  ;;  %v4564_v32 = vrot.slane %v4562_v24, 1 }
 0x1a1   : > { %5316 = vmatprep.subr.bf16.mxu0 %v8122_v39  ;;  %7191 = vmatpush1.bf16.msra.mxu1 %v8117_v51  ;;  %v4541_v51 = vsel %vm419_vm0, %v4536_v43, %v4540_v15 }
 0x1a2   : > { %7176 = vmatprep.subr.bf16.mxu1 %v8122_v39  ;;  %v4550_v39 = vshrl.u32 %v9400_v0, 16 }
 0x1a4   : > { %5317 = vmatpush1.bf16.msra.mxu0 %v8120_v2 }
 0x1a5   : > { %5318 = vmatprep.subr.bf16.mxu0 %v8125_v33  ;;  %7192 = vmatpush1.bf16.msra.mxu1 %v8120_v2  ;;  %v4532_v2 = vrot.slane %v4530_v49, 1  ;;  %v4598_v49 = vshrl.u32 %v9457_v61, 16 }
 0x1a6   : > { %2251 = vmatmul.mubr.bf16.gmra.mrb[16].mxu1 %v9261_v46  ;;  %7177 = vmatprep.subr.bf16.mxu1 %v8125_v33  ;;  %v4552_v33 = vor.u32 %v4550_v39, %v4540_v15  ;;  %v4263_v39 = vld [vmem:[%s8355_s6 + $0xf0] sm:$0x11] }
 0x1a7   : > { %4881 = vmatmul.mubr.bf16.gmra.mrb[16].mxu0 %v4485_v3  ;;  %2260 = vmatprep.mubr.bf16.mxu1 %v9264_v53  ;;  %v4556_v3 = vrot.slane %v4554_v36, 1  ;;  %v4544_v13 = vor.u32 %v4542_v60, %v4532_v2 }
 0x1a8   : > { %4890 = vmatprep.mubr.bf16.mxu0 %v4509_v23  ;;  %5319 = vmatpush1.bf16.msra.mxu0 %v8123_v42  ;;  %v4533_v23 = vsel %vm419_vm0, %v4528_v55, %v4532_v2  ;;  %v9666_v2 = vcombine.high %v4263_v39, %v4263_v39 }
 0x1a9   : > { %5320 = vmatprep.subr.bf16.mxu0 %v8128_v5  ;;  %7193 = vmatpush1.bf16.msra.mxu1 %v8123_v42  ;;  %v4557_v42 = vsel %vm419_vm0, %v4552_v33, %v4556_v3 }
 0x1aa   : > { %7178 = vmatprep.subr.bf16.mxu1 %v8128_v5  ;;  %v4566_v5 = vshrl.u32 %v9434_v18, 16  ;;  %v4618_v60 = vshll.u32 %v9666_v2, 16 }
 0x1ac   : > { %5321 = vmatpush1.bf16.msra.mxu0 %v8126_v12 }
 0x1ad   : > { %5322 = vmatprep.subr.bf16.mxu0 %v8131_v1  ;;  %7194 = vmatpush1.bf16.msra.mxu1 %v8126_v12  ;;  %v4548_v12 = vrot.slane %v4546_v37, 1 }
 0x1ae   : > { %2261 = vmatmul.mubr.bf16.gmra.mrb[20].mxu1 %v9295_v10  ;;  %7179 = vmatprep.subr.bf16.mxu1 %v8131_v1  ;;  %v4568_v1 = vor.u32 %v4566_v5, %v4556_v3  ;;  %v4590_v3 = vshrl.u32 %v9466_v17, 16  ;;  %v9676_v5 = vcombine.low %v4263_v39, %v4263_v39 }
 0x1af   : > { %4891 = vmatmul.mubr.bf16.gmra.mrb[20].mxu0 %v4501_v40  ;;  %2270 = vmatprep.mubr.bf16.mxu1 %v9298_v54  ;;  %v4572_v40 = vrot.slane %v4570_v25, 1  ;;  %v4549_v59 = vsel %vm419_vm0, %v4544_v13, %v4548_v12 }
 0x1b0   : > { %4900 = vmatprep.mubr.bf16.mxu0 %v4525_v62  ;;  %5323 = vmatpush1.bf16.msra.mxu0 %v8129_v22  ;;  %v4558_v62 = vshrl.u32 %v9444_v41, 16 }
 0x1b1   : > { %5324 = vmatprep.subr.bf16.mxu0 %v8134_v26  ;;  %7195 = vmatpush1.bf16.msra.mxu1 %v8129_v22  ;;  %v4573_v19 = vsel %vm419_vm0, %v4568_v1, %v4572_v40  ;;  %v4582_v22 = vshrl.u32 %v9447_v47, 16  ;;  %v4610_v1 = vshll.u32 %v9676_v5, 16 }
 0x1b2   : > { %7180 = vmatprep.subr.bf16.mxu1 %v8134_v26  ;;  %v4586_v26 = vshll.u32 %v9457_v61, 16  ;;  %v4560_v31 = vor.u32 %v4558_v62, %v4548_v12  ;;  %v4606_v12 = vshrl.u32 %v9481_v9, 16 }
 0x1b3   : > { %v4584_v43 = vor.u32 %v4582_v22, %v4572_v40  ;;  %v4612_v62 = vrot.slane %v4610_v1, 1  ;;  %v5090_v22 = vrot.slane %v9366_v50, 1 }
 0x1b4   : > { %5325 = vmatpush1.bf16.msra.mxu0 %v8132_v16  ;;  %v4588_v15 = vrot.slane %v4586_v26, 1  ;;  %v5094_v26 = vrot.slane %v9400_v0, 1 }
 0x1b5   : > { %5326 = vmatprep.subr.bf16.mxu0 %v8137_v4  ;;  %7196 = vmatpush1.bf16.msra.mxu1 %v8132_v16  ;;  %v4565_v16 = vsel %vm419_vm0, %v4560_v31, %v4564_v32 }
 0x1b6   : > { %2271 = vmatmul.mubr.bf16.gmra.mrb[24].mxu1 %v9329_v29  ;;  %7181 = vmatprep.subr.bf16.mxu1 %v8137_v4  ;;  %v4574_v4 = vshrl.u32 %v9454_v58, 16  ;;  %v4589_v35 = vsel %vm419_vm0, %v4584_v43, %v4588_v15 }
 0x1b7   : > { %4901 = vmatmul.mubr.bf16.gmra.mrb[24].mxu0 %v4517_v27  ;;  %2280 = vmatprep.mubr.bf16.mxu1 %v9332_v63  ;;  %v4578_v27 = vshll.u32 %v9466_v17, 16 }
 0x1b8   : > { %4910 = vmatprep.mubr.bf16.mxu0 %v4541_v51  ;;  %5327 = vmatpush1.bf16.msra.mxu0 %v8135_v38  ;;  %v4602_v51 = vshll.u32 %v9469_v56, 16  ;;  %v4576_v36 = vor.u32 %v4574_v4, %v4564_v32  ;;  %v5092_v4 = vrot.slane %v9431_v45, 1 }
 0x1b9   : > { %5328 = vmatprep.subr.bf16.mxu0 %v8140_v20  ;;  %7197 = vmatpush1.bf16.msra.mxu1 %v8135_v38  ;;  %v4580_v38 = vrot.slane %v4578_v27, 1  ;;  %v5098_v27 = vrot.slane %v9434_v18, 1 }
 0x1ba   : > { %7182 = vmatprep.subr.bf16.mxu1 %v8140_v20  ;;  %v4600_v20 = vor.u32 %v4598_v49, %v4588_v15  ;;  %v4604_v55 = vrot.slane %v4602_v51, 1  ;;  %v5095_v15 = vsel %vm1373_vm1, %v5090_v22, %v5094_v26 }
 0x1bb   : > { %v4581_v33 = vsel %vm419_vm0, %v4576_v36, %v4580_v38  ;;  %v4592_v37 = vor.u32 %v4590_v3, %v4580_v38  ;;  %v5099_v39 = vsel %vm1373_vm1, %v5094_v26, %v5098_v27 }
 0x1bc   : > { %5329 = vmatpush1.bf16.msra.mxu0 %v8138_v28 }
 0x1bd   : > { %5330 = vmatprep.subr.bf16.mxu0 %v8143_v34  ;;  %7198 = vmatpush1.bf16.msra.mxu1 %v8138_v28  ;;  %v4594_v28 = vshll.u32 %v9481_v9, 16 }
 0x1be   : > { %2281 = vmatmul.mubr.bf16.gmra.mrb[28].mxu1 %v9363_v11  ;;  %7183 = vmatprep.subr.bf16.mxu1 %v8143_v34  ;;  %v4605_v34 = vsel %vm419_vm0, %v4600_v20, %v4604_v55 }
 0x1bf   : > { %4911 = vmatmul.mubr.bf16.gmra.mrb[28].mxu0 %v4533_v23  ;;  %2290 = vmatprep.mubr.bf16.mxu1 %v9366_v50  ;;  %v4614_v23 = vshrl.u32 %v9469_v56, 16 }
 0x1c0   : > { %4920 = vmatprep.mubr.bf16.mxu0 %v4557_v42  ;;  %5331 = vmatpush1.bf16.msra.mxu0 %v8141_v6  ;;  %v4596_v42 = vrot.slane %v4594_v28, 1 }
 0x1c1   : > { %5332 = vmatprep.subr.bf16.mxu0 %v8148_v30  ;;  %7199 = vmatpush1.bf16.msra.mxu1 %v8141_v6  ;;  %v4616_v25 = vor.u32 %v4614_v23, %v4604_v55  ;;  %v4620_v6 = vrot.slane %v4618_v60, 1 }
 0x1c2   : > { %7184 = vmatprep.subr.bf16.mxu1 %v8148_v30  ;;  %v5023_v30 = vld [vmem:[%s8355_s6 + $0x20] sm:$0xee]  ;;  %v4597_v13 = vsel %vm419_vm0, %v4592_v37, %v4596_v42 }
 0x1c3   : > { %v4621_v40 = vsel %vm419_vm0, %v4616_v25, %v4620_v6  ;;  %v7132_v32 = vcombine.low %v5023_v30, %v9152_v57 }
 0x1c4   : > { %5333 = vmatpush1.bf16.msra.mxu0 %v8146_v8 }
 0x1c5   : > { %7200 = vmatpush1.bf16.msra.mxu1 %v8146_v8  ;;  %v7133_v8 = vcombine.high %v5023_v30, %v9152_v57  ;;  %v5070_v57 = vrot.slane %v9203_v14, 1  ;;  %v5096_v14 = vrot.slane %v9444_v41, 1 }
 0x1c6   : > { %2291 = vmatmul.mubr.bf16.gmra.mrb[32].mxu1 %v9397_v44 }
 0x1c7   : > { %4921 = vmatmul.mubr.bf16.gmra.mrb[32].mxu0 %v4549_v59  ;;  %2300 = vmatprep.mubr.bf16.mxu1 %v9400_v0  ;;  %v4608_v59 = vor.u32 %v4606_v12, %v4596_v42  ;;  %v5065_v24 = vrot.slane %v7133_v8, 1  ;;  %v5088_v0 = vrot.slane %v9397_v44, 1  ;;  %v5097_v38 = vsel %vm1373_vm1, %v5092_v4, %v5096_v14 }
 0x1c8   : > { %4930 = vmatprep.mubr.bf16.mxu0 %v4573_v19  ;;  %v5066_v19 = vrot.slane %v9172_v52, 1  ;;  %v5063_v52 = vrot.slane %v9195_v7, 1  ;;  %v5068_v7 = vrot.slane %v9227_v21, 1  ;;  %v5072_v21 = vrot.slane %v9261_v46, 1 }
 0x1c9   : > { %v4613_v31 = vsel %vm419_vm0, %v4608_v59, %v4612_v62  ;;  %v5093_v49 = vsel %vm1373_vm1, %v5088_v0, %v5092_v4  ;;  %v5076_v46 = vrot.slane %v9295_v10, 1  ;;  %v5080_v10 = vrot.slane %v9329_v29, 1 }
 0x1ca   : > { %v5067_v43 = vsel %vm1373_vm1, %v5065_v24, %v5066_v19  ;;  %v5071_v51 = vsel %vm1373_vm1, %v5066_v19, %v5070_v57  ;;  %v5069_v36 = vsel %vm1373_vm1, %v5063_v52, %v5068_v7  ;;  %v5084_v29 = vrot.slane %v9363_v11, 1 }
 0x1cb   : > { %v5077_v23 = vsel %vm1373_vm1, %v5072_v21, %v5076_v46  ;;  %v5081_v25 = vsel %vm1373_vm1, %v5076_v46, %v5080_v10 }
 0x1cc   : > { %v5089_v1 = vsel %vm1373_vm1, %v5084_v29, %v5088_v0 }
 0x1ce   : > { %2301 = vmatmul.mubr.bf16.gmra.mrb[36].mxu1 %v9431_v45  ;;  %v5074_v45 = vrot.slane %v9230_v48, 1  ;;  %v5078_v48 = vrot.slane %v9264_v53, 1  ;;  %v5082_v53 = vrot.slane %v9298_v54, 1  ;;  %v5086_v54 = vrot.slane %v9332_v63, 1 }
 0x1cf   : > { %4931 = vmatmul.mubr.bf16.gmra.mrb[36].mxu0 %v4565_v16  ;;  %2310 = vmatprep.mubr.bf16.mxu1 %v9434_v18  ;;  %v5062_v16 = vrot.slane %v7132_v32, 1  ;;  %v5102_v18 = vrot.slane %v9447_v47, 1  ;;  %v5085_v63 = vsel %vm1373_vm1, %v5080_v10, %v5084_v29 }
 0x1d0   : > { %4940 = vmatprep.mubr.bf16.mxu0 %v4589_v35  ;;  %v5075_v20 = vsel %vm1373_vm1, %v5070_v57, %v5074_v45  ;;  %v5079_v28 = vsel %vm1373_vm1, %v5074_v45, %v5078_v48  ;;  %v5083_v37 = vsel %vm1373_vm1, %v5078_v48, %v5082_v53  ;;  %v5087_v30 = vsel %vm1373_vm1, %v5082_v53, %v5086_v54 }
 0x1d1   : > { %v5064_v35 = vsel %vm1373_vm1, %v5062_v16, %v5063_v52  ;;  %v5103_v55 = vsel %vm1373_vm1, %v5098_v27, %v5102_v18  ;;  %v5091_v12 = vsel %vm1373_vm1, %v5086_v54, %v5090_v22 }
 0x1d6   : > { %2311 = vmatmul.mubr.bf16.gmra.mrb[40].mxu1 %v9444_v41  ;;  %v5100_v41 = vrot.slane %v9454_v58, 1 }
 0x1d7   : > { %4941 = vmatmul.mubr.bf16.gmra.mrb[40].mxu0 %v4581_v33  ;;  %2320 = vmatprep.mubr.bf16.mxu1 %v9447_v47  ;;  %v5106_v47 = vrot.slane %v9457_v61, 1  ;;  %v5073_v33 = vsel %vm1373_vm1, %v5068_v7, %v5072_v21 }
 0x1d8   : > { %4950 = vmatprep.mubr.bf16.mxu0 %v4605_v34  ;;  %v5101_v3 = vsel %vm1373_vm1, %v5096_v14, %v5100_v41 }
 0x1d9   : > { %v5107_v34 = vsel %vm1373_vm1, %v5102_v18, %v5106_v47 }
 0x1de   : > { %2321 = vmatmul.mubr.bf16.gmra.mrb[44].mxu1 %v9454_v58  ;;  %v5104_v58 = vrot.slane %v9466_v17, 1 }
 0x1df   : > { %4951 = vmatmul.mubr.bf16.gmra.mrb[44].mxu0 %v4597_v13  ;;  %2330 = vmatprep.mubr.bf16.mxu1 %v9457_v61  ;;  %v5110_v61 = vrot.slane %v9469_v56, 1  ;;  %v5114_v56 = vrot.slane %v9666_v2, 1 }
 0x1e0   : > { %4960 = vmatprep.mubr.bf16.mxu0 %v4621_v40  ;;  %v5105_v60 = vsel %vm1373_vm1, %v5100_v41, %v5104_v58 }
 0x1e1   : > { %v5111_v42 = vsel %vm1373_vm1, %v5106_v47, %v5110_v61  ;;  %v5115_v13 = vsel %vm1373_vm1, %v5110_v61, %v5114_v56 }
 0x1e6   : > { %2331 = vmatmul.mubr.bf16.gmra.mrb[48].mxu1 %v9466_v17  ;;  %v5108_v17 = vrot.slane %v9481_v9, 1  ;;  %v5112_v9 = vrot.slane %v9676_v5, 1 }
 0x1e7   : > { %4961 = vmatmul.mubr.bf16.gmra.mrb[48].mxu0 %v4613_v31  ;;  %5404 = vmatprep.mubr.bf16.mxu1 %v5095_v15 }
 0x1e8   : > { %5334 = vmatprep.mubr.bf16.mxu0 %v5067_v43  ;;  %v5109_v6 = vsel %vm1373_vm1, %v5104_v58, %v5108_v17  ;;  %v5113_v2 = vsel %vm1373_vm1, %v5108_v17, %v5112_v9 }
 0x1ee   : > { %5405 = vmatmul.mubr.bf16.vlgmr.msra.gmra.mrb[52].mxu1 %v5093_v49 }
 0x1ef   : > { %5335 = vmatmul.mubr.bf16.vlgmr.msra.gmra.mrb[0].mxu0 %v5064_v35  ;;  %5414 = vmatprep.mubr.bf16.mxu1 %v5099_v39 }
 0x1f0   : > { %5344 = vmatprep.mubr.bf16.mxu0 %v5071_v51 }
 0x1f6   : > { %5415 = vmatmul.mubr.bf16.gmra.mrb[56].mxu1 %v5097_v38 }
 0x1f7   : > { %5345 = vmatmul.mubr.bf16.gmra.mrb[4].mxu0 %v5069_v36  ;;  %5424 = vmatprep.mubr.bf16.mxu1 %v5103_v55 }
 0x1f8   : > { %5354 = vmatprep.mubr.bf16.mxu0 %v5075_v20 }
 0x1fe   : > { %5425 = vmatmul.mubr.bf16.gmra.mrb[60].mxu1 %v5101_v3 }
 0x1ff   : > { %5355 = vmatmul.mubr.bf16.gmra.mrb[8].mxu0 %v5073_v33  ;;  %5434 = vmatprep.mubr.bf16.mxu1 %v5107_v34 }
 0x200   : > { %5364 = vmatprep.mubr.bf16.mxu0 %v5079_v28 }
 0x206   : > { %5435 = vmatmul.mubr.bf16.gmra.mrb[64].mxu1 %v5105_v60 }
 0x207   : > { %5365 = vmatmul.mubr.bf16.gmra.mrb[12].mxu0 %v5077_v23  ;;  %5444 = vmatprep.mubr.bf16.mxu1 %v5111_v42 }
 0x208   : > { %5374 = vmatprep.mubr.bf16.mxu0 %v5083_v37 }
 0x20e   : > { %5445 = vmatmul.mubr.bf16.gmra.mrb[68].mxu1 %v5109_v6 }
 0x20f   : > { %5375 = vmatmul.mubr.bf16.gmra.mrb[16].mxu0 %v5081_v25  ;;  %5454 = vmatprep.mubr.bf16.mxu1 %v5115_v13 }
 0x210   : > { %5384 = vmatprep.mubr.bf16.mxu0 %v5087_v30 }
 0x216   : > { %5455 = vmatmul.mubr.bf16.gmra.mrb[72].mxu1 %v5113_v2 }
 0x217   : > { %5385 = vmatmul.mubr.bf16.gmra.mrb[20].mxu0 %v5085_v63 }
 0x218   : > { %5394 = vmatprep.mubr.bf16.mxu0 %v5091_v12 }
 0x21f   : > { %5395 = vmatmul.mubr.bf16.gmra.mrb[24].mxu0 %v5089_v1 }
 0x259   : > { %v9749_v40 = vpop.f32.mrb[0].mxu1 }
 0x25a   : > { %v9751_v11 = vpop.f32.mrb[1].mxu1 }
 0x25b   : > { %v9753_v5 = vpop.f32.mrb[2].mxu1 }
 0x25c   : > { %v9755_v8 = vpop.f32.mrb[3].mxu1 }
 0x261   : > { %v9757_v59 = vpop.f32.mrb[4].mxu1 }
 0x262   : > { %v9759_v50 = vpop.f32.mrb[5].mxu1 }
 0x263   : > { %v9761_v62 = vpop.f32.mrb[6].mxu1 }
 0x264   : > { %v9763_v24 = vpop.f32.mrb[7].mxu1 }
 0x269   : > { %v9765_v44 = vpop.f32.mrb[8].mxu1 }
 0x26a   : > { %v9767_v19 = vpop.f32.mrb[9].mxu1 }
 0x26b   : > { %v9769_v22 = vpop.f32.mrb[10].mxu1 }
 0x26c   : > { %v9771_v26 = vpop.f32.mrb[11].mxu1 }
 0x271   : > { %v9773_v31 = vpop.f32.mrb[12].mxu1 }
 0x272   : > { %v9775_v32 = vpop.f32.mrb[13].mxu1 }
 0x273   : > { %v9777_v43 = vpop.f32.mrb[14].mxu1 }
 0x274   : > { %v9779_v15 = vpop.f32.mrb[15].mxu1 }
 0x279   : > { %v9781_v16 = vpop.f32.mrb[16].mxu1 }
 0x27a   : > { %v9783_v52 = vpop.f32.mrb[17].mxu1 }
 0x27b   : > { %10503 = vst [vmem:[#allocation3_spill] sm:$0xff] %v9783_v52  ;;  %v9785_v0 = vpop.f32.mrb[18].mxu1 }
 0x27c   : > { %10504 = vst [vmem:[#allocation4_spill] sm:$0xff] %v9785_v0  ;;  %v9787_v4 = vpop.f32.mrb[19].mxu1 }
 0x27d   : > { %10505 = vst [vmem:[#allocation5_spill] sm:$0xff] %v9787_v4 }
 0x281   : > { %v9789_v57 = vpop.f32.mrb[20].mxu1 }
 0x282   : > { %10506 = vst [vmem:[#allocation6_spill] sm:$0xff] %v9789_v57  ;;  %v9791_v27 = vpop.f32.mrb[21].mxu1 }
 0x283   : > { %10507 = vst [vmem:[#allocation7_spill] sm:$0xff] %v9791_v27  ;;  %v9793_v35 = vpop.f32.mrb[22].mxu1 }
 0x284   : > { %10508 = vst [vmem:[#allocation8_spill] sm:$0xff] %v9793_v35  ;;  %v9795_v49 = vpop.f32.mrb[23].mxu1 }
 0x285   : > { %10509 = vst [vmem:[#allocation9_spill] sm:$0xff] %v9795_v49 }
 0x289   : > { %v9797_v51 = vpop.f32.mrb[24].mxu1 }
 0x28a   : > { %10510 = vst [vmem:[#allocation10_spill] sm:$0xff] %v9797_v51  ;;  %v9799_v39 = vpop.f32.mrb[25].mxu1 }
 0x28b   : > { %10511 = vst [vmem:[#allocation11_spill] sm:$0xff] %v9799_v39  ;;  %v9801_v7 = vpop.f32.mrb[26].mxu1 }
 0x28c   : > { %10512 = vst [vmem:[#allocation12_spill] sm:$0xff] %v9801_v7  ;;  %v9803_v14 = vpop.f32.mrb[27].mxu1 }
 0x28d   : > { %10513 = vst [vmem:[#allocation13_spill] sm:$0xff] %v9803_v14 }
 0x291   : > { %v2282_v45 = vpop.f32.mrb[28].mxu1 }
 0x292   : > { %v4912_v18 = vpop.f32.mrb[28].mxu0  ;;  %v2284_v38 = vpop.f32.mrb[29].mxu1 }
 0x293   : > { %v9805_v36 = vadd.f32 %v4912_v18, %v2282_v45  ;;  %v4914_v20 = vpop.f32.mrb[29].mxu0  ;;  %v2286_v21 = vpop.f32.mrb[30].mxu1 }
 0x294   : > { %v9807_v55 = vadd.f32 %v4914_v20, %v2284_v38  ;;  %v4916_v41 = vpop.f32.mrb[30].mxu0  ;;  %v2288_v47 = vpop.f32.mrb[31].mxu1 }
 0x295   : > { %v9809_v48 = vadd.f32 %v4916_v41, %v2286_v21  ;;  %v4918_v33 = vpop.f32.mrb[31].mxu0 }
 0x296   : > { %v9811_v3 = vadd.f32 %v4918_v33, %v2288_v47 }
 0x299   : > { %v2292_v28 = vpop.f32.mrb[32].mxu1 }
 0x29a   : > { %v4922_v34 = vpop.f32.mrb[32].mxu0  ;;  %v2294_v58 = vpop.f32.mrb[33].mxu1 }
 0x29b   : > { %v9813_v46 = vadd.f32 %v4922_v34, %v2292_v28  ;;  %v4924_v53 = vpop.f32.mrb[33].mxu0  ;;  %v2296_v23 = vpop.f32.mrb[34].mxu1 }
 0x29c   : > { %v9815_v61 = vadd.f32 %v4924_v53, %v2294_v58  ;;  %v4926_v60 = vpop.f32.mrb[34].mxu0  ;;  %v2298_v42 = vpop.f32.mrb[35].mxu1 }
 0x29d   : > { %v9817_v37 = vadd.f32 %v4926_v60, %v2296_v23  ;;  %v4928_v10 = vpop.f32.mrb[35].mxu0 }
 0x29e   : > { %v9819_v17 = vadd.f32 %v4928_v10, %v2298_v42 }
 0x2a1   : > { %v2302_v54 = vpop.f32.mrb[36].mxu1 }
 0x2a2   : > { %v4932_v56 = vpop.f32.mrb[36].mxu0  ;;  %v2304_v6 = vpop.f32.mrb[37].mxu1 }
 0x2a3   : > { %v9821_v25 = vadd.f32 %v4932_v56, %v2302_v54  ;;  %v4934_v30 = vpop.f32.mrb[37].mxu0  ;;  %v2306_v29 = vpop.f32.mrb[38].mxu1 }
 0x2a4   : > { %v9823_v13 = vadd.f32 %v4934_v30, %v2304_v6  ;;  %v4936_v9 = vpop.f32.mrb[38].mxu0  ;;  %v2308_v2 = vpop.f32.mrb[39].mxu1 }
 0x2a5   : > { %v9825_v63 = vadd.f32 %v4936_v9, %v2306_v29  ;;  %v4938_v12 = vpop.f32.mrb[39].mxu0 }
 0x2a6   : > { %v9827_v1 = vadd.f32 %v4938_v12, %v2308_v2 }
 0x2a9   : > { %v2312_v45 = vpop.f32.mrb[40].mxu1 }
 0x2aa   : > { %v4942_v18 = vpop.f32.mrb[40].mxu0  ;;  %v2314_v20 = vpop.f32.mrb[41].mxu1 }
 0x2ab   : > { %v9829_v38 = vadd.f32 %v4942_v18, %v2312_v45  ;;  %v4944_v21 = vpop.f32.mrb[41].mxu0  ;;  %v2316_v47 = vpop.f32.mrb[42].mxu1 }
 0x2ac   : > { %v9831_v41 = vadd.f32 %v4944_v21, %v2314_v20  ;;  %v4946_v33 = vpop.f32.mrb[42].mxu0  ;;  %v2318_v34 = vpop.f32.mrb[43].mxu1  ;;  %v5519_v20 = vlaneseq }
 0x2ad   : > { %v9833_v28 = vadd.f32 %v4946_v33, %v2316_v47  ;;  %v4948_v58 = vpop.f32.mrb[43].mxu0 }
 0x2ae   : > { %v9835_v53 = vadd.f32 %v4948_v58, %v2318_v34 }
 0x2b1   : > { %v2322_v23 = vpop.f32.mrb[44].mxu1 }
 0x2b2   : > { %v4952_v60 = vpop.f32.mrb[44].mxu0  ;;  %v2324_v10 = vpop.f32.mrb[45].mxu1 }
 0x2b3   : > { %v9837_v42 = vadd.f32 %v4952_v60, %v2322_v23  ;;  %v4954_v54 = vpop.f32.mrb[45].mxu0  ;;  %v2326_v6 = vpop.f32.mrb[46].mxu1 }
 0x2b4   : > { %v9839_v56 = vadd.f32 %v4954_v54, %v2324_v10  ;;  %v4956_v30 = vpop.f32.mrb[46].mxu0  ;;  %v2328_v9 = vpop.f32.mrb[47].mxu1 }
 0x2b5   : > { %v9841_v29 = vadd.f32 %v4956_v30, %v2326_v6  ;;  %v4958_v2 = vpop.f32.mrb[47].mxu0  ;;  %v5520_v30 = vshrl.u32 %v5519_v20, 7 }
 0x2b6   : > { %10514 = vst [vmem:[#allocation14_spill] sm:$0xff] %v9839_v56  ;;  %v9843_v12 = vadd.f32 %v4958_v2, %v2328_v9 }
 0x2b7   : > { %10515 = vst [vmem:[#allocation15_spill] sm:$0xff] %v9841_v29  ;;  %v5521_v2 = vsub.s32 0, %v5520_v30 }
 0x2b8   : > { %10516 = vst [vmem:[#allocation16_spill] sm:$0xff] %v9843_v12 }
 0x2b9   : > { %v2332_v45 = vpop.f32.mrb[48].mxu1 }
 0x2ba   : > { %v4962_v18 = vpop.f32.mrb[48].mxu0  ;;  %v2334_v47 = vpop.f32.mrb[49].mxu1 }
 0x2bb   : > { %v9845_v21 = vadd.f32 %v4962_v18, %v2332_v45  ;;  %v4964_v33 = vpop.f32.mrb[49].mxu0  ;;  %v2336_v58 = vpop.f32.mrb[50].mxu1  ;;  %v5517_v45 = vld [vmem:[%s10492_s2] sm:$0x3] }
 0x2bc   : > { %v9847_v34 = vadd.f32 %v4964_v33, %v2334_v47  ;;  %v4966_v23 = vpop.f32.mrb[50].mxu0  ;;  %v2338_v10 = vpop.f32.mrb[51].mxu1  ;;  %v5525_v33 = vsub.s32 1, %v5520_v30 }
 0x2bd   : > { %10517 = vst [vmem:[#allocation17_spill] sm:$0xff] %v9845_v21  ;;  %v9849_v60 = vadd.f32 %v4966_v23, %v2336_v58  ;;  %v4968_v54 = vpop.f32.mrb[51].mxu0 }
 0x2be   : > { %10518 = vst [vmem:[#allocation18_spill] sm:$0xff] %v9847_v34  ;;  %v9851_v6 = vadd.f32 %v4968_v54, %v2338_v10  ;;  %v9870_v30 = vrot.slane %v5517_v45, %v5525_v33 }
 0x2bf   : > { %10519 = vst [vmem:[#allocation19_spill] sm:$0xff] %v9849_v60 }
 0x2c0   : > { %10520 = vst [vmem:[#allocation20_spill] sm:$0xff] %v9851_v6  ;;  %v9864_v6 = vrot.slane %v5517_v45, %v5521_v2 }
 0x2c1   : > { %v5406_v14 = vpop.f32.mrb[52].mxu1 }
 0x2c2   : > { %v5336_v9 = vpop.f32.mrb[0].mxu0  ;;  %v7230_v18 = vadd.f32 %v9805_v36, %v5406_v14  ;;  %v5408_v58 = vpop.f32.mrb[53].mxu1 }
 0x2c3   : > { %v7201_v7 = vadd.f32 %v5336_v9, %v9749_v40  ;;  %v5338_v47 = vpop.f32.mrb[1].mxu0  ;;  %v7232_v10 = vadd.f32 %v9807_v55, %v5408_v58  ;;  %v5410_v20 = vpop.f32.mrb[54].mxu1 }
 0x2c4   : > { %v7202_v23 = vadd.f32 %v5338_v47, %v9751_v11  ;;  %v5340_v54 = vpop.f32.mrb[2].mxu0  ;;  %v9862_v51 = vadd.f32 %v9809_v48, %v5410_v20  ;;  %v5412_v9 = vpop.f32.mrb[55].mxu1  ;;  %v9874_v55 = vadd.f32 %v7230_v18, %v9864_v6 }
 0x2c5   : > { %v7203_v39 = vadd.f32 %v5340_v54, %v9753_v5  ;;  %v5342_v40 = vpop.f32.mrb[3].mxu0  ;;  %v9868_v36 = vadd.f32 %v9811_v3, %v5412_v9  ;;  %v5529_v11 = vadd.f32 %v7201_v7, %v9864_v6  ;;  %v9878_v58 = vadd.f32 %v7232_v10, %v9870_v30 }
 0x2c6   : > { %10521 = vst [vmem:[#allocation21_spill] sm:$0xff] %v9862_v51  ;;  %v7204_v14 = vadd.f32 %v5342_v40, %v9755_v8  ;;  %10523 = vst [vmem:[#allocation23_spill] sm:$0xff] %v9874_v55  ;;  %v5530_v48 = vadd.f32 %v7202_v23, %v9870_v30 }
 0x2c7   : > { %10522 = vst [vmem:[#allocation22_spill] sm:$0xff] %v9868_v36  ;;  %10524 = vst [vmem:[#allocation24_spill] sm:$0xff] %v9878_v58  ;;  %v5531_v45 = vadd.f32 %v7203_v39, %v9864_v6 }
 0x2c8   : > { %v5532_v7 = vadd.f32 %v7204_v14, %v9870_v30 }
 0x2c9   : > { %v5416_v47 = vpop.f32.mrb[56].mxu1 }
 0x2ca   : > { %v5346_v5 = vpop.f32.mrb[4].mxu0  ;;  %v7238_v8 = vadd.f32 %v9813_v46, %v5416_v47  ;;  %v5418_v54 = vpop.f32.mrb[57].mxu1  ;;  %v5581_v47 = vmax.f32 %v5529_v11, 0.0 }
 0x2cb   : > { %v7205_v2 = vadd.f32 %v5346_v5, %v9757_v59  ;;  %v5348_v3 = vpop.f32.mrb[5].mxu0  ;;  %v7240_v33 = vadd.f32 %v9815_v61, %v5418_v54  ;;  %v5420_v40 = vpop.f32.mrb[58].mxu1 }
 0x2cc   : > { %v7206_v18 = vadd.f32 %v5348_v3, %v9759_v50  ;;  %v5350_v20 = vpop.f32.mrb[6].mxu0  ;;  %v9888_v10 = vadd.f32 %v7238_v8, %v9864_v6  ;;  %v7242_v46 = vadd.f32 %v9817_v37, %v5420_v40  ;;  %v5422_v5 = vpop.f32.mrb[59].mxu1 }
 0x2cd   : > { %v5533_v23 = vadd.f32 %v7205_v2, %v9864_v6  ;;  %v7207_v59 = vadd.f32 %v5350_v20, %v9761_v62  ;;  %v5352_v9 = vpop.f32.mrb[7].mxu0  ;;  %v9894_v14 = vadd.f32 %v7240_v33, %v9870_v30  ;;  %v7244_v61 = vadd.f32 %v9819_v17, %v5422_v5 }
 0x2ce   : > { %10525 = vst [vmem:[#allocation25_spill] sm:$0xff] %v9888_v10  ;;  %v5534_v39 = vadd.f32 %v7206_v18, %v9870_v30  ;;  %v7208_v50 = vadd.f32 %v5352_v9, %v9763_v24  ;;  %v9900_v3 = vadd.f32 %v7242_v46, %v9864_v6  ;;  %v5582_v62 = vmax.f32 %v5530_v48, 0.0 }
 0x2cf   : > { %10526 = vst [vmem:[#allocation26_spill] sm:$0xff] %v9894_v14  ;;  %v5585_v2 = vmax.f32 %v5533_v23, 0.0  ;;  %v5535_v8 = vadd.f32 %v7207_v59, %v9864_v6  ;;  %v9904_v18 = vadd.f32 %v7244_v61, %v9870_v30  ;;  %v5583_v24 = vmax.f32 %v5531_v45, 0.0 }
 0x2d0   : > { %v5586_v37 = vmax.f32 %v5534_v39, 0.0  ;;  %v5536_v54 = vadd.f32 %v7208_v50, %v9870_v30  ;;  %v5584_v33 = vmax.f32 %v5532_v7, 0.0  ;;  %v10496_v20 = vmax.f32 %v9888_v10, 0.0 }
 0x2d1   : > { %v5694_v17 = vmax.f32 %v5581_v47, %v5585_v2  ;;  %v5587_v11 = vmax.f32 %v5535_v8, 0.0  ;;  %v10495_v23 = vmax.f32 %v9894_v14, 0.0  ;;  %v5426_v46 = vpop.f32.mrb[60].mxu1 }
 0x2d2   : > { %v5695_v40 = vmax.f32 %v5582_v62, %v5586_v37  ;;  %v5588_v59 = vmax.f32 %v5536_v54, 0.0  ;;  %v5356_v48 = vpop.f32.mrb[8].mxu0  ;;  %v7246_v50 = vadd.f32 %v9821_v25, %v5426_v46  ;;  %v5428_v7 = vpop.f32.mrb[61].mxu1 }
 0x2d3   : > { %v5696_v9 = vmax.f32 %v5583_v24, %v5587_v11  ;;  %v7209_v39 = vadd.f32 %v5356_v48, %v9765_v44  ;;  %v5358_v45 = vpop.f32.mrb[9].mxu0  ;;  %v7248_v8 = vadd.f32 %v9823_v13, %v5428_v7  ;;  %v5430_v37 = vpop.f32.mrb[62].mxu1 }
 0x2d4   : > { %v9911_v61 = vmax.f32 %v5584_v33, %v5588_v59  ;;  %v7210_v2 = vadd.f32 %v5358_v45, %v9767_v19  ;;  %v5360_v62 = vpop.f32.mrb[10].mxu0  ;;  %v5565_v44 = vadd.f32 %v7246_v50, %v9864_v6  ;;  %v7250_v24 = vadd.f32 %v9825_v63, %v5430_v37  ;;  %v5432_v11 = vpop.f32.mrb[63].mxu1 }
 0x2d5   : > { %v9917_v54 = vadd.f32 %v7209_v39, %v9864_v6  ;;  %v7211_v25 = vadd.f32 %v5360_v62, %v9769_v22  ;;  %v5362_v33 = vpop.f32.mrb[11].mxu0  ;;  %v5566_v19 = vadd.f32 %v7248_v8, %v9870_v30  ;;  %v7252_v48 = vadd.f32 %v9827_v1, %v5432_v11 }
 0x2d6   : > { %v9923_v59 = vadd.f32 %v7210_v2, %v9870_v30  ;;  %v7212_v13 = vadd.f32 %v5362_v33, %v9771_v26  ;;  %v5617_v39 = vmax.f32 %v5565_v44, 0.0  ;;  %v9933_v22 = vadd.f32 %v7250_v24, %v9864_v6 }
 0x2d7   : > { %v10498_v46 = vmax.f32 %v9917_v54, 0.0  ;;  %v9930_v50 = vadd.f32 %v7211_v25, %v9864_v6  ;;  %v5618_v45 = vmax.f32 %v5566_v19, 0.0  ;;  %v9940_v2 = vadd.f32 %v7252_v48, %v9870_v30 }
 0x2d8   : > { %v10497_v63 = vmax.f32 %v9923_v59, 0.0  ;;  %v9937_v7 = vadd.f32 %v7212_v13, %v9870_v30  ;;  %v9946_v1 = vmax.f32 %v10496_v20, %v5617_v39 }
 0x2d9   : > { %v5703_v26 = vmax.f32 %v5694_v17, %v10498_v46  ;;  %v10499_v8 = vmax.f32 %v9930_v50, 0.0  ;;  %v9956_v44 = vmax.f32 %v10495_v23, %v5618_v45  ;;  %v9962_v33 = vpop.f32.mrb[64].mxu1 }
 0x2da   : > { %v9952_v37 = vmax.f32 %v5695_v40, %v10497_v63  ;;  %v9960_v24 = vpop.f32.mrb[12].mxu0  ;;  %v9973_v39 = vpop.f32.mrb[65].mxu1 }
 0x2db   : > { %v5798_v11 = vsel %vm5797_vm2, %v5703_v26, -inf  ;;  %v5883_v19 = vsel %vm5882_vm3, %v5703_v26, -inf  ;;  %v5968_v13 = vsel %vm5967_vm4, %v5703_v26, -inf  ;;  %v9969_v40 = vmax.f32 %v5696_v9, %v10499_v8  ;;  %v9971_v48 = vpop.f32.mrb[13].mxu0  ;;  %v9979_v47 = vpop.f32.mrb[66].mxu1 }
 0x2dc   : > { %v5799_v45 = vrot.slane %v5798_v11, 4  ;;  %v5884_v23 = vrot.slane %v5883_v19, 4  ;;  %v5969_v20 = vrot.slane %v5968_v13, 4  ;;  %v5805_v63 = vsel %vm5797_vm2, %v9952_v37, -inf  ;;  %v9977_v46 = vpop.f32.mrb[14].mxu0  ;;  %v9988_v62 = vpop.f32.mrb[67].mxu1 }
 0x2dd   : > { %v5806_v17 = vrot.slane %v5805_v63, 4  ;;  %v5890_v25 = vsel %vm5882_vm3, %v9952_v37, -inf  ;;  %v5975_v9 = vsel %vm5967_vm4, %v9952_v37, -inf  ;;  %v6053_v8 = vsel %vm6052_vm5, %v5703_v26, -inf  ;;  %v9986_v5 = vpop.f32.mrb[15].mxu0 }
 0x2de   : > { %v5800_v36 = vmax.f32 %v5798_v11, %v5799_v45  ;;  %v5885_v14 = vmax.f32 %v5883_v19, %v5884_v23  ;;  %v5970_v58 = vmax.f32 %v5968_v13, %v5969_v20  ;;  %v5891_v51 = vrot.slane %v5890_v25, 4 }
 0x2df   : > { %v5807_v10 = vmax.f32 %v5805_v63, %v5806_v17  ;;  %v5976_v49 = vrot.slane %v5975_v9, 4  ;;  %v6055_v55 = vsel %vm6054_vm6, %v9969_v40, -inf  ;;  %v6162_v60 = vsel %vm5797_vm2, %v9969_v40, -inf }
 0x2e0   : > { %v5801_v35 = vrot.slane %v5800_v36, 2  ;;  %v5886_v34 = vrot.slane %v5885_v14, 2  ;;  %v5971_v26 = vrot.slane %v5970_v58, 2  ;;  %v5892_v27 = vmax.f32 %v5890_v25, %v5891_v51 }
 0x2e1   : > { %v5808_v21 = vrot.slane %v5807_v10, 2  ;;  %v5977_v57 = vmax.f32 %v5975_v9, %v5976_v49  ;;  %v6056_v12 = vmax.f32 %v6053_v8, %v6055_v55  ;;  %v6163_v11 = vrot.slane %v6162_v60, 4  ;;  %v9996_v17 = vpop.f32.mrb[68].mxu1 }
 0x2e2   : > { %v5802_v23 = vmax.f32 %v5800_v36, %v5801_v35  ;;  %v5887_v20 = vmax.f32 %v5885_v14, %v5886_v34  ;;  %v5972_v19 = vmax.f32 %v5970_v58, %v5971_v26  ;;  %v5893_v13 = vrot.slane %v5892_v27, 2  ;;  %v9994_v63 = vpop.f32.mrb[16].mxu0  ;;  %v10000_v52 = vpop.f32.mrb[69].mxu1 }
 0x2e3   : > { %v5809_v45 = vmax.f32 %v5807_v10, %v5808_v21  ;;  %v5978_v4 = vrot.slane %v5977_v57, 2  ;;  %v6057_v29 = vrot.slane %v6056_v12, 4  ;;  %v6164_v0 = vmax.f32 %v6162_v60, %v6163_v11  ;;  %v9998_v56 = vpop.f32.mrb[17].mxu0  ;;  %10528 = vst [vmem:[#allocation28_spill] sm:$0xff] %v10000_v52  ;;  %v10004_v34 = vpop.f32.mrb[70].mxu1 }
 0x2e4   : > { %10527 = vst [vmem:[#allocation27_spill] sm:$0xff] %v9998_v56  ;;  %v5803_v51 = vrot.slane %v5802_v23, 1  ;;  %v5888_v49 = vrot.slane %v5887_v20, 1  ;;  %v5973_v55 = vrot.slane %v5972_v19, 1  ;;  %v5894_v8 = vmax.f32 %v5892_v27, %v5893_v13  ;;  %v10002_v35 = vpop.f32.mrb[18].mxu0  ;;  %10530 = vst [vmem:[#allocation30_spill] sm:$0xff] %v10004_v34 }
 0x2e5   : > { %10529 = vst [vmem:[#allocation29_spill] sm:$0xff] %v10002_v35  ;;  %v5810_v36 = vrot.slane %v5809_v45, 1  ;;  %v5979_v58 = vmax.f32 %v5977_v57, %v5978_v4  ;;  %v6058_v14 = vmax.f32 %v6056_v12, %v6057_v29  ;;  %v6165_v25 = vrot.slane %v6164_v0, 2  ;;  %v10006_v21 = vpop.f32.mrb[19].mxu0  ;;  %v10008_v60 = vpop.f32.mrb[71].mxu1 }
 0x2e6   : > { %v5804_v10 = vmax.f32 %v5802_v23, %v5803_v51  ;;  %v5889_v9 = vmax.f32 %v5887_v20, %v5888_v49  ;;  %v5974_v26 = vmax.f32 %v5972_v19, %v5973_v55  ;;  %v5895_v11 = vrot.slane %v5894_v8, 1 }
 0x2e7   : > { %v5811_v52 = vmax.f32 %v5809_v45, %v5810_v36  ;;  %v5980_v56 = vrot.slane %v5979_v58, 1  ;;  %v6059_v27 = vrot.slane %v6058_v14, 2  ;;  %v6166_v13 = vmax.f32 %v6164_v0, %v6165_v25 }
 0x2e8   : > { %v6330_v35 = vsel %vm6054_vm6, %v5804_v10, %v5889_v9  ;;  %v5896_v34 = vmax.f32 %v5894_v8, %v5895_v11  ;;  %v6246_v4 = vsel %vm5882_vm3, %v9969_v40, -inf  ;;  %v10531_v57 = vmax.f32 %v9933_v22, 0.0 }
 0x2e9   : > { %v10532_v29 = vmax.f32 %v9900_v3, 0.0  ;;  %v6343_v23 = vsel %vm6342_vm7, %v6330_v35, %v5974_v26  ;;  %v5981_v20 = vmax.f32 %v5979_v58, %v5980_v56  ;;  %v6060_v19 = vmax.f32 %v6058_v14, %v6059_v27  ;;  %v10028_v8 = vpop.f32.mrb[72].mxu1 }
 0x2ea   : > { %v6167_v45 = vrot.slane %v6166_v13, 1  ;;  %v6331_v51 = vsel %vm6054_vm6, %v5811_v52, %v5896_v34  ;;  %v6247_v0 = vrot.slane %v6246_v4, 4  ;;  %v10533_v49 = vmax.f32 %v9937_v7, 0.0  ;;  %v10026_v22 = vpop.f32.mrb[20].mxu0  ;;  %v10041_v14 = vpop.f32.mrb[73].mxu1 }
 0x2eb   : > { %v10017_v12 = vmax.f32 %v10532_v29, %v10531_v57  ;;  %v6063_v40 = vsel %vm6052_vm5, %v9952_v37, -inf  ;;  %v10031_v36 = vsel %vm6342_vm7, %v6331_v51, %v5981_v20  ;;  %v6061_v56 = vrot.slane %v6060_v19, 1  ;;  %v10048_v11 = vpop.f32.mrb[74].mxu1 }
 0x2ec   : > { %v5706_v55 = vmax.f32 %v9911_v61, %v10533_v49  ;;  %v6168_v35 = vmax.f32 %v6166_v13, %v6167_v45  ;;  %v10534_v52 = vmax.f32 %v9940_v2, 0.0  ;;  %v10535_v34 = vmax.f32 %v9904_v18, 0.0  ;;  %v10039_v61 = vpop.f32.mrb[21].mxu0  ;;  %v10052_v20 = vpop.f32.mrb[75].mxu1 }
 0x2ed   : > { %v6248_v37 = vmax.f32 %v6246_v4, %v6247_v0  ;;  %v10046_v26 = vpop.f32.mrb[22].mxu0  ;;  %v6062_v2 = vmax.f32 %v6060_v19, %v6061_v56  ;;  %v7213_v45 = vadd.f32 %v9960_v24, %v9773_v31  ;;  %v7254_v51 = vadd.f32 %v9829_v38, %v9962_v33 }
 0x2ee   : > { %v10037_v58 = vmax.f32 %v10535_v34, %v10534_v52  ;;  %v6064_v25 = vsel %vm6054_vm6, %v5706_v55, -inf  ;;  %v6169_v10 = vsel %vm5797_vm2, %v5706_v55, -inf  ;;  %v6253_v9 = vsel %vm5882_vm3, %v5706_v55, -inf  ;;  %v10050_v29 = vpop.f32.mrb[23].mxu0 }
 0x2ef   : > { %v6065_v27 = vmax.f32 %v6063_v40, %v6064_v25  ;;  %v6170_v13 = vrot.slane %v6169_v10, 4  ;;  %v6254_v57 = vrot.slane %v6253_v9, 4  ;;  %v6249_v4 = vrot.slane %v6248_v37, 2 }
 0x2f0   : > { %v7214_v0 = vadd.f32 %v9971_v48, %v9775_v32  ;;  %v6355_v49 = vsel %vm5797_vm2, %v6343_v23, %v6062_v2  ;;  %v5541_v34 = vadd.f32 %v7213_v45, %v9864_v6  ;;  %v10065_v25 = vadd.f32 %v7254_v51, %v9864_v6 }
 0x2f1   : > { %v6066_v19 = vrot.slane %v6065_v27, 4  ;;  %v6171_v55 = vmax.f32 %v6169_v10, %v6170_v13  ;;  %v6255_v40 = vmax.f32 %v6253_v9, %v6254_v57  ;;  %v6250_v56 = vmax.f32 %v6248_v37, %v6249_v4 }
 0x2f2   : > { %v6368_v52 = vsel %vm6367_vm8, %v6355_v49, %v6168_v35  ;;  %v5542_v33 = vadd.f32 %v7214_v0, %v9870_v30  ;;  %v5593_v48 = vmax.f32 %v5541_v34, 0.0  ;;  %v5621_v23 = vmax.f32 %v10065_v25, 0.0  ;;  %v10071_v37 = vpop.f32.mrb[24].mxu0 }
 0x2f3   : > { %v6067_v31 = vmax.f32 %v6065_v27, %v6066_v19  ;;  %v6172_v24 = vrot.slane %v6171_v55, 2  ;;  %v6256_v38 = vrot.slane %v6255_v40, 2  ;;  %v6251_v32 = vrot.slane %v6250_v56, 1  ;;  %v10073_v57 = vpop.f32.mrb[25].mxu0 }
 0x2f4   : > { %v7256_v10 = vadd.f32 %v9831_v41, %v9973_v39  ;;  %v5594_v13 = vmax.f32 %v5542_v33, 0.0  ;;  %v10536_v4 = vmax.f32 %v9917_v54, 0.0  ;;  %v5775_v41 = vmax.f32 %v9946_v1, %v5621_v23  ;;  %v10090_v51 = vpop.f32.mrb[26].mxu0 }
 0x2f5   : > { %v6068_v35 = vrot.slane %v6067_v31, 2  ;;  %v6173_v9 = vmax.f32 %v6171_v55, %v6172_v24  ;;  %v6257_v2 = vmax.f32 %v6255_v40, %v6256_v38  ;;  %v6252_v27 = vmax.f32 %v6250_v56, %v6251_v32  ;;  %v10096_v56 = vpop.f32.mrb[27].mxu0 }
 0x2f6   : > { %v10082_v45 = vmax.f32 %v10536_v4, %v5593_v48  ;;  %v10088_v39 = vadd.f32 %v7256_v10, %v9870_v30  ;;  %v10537_v55 = vmax.f32 %v9923_v59, 0.0  ;;  %v5854_v34 = vsel %vm5797_vm2, %v5775_v41, -inf }
 0x2f7   : > { %v6069_v0 = vmax.f32 %v6067_v31, %v6068_v35  ;;  %v6174_v49 = vrot.slane %v6173_v9, 1  ;;  %v6258_v19 = vrot.slane %v6257_v2, 1  ;;  %v6381_v54 = vsel %vm6380_vm9, %v6368_v52, %v6252_v27 }
 0x2f8   : > { %v10094_v40 = vmax.f32 %v10537_v55, %v5594_v13  ;;  %v5939_v1 = vsel %vm5882_vm3, %v5775_v41, -inf  ;;  %v6024_v24 = vsel %vm5967_vm4, %v5775_v41, -inf  ;;  %6393 = vst [vmem:[%s10078_s19] sm:$0x3f] %v6381_v54  ;;  %v5855_v32 = vrot.slane %v5854_v34, 4 }
 0x2f9   : > { %v6070_v38 = vrot.slane %v6069_v0, 1  ;;  %v6175_v33 = vmax.f32 %v6173_v9, %v6174_v49  ;;  %v6259_v31 = vmax.f32 %v6257_v2, %v6258_v19  ;;  %v5940_v48 = vrot.slane %v5939_v1, 4 }
 0x2fa   : > { %v6025_v10 = vrot.slane %v6024_v24, 4  ;;  %v5622_v59 = vmax.f32 %v10088_v39, 0.0  ;;  %v7215_v35 = vadd.f32 %v9977_v46, %v9777_v43  ;;  %v5856_v52 = vmax.f32 %v5854_v34, %v5855_v32 }
 0x2fb   : > { %v6071_v13 = vmax.f32 %v6069_v0, %v6070_v38  ;;  %v7258_v27 = vadd.f32 %v9833_v28, %v9979_v47  ;;  %v6126_v4 = vsel %vm6052_vm5, %v5775_v41, -inf  ;;  %v5941_v55 = vmax.f32 %v5939_v1, %v5940_v48 }
 0x2fc   : > { %v6026_v54 = vmax.f32 %v6024_v24, %v6025_v10  ;;  %v5776_v9 = vmax.f32 %v9956_v44, %v5622_v59  ;;  %v5543_v2 = vadd.f32 %v7215_v35, %v9864_v6  ;;  %v5857_v43 = vrot.slane %v5856_v52, 2 }
 0x2fd   : > { %v6356_v49 = vsel %vm5797_vm2, %v10031_v36, %v6071_v13  ;;  %v10116_v46 = vadd.f32 %v7258_v27, %v9864_v6  ;;  %v7216_v28 = vadd.f32 %v9986_v5, %v9779_v15  ;;  %v5942_v41 = vrot.slane %v5941_v55, 2 }
 0x2fe   : > { %v6369_v47 = vsel %vm6367_vm8, %v6356_v49, %v6175_v33  ;;  %v6027_v0 = vrot.slane %v6026_v54, 2  ;;  %v5861_v19 = vsel %vm5797_vm2, %v5776_v9, -inf  ;;  %v5858_v34 = vmax.f32 %v5856_v52, %v5857_v43 }
 0x2ff   : > { %v6382_v44 = vsel %vm6380_vm9, %v6369_v47, %v6259_v31  ;;  %v5862_v1 = vrot.slane %v5861_v19, 4  ;;  %v5946_v24 = vsel %vm5882_vm3, %v5776_v9, -inf  ;;  %v5943_v36 = vmax.f32 %v5941_v55, %v5942_v41 }
 0x300   : > { %6394 = vst [vmem:[%s10078_s19 + $0x8] sm:$0x3f] %v6382_v44  ;;  %v6028_v38 = vmax.f32 %v6026_v54, %v6027_v0  ;;  %v5947_v32 = vrot.slane %v5946_v24, 4  ;;  %v6031_v48 = vsel %vm5967_vm4, %v5776_v9, -inf  ;;  %v5859_v10 = vrot.slane %v5858_v34, 1 }
 0x301   : > { %v5863_v15 = vmax.f32 %v5861_v19, %v5862_v1  ;;  %v6032_v5 = vrot.slane %v6031_v48, 4  ;;  %v5595_v33 = vmax.f32 %v5543_v2, 0.0  ;;  %v5944_v35 = vrot.slane %v5943_v36, 1 }
 0x302   : > { %v6029_v13 = vrot.slane %v6028_v38, 1  ;;  %v5948_v27 = vmax.f32 %v5946_v24, %v5947_v32  ;;  %v5623_v49 = vmax.f32 %v10116_v46, 0.0  ;;  %v5860_v31 = vmax.f32 %v5858_v34, %v5859_v10 }
 0x303   : > { %v5864_v52 = vrot.slane %v5863_v15, 2  ;;  %v6033_v43 = vmax.f32 %v6031_v48, %v6032_v5  ;;  %v10538_v47 = vmax.f32 %v9930_v50, 0.0  ;;  %v5945_v55 = vmax.f32 %v5943_v36, %v5944_v35 }
 0x304   : > { %v6030_v54 = vmax.f32 %v6028_v38, %v6029_v13  ;;  %v5949_v41 = vrot.slane %v5948_v27, 2  ;;  %v5777_v0 = vmax.f32 %v10017_v12, %v5623_v49  ;;  %v5544_v1 = vadd.f32 %v7216_v28, %v9870_v30 }
 0x305   : > { %v10129_v44 = vmax.f32 %v10538_v47, %v5595_v33  ;;  %v5865_v2 = vmax.f32 %v5863_v15, %v5864_v52  ;;  %v6034_v19 = vrot.slane %v6033_v43, 2  ;;  %v7260_v34 = vadd.f32 %v9835_v53, %v9988_v62 }
 0x306   : > { %v6338_v24 = vsel %vm6054_vm6, %v5860_v31, %v5945_v55  ;;  %v5950_v32 = vmax.f32 %v5948_v27, %v5949_v41  ;;  %v6127_v50 = vsel %vm6054_vm6, %v5777_v0, -inf  ;;  %v6218_v36 = vsel %vm5797_vm2, %v5777_v0, -inf }
 0x307   : > { %v6351_v38 = vsel %vm6342_vm7, %v6338_v24, %v6030_v54  ;;  %v5866_v48 = vrot.slane %v5865_v2, 1  ;;  %v6035_v10 = vmax.f32 %v6033_v43, %v6034_v19  ;;  %v6128_v5 = vmax.f32 %v6126_v4, %v6127_v50 }
 0x308   : > { %v5951_v12 = vrot.slane %v5950_v32, 1  ;;  %v6219_v15 = vrot.slane %v6218_v36, 4  ;;  %v6302_v33 = vsel %vm5882_vm3, %v5777_v0, -inf  ;;  %v5596_v28 = vmax.f32 %v5544_v1, 0.0 }
 0x309   : > { %v5867_v35 = vmax.f32 %v5865_v2, %v5866_v48  ;;  %v6036_v13 = vrot.slane %v6035_v10, 1  ;;  %v6129_v53 = vrot.slane %v6128_v5, 4  ;;  %v6303_v62 = vrot.slane %v6302_v33, 4  ;;  %v10540_v48 = vld [vmem:[#allocation3_spill] sm:$0xff] }
 0x30a   : > { %v5952_v31 = vmax.f32 %v5950_v32, %v5951_v12  ;;  %v6220_v27 = vmax.f32 %v6218_v36, %v6219_v15  ;;  %v10539_v52 = vmax.f32 %v9937_v7, 0.0  ;;  %v10147_v55 = vadd.f32 %v7260_v34, %v9870_v30  ;;  %v10542_v15 = vld [vmem:[#allocation28_spill] sm:$0xff] }
 0x30b   : > { %v6037_v43 = vmax.f32 %v6035_v10, %v6036_v13  ;;  %v6130_v4 = vmax.f32 %v6128_v5, %v6129_v53  ;;  %v6304_v54 = vmax.f32 %v6302_v33, %v6303_v62  ;;  %v6135_v41 = vsel %vm6052_vm5, %v5776_v9, -inf  ;;  %v10541_v10 = vld [vmem:[#allocation27_spill] sm:$0xff]  ;;  %v10543_v33 = vld [vmem:[#allocation14_spill] sm:$0xff] }
 0x30c   : > { %v10144_v47 = vmax.f32 %v10539_v52, %v5596_v28  ;;  %v6339_v0 = vsel %vm6054_vm6, %v5867_v35, %v5952_v31  ;;  %v6221_v2 = vrot.slane %v6220_v27, 2  ;;  %v5624_v19 = vmax.f32 %v10147_v55, 0.0 }
 0x30d   : > { %v7217_v1 = vadd.f32 %v9994_v63, %v9781_v16  ;;  %v10155_v7 = vsel %vm6342_vm7, %v6339_v0, %v6037_v43  ;;  %v6131_v24 = vrot.slane %v6130_v4, 2  ;;  %v6305_v32 = vrot.slane %v6304_v54, 2 }
 0x30e   : > { %v7262_v34 = vadd.f32 %v9837_v42, %v9996_v17  ;;  %v6222_v50 = vmax.f32 %v6220_v27, %v6221_v2  ;;  %v5778_v9 = vmax.f32 %v10037_v58, %v5624_v19  ;;  %v7218_v5 = vadd.f32 %v10541_v10, %v10540_v48 }
 0x30f   : > { %v10163_v36 = vadd.f32 %v7217_v1, %v9864_v6  ;;  %v6132_v16 = vmax.f32 %v6130_v4, %v6131_v24  ;;  %v6306_v63 = vmax.f32 %v6304_v54, %v6305_v32  ;;  %v7264_v28 = vadd.f32 %v10543_v33, %v10542_v15 }
 0x310   : > { %v5573_v12 = vadd.f32 %v7262_v34, %v9864_v6  ;;  %v6223_v35 = vrot.slane %v6222_v50, 1  ;;  %v6136_v42 = vsel %vm6054_vm6, %v5778_v9, -inf  ;;  %v6225_v17 = vsel %vm5797_vm2, %v5778_v9, -inf }
 0x311   : > { %v6309_v58 = vsel %vm5882_vm3, %v5778_v9, -inf  ;;  %v6133_v13 = vrot.slane %v6132_v16, 1  ;;  %v6307_v53 = vrot.slane %v6306_v63, 1  ;;  %v6137_v62 = vmax.f32 %v6135_v41, %v6136_v42 }
 0x312   : > { %v6226_v31 = vrot.slane %v6225_v17, 4  ;;  %v6224_v27 = vmax.f32 %v6222_v50, %v6223_v35  ;;  %v6310_v52 = vrot.slane %v6309_v58, 4  ;;  %v5597_v43 = vmax.f32 %v10163_v36, 0.0 }
 0x313   : > { %v5625_v4 = vmax.f32 %v5573_v12, 0.0  ;;  %v6134_v54 = vmax.f32 %v6132_v16, %v6133_v13  ;;  %v6308_v0 = vmax.f32 %v6306_v63, %v6307_v53  ;;  %v6138_v2 = vrot.slane %v6137_v62, 4 }
 0x314   : > { %v6227_v1 = vmax.f32 %v6225_v17, %v6226_v31  ;;  %v6311_v24 = vmax.f32 %v6309_v58, %v6310_v52  ;;  %v10177_v32 = vmax.f32 %v10082_v45, %v5597_v43  ;;  %v10184_v34 = vadd.f32 %v7218_v5, %v9870_v30 }
 0x315   : > { %v10181_v41 = vmax.f32 %v5621_v23, %v5625_v4  ;;  %v6363_v50 = vsel %vm5797_vm2, %v6351_v38, %v6134_v54  ;;  %v6139_v9 = vmax.f32 %v6137_v62, %v6138_v2  ;;  %v5574_v10 = vadd.f32 %v7264_v28, %v9870_v30 }
 0x316   : > { %v6228_v48 = vrot.slane %v6227_v1, 2  ;;  %v6376_v16 = vsel %vm6367_vm8, %v6363_v50, %v6224_v27  ;;  %v6312_v63 = vrot.slane %v6311_v24, 2  ;;  %v5812_v45 = vsel %vm5797_vm2, %v10177_v32, -inf }
 0x317   : > { %v5897_v25 = vsel %vm5882_vm3, %v10177_v32, -inf  ;;  %v6389_v23 = vsel %vm6380_vm9, %v6376_v16, %v6308_v0  ;;  %v6140_v12 = vrot.slane %v6139_v9, 2  ;;  %v5813_v15 = vrot.slane %v5812_v45, 4 }
 0x318   : > { %v6229_v5 = vmax.f32 %v6227_v1, %v6228_v48  ;;  %6401 = vst [vmem:[%s10078_s19 + $0x40] sm:$0x3f] %v6389_v23  ;;  %v6313_v38 = vmax.f32 %v6311_v24, %v6312_v63  ;;  %v5898_v33 = vrot.slane %v5897_v25, 4  ;;  %v5982_v28 = vsel %vm5967_vm4, %v10177_v32, -inf }
 0x319   : > { %v5598_v35 = vmax.f32 %v10184_v34, 0.0  ;;  %v6141_v42 = vmax.f32 %v6139_v9, %v6140_v12  ;;  %v5814_v58 = vmax.f32 %v5812_v45, %v5813_v15  ;;  %v5983_v13 = vrot.slane %v5982_v28, 4 }
 0x31a   : > { %v6230_v17 = vrot.slane %v6229_v5, 1  ;;  %v6314_v53 = vrot.slane %v6313_v38, 1  ;;  %v5899_v62 = vmax.f32 %v5897_v25, %v5898_v33  ;;  %v5626_v27 = vmax.f32 %v5574_v10, 0.0 }
 0x31b   : > { %v5722_v31 = vmax.f32 %v10094_v40, %v5598_v35  ;;  %v6142_v52 = vrot.slane %v6141_v42, 1  ;;  %v5815_v54 = vrot.slane %v5814_v58, 2  ;;  %v5984_v0 = vmax.f32 %v5982_v28, %v5983_v13 }
 0x31c   : > { %v6231_v4 = vmax.f32 %v6229_v5, %v6230_v17  ;;  %v6315_v2 = vmax.f32 %v6313_v38, %v6314_v53  ;;  %v5900_v1 = vrot.slane %v5899_v62, 2  ;;  %v10206_v10 = vmax.f32 %v5622_v59, %v5626_v27  ;;  %v10544_v27 = vld [vmem:[#allocation4_spill] sm:$0xff] }
 0x31d   : > { %v5819_v24 = vsel %vm5797_vm2, %v5722_v31, -inf  ;;  %v5904_v50 = vsel %vm5882_vm3, %v5722_v31, -inf  ;;  %v6143_v9 = vmax.f32 %v6141_v42, %v6142_v52  ;;  %v5816_v48 = vmax.f32 %v5814_v58, %v5815_v54  ;;  %v10545_v52 = vld [vmem:[#allocation29_spill] sm:$0xff] }
 0x31e   : > { %v5985_v16 = vrot.slane %v5984_v0, 2  ;;  %v5820_v63 = vrot.slane %v5819_v24, 4  ;;  %v5901_v45 = vmax.f32 %v5899_v62, %v5900_v1  ;;  %v5905_v25 = vrot.slane %v5904_v50, 4  ;;  %v10546_v1 = vld [vmem:[#allocation30_spill] sm:$0xff] }
 0x31f   : > { %v5989_v40 = vsel %vm5967_vm4, %v5722_v31, -inf  ;;  %v6364_v23 = vsel %vm5797_vm2, %v10155_v7, %v6143_v9  ;;  %v5817_v12 = vrot.slane %v5816_v48, 1  ;;  %v7219_v7 = vadd.f32 %v10545_v52, %v10544_v27  ;;  %v10551_v27 = vld [vmem:[#allocation17_spill] sm:$0xff] }
 0x320   : > { %v5986_v5 = vmax.f32 %v5984_v0, %v5985_v16  ;;  %v5821_v15 = vmax.f32 %v5819_v24, %v5820_v63  ;;  %v6377_v38 = vsel %vm6367_vm8, %v6364_v23, %v6231_v4  ;;  %v5902_v33 = vrot.slane %v5901_v45, 1  ;;  %v10547_v24 = vld [vmem:[#allocation15_spill] sm:$0xff] }
 0x321   : > { %v5906_v28 = vmax.f32 %v5904_v50, %v5905_v25  ;;  %v5990_v42 = vrot.slane %v5989_v40, 4  ;;  %v6390_v17 = vsel %vm6380_vm9, %v6377_v38, %v6315_v2  ;;  %v5818_v58 = vmax.f32 %v5816_v48, %v5817_v12 }
 0x322   : > { %v5987_v13 = vrot.slane %v5986_v5, 1  ;;  %v5822_v53 = vrot.slane %v5821_v15, 2  ;;  %6402 = vst [vmem:[%s10078_s19 + $0x48] sm:$0x3f] %v6390_v17  ;;  %v5903_v39 = vmax.f32 %v5901_v45, %v5902_v33  ;;  %v6072_v4 = vsel %vm6052_vm5, %v10177_v32, -inf }
 0x323   : > { %v5907_v59 = vrot.slane %v5906_v28, 2  ;;  %v5991_v62 = vmax.f32 %v5989_v40, %v5990_v42  ;;  %v7266_v50 = vadd.f32 %v10547_v24, %v10546_v1  ;;  %v10221_v16 = vadd.f32 %v7219_v7, %v9864_v6  ;;  %v10548_v40 = vld [vmem:[#allocation5_spill] sm:$0xff]  ;;  %v10549_v42 = vld [vmem:[#allocation16_spill] sm:$0xff] }
 0x324   : > { %v5988_v54 = vmax.f32 %v5986_v5, %v5987_v13  ;;  %v5823_v0 = vmax.f32 %v5821_v15, %v5822_v53  ;;  %v6332_v2 = vsel %vm6054_vm6, %v5818_v58, %v5903_v39  ;;  %v7220_v23 = vadd.f32 %v10006_v21, %v10548_v40  ;;  %v10550_v53 = vld [vmem:[#allocation6_spill] sm:$0xff] }
 0x325   : > { %v5908_v9 = vmax.f32 %v5906_v28, %v5907_v59  ;;  %v5992_v48 = vrot.slane %v5991_v62, 2  ;;  %v5575_v25 = vadd.f32 %v7266_v50, %v9864_v6  ;;  %v5599_v5 = vmax.f32 %v10221_v16, 0.0 }
 0x326   : > { %v10224_v63 = vsel %vm6342_vm7, %v6332_v2, %v5988_v54  ;;  %v5824_v45 = vrot.slane %v5823_v0, 1  ;;  %v6081_v15 = vsel %vm6052_vm5, %v5722_v31, -inf  ;;  %v10232_v28 = vadd.f32 %v7220_v23, %v9870_v30 }
 0x327   : > { %v5909_v32 = vrot.slane %v5908_v9, 1  ;;  %v5993_v12 = vmax.f32 %v5991_v62, %v5992_v48  ;;  %v5627_v33 = vmax.f32 %v5575_v25, 0.0  ;;  %v7268_v17 = vadd.f32 %v10549_v42, %v10008_v60 }
 0x328   : > { %v5825_v38 = vmax.f32 %v5823_v0, %v5824_v45  ;;  %v5723_v21 = vmax.f32 %v10129_v44, %v5599_v5  ;;  %v7221_v39 = vadd.f32 %v10026_v22, %v10550_v53  ;;  %v5600_v59 = vmax.f32 %v10232_v28, 0.0 }
 0x329   : > { %v5910_v58 = vmax.f32 %v5908_v9, %v5909_v32  ;;  %v5994_v13 = vrot.slane %v5993_v12, 1  ;;  %v10243_v31 = vmax.f32 %v5623_v49, %v5627_v33  ;;  %v5576_v62 = vadd.f32 %v7268_v17, %v9870_v30 }
 0x32a   : > { %v7270_v60 = vadd.f32 %v10551_v27, %v10028_v8  ;;  %v6073_v54 = vsel %vm6054_vm6, %v5723_v21, -inf  ;;  %v6176_v44 = vsel %vm5797_vm2, %v5723_v21, -inf  ;;  %v6260_v46 = vsel %vm5882_vm3, %v5723_v21, -inf }
 0x32b   : > { %v5995_v52 = vmax.f32 %v5993_v12, %v5994_v13  ;;  %v6333_v7 = vsel %vm6054_vm6, %v5825_v38, %v5910_v58  ;;  %v6074_v0 = vmax.f32 %v6072_v4, %v6073_v54  ;;  %v6177_v22 = vrot.slane %v6176_v44, 4 }
 0x32c   : > { %v5724_v49 = vmax.f32 %v10144_v47, %v5600_v59  ;;  %v6261_v24 = vrot.slane %v6260_v46, 4  ;;  %v5628_v8 = vmax.f32 %v5576_v62, 0.0  ;;  %v5549_v50 = vadd.f32 %v7221_v39, %v9864_v6 }
 0x32d   : > { %v10257_v1 = vsel %vm6342_vm7, %v6333_v7, %v5995_v52  ;;  %v6075_v2 = vrot.slane %v6074_v0, 4  ;;  %v6178_v9 = vmax.f32 %v6176_v44, %v6177_v22  ;;  %v5577_v39 = vadd.f32 %v7270_v60, %v9864_v6 }
 0x32e   : > { %v6082_v48 = vsel %vm6054_vm6, %v5724_v49, -inf  ;;  %v6183_v4 = vsel %vm5797_vm2, %v5724_v49, -inf  ;;  %v6262_v45 = vmax.f32 %v6260_v46, %v6261_v24  ;;  %v6267_v23 = vsel %vm5882_vm3, %v5724_v49, -inf  ;;  %v10552_v46 = vld [vmem:[#allocation7_spill] sm:$0xff] }
 0x32f   : > { %v6083_v25 = vmax.f32 %v6081_v15, %v6082_v48  ;;  %v6184_v40 = vrot.slane %v6183_v4, 4  ;;  %v6076_v32 = vmax.f32 %v6074_v0, %v6075_v2  ;;  %v6179_v47 = vrot.slane %v6178_v9, 2 }
 0x330   : > { %v6268_v12 = vrot.slane %v6267_v23, 4  ;;  %v10265_v38 = vmax.f32 %v5624_v19, %v5628_v8  ;;  %v6263_v33 = vrot.slane %v6262_v45, 2  ;;  %v5601_v58 = vmax.f32 %v5549_v50, 0.0 }
 0x331   : > { %v6084_v42 = vrot.slane %v6083_v25, 4  ;;  %v6185_v17 = vmax.f32 %v6183_v4, %v6184_v40  ;;  %v6077_v13 = vrot.slane %v6076_v32, 2  ;;  %v6180_v21 = vmax.f32 %v6178_v9, %v6179_v47 }
 0x332   : > { %v6269_v53 = vmax.f32 %v6267_v23, %v6268_v12  ;;  %v6264_v15 = vmax.f32 %v6262_v45, %v6263_v33  ;;  %v10270_v52 = vmax.f32 %v5597_v43, %v5601_v58  ;;  %v5629_v54 = vmax.f32 %v5577_v39, 0.0 }
 0x333   : > { %v6085_v62 = vmax.f32 %v6083_v25, %v6084_v42  ;;  %v6186_v27 = vrot.slane %v6185_v17, 2  ;;  %v6078_v7 = vmax.f32 %v6076_v32, %v6077_v13  ;;  %v6181_v55 = vrot.slane %v6180_v21, 1 }
 0x334   : > { %v6270_v19 = vrot.slane %v6269_v53, 2  ;;  %v6265_v44 = vrot.slane %v6264_v15, 1  ;;  %v7222_v49 = vadd.f32 %v10039_v61, %v10552_v46  ;;  %v5793_v50 = vmax.f32 %v10181_v41, %v5629_v54 }
 0x335   : > { %v6086_v0 = vrot.slane %v6085_v62, 2  ;;  %v6187_v22 = vmax.f32 %v6185_v17, %v6186_v27  ;;  %v6079_v24 = vrot.slane %v6078_v7, 1  ;;  %v6182_v8 = vmax.f32 %v6180_v21, %v6181_v55  ;;  %v10554_v55 = vld [vmem:[#allocation8_spill] sm:$0xff] }
 0x336   : > { %v6271_v60 = vmax.f32 %v6269_v53, %v6270_v19  ;;  %v6266_v2 = vmax.f32 %v6264_v15, %v6265_v44  ;;  %v5550_v43 = vadd.f32 %v7222_v49, %v9870_v30  ;;  %v5868_v45 = vsel %vm5797_vm2, %v5793_v50, -inf  ;;  %v10553_v15 = vld [vmem:[#allocation18_spill] sm:$0xff] }
 0x337   : > { %v6087_v9 = vmax.f32 %v6085_v62, %v6086_v0  ;;  %v6188_v36 = vrot.slane %v6187_v22, 1  ;;  %v6080_v48 = vmax.f32 %v6078_v7, %v6079_v24  ;;  %v5953_v25 = vsel %vm5882_vm3, %v5793_v50, -inf }
 0x338   : > { %v6272_v4 = vrot.slane %v6271_v60, 1  ;;  %v5869_v61 = vrot.slane %v5868_v45, 4  ;;  %v5954_v32 = vrot.slane %v5953_v25, 4  ;;  %v6038_v12 = vsel %vm5967_vm4, %v5793_v50, -inf }
 0x339   : > { %v6088_v40 = vrot.slane %v6087_v9, 1  ;;  %v6189_v23 = vmax.f32 %v6187_v22, %v6188_v36  ;;  %v6357_v47 = vsel %vm5797_vm2, %v10224_v63, %v6080_v48  ;;  %v5602_v33 = vmax.f32 %v5550_v43, 0.0  ;;  %v10557_v43 = vld [vmem:[#allocation9_spill] sm:$0xff] }
 0x33a   : > { %v6273_v41 = vmax.f32 %v6271_v60, %v6272_v4  ;;  %v6370_v42 = vsel %vm6367_vm8, %v6357_v47, %v6182_v8  ;;  %v5870_v58 = vmax.f32 %v5868_v45, %v5869_v61  ;;  %v5955_v13 = vmax.f32 %v5953_v25, %v5954_v32  ;;  %v10558_v25 = vld [vmem:[#allocation20_spill] sm:$0xff] }
 0x33b   : > { %v6089_v17 = vmax.f32 %v6087_v9, %v6088_v40  ;;  %v6383_v21 = vsel %vm6380_vm9, %v6370_v42, %v6266_v2  ;;  %v6039_v53 = vrot.slane %v6038_v12, 4  ;;  %v10285_v39 = vmax.f32 %v5598_v35, %v5602_v33  ;;  %v10555_v35 = vld [vmem:[#allocation19_spill] sm:$0xff] }
 0x33c   : > { %v7272_v63 = vadd.f32 %v10553_v15, %v10041_v14  ;;  %6395 = vst [vmem:[%s10078_s19 + $0x10] sm:$0x3f] %v6383_v21  ;;  %v5871_v27 = vrot.slane %v5870_v58, 2  ;;  %v5956_v7 = vrot.slane %v5955_v13, 2  ;;  %v7223_v19 = vadd.f32 %v10046_v26, %v10554_v55 }
 0x33d   : > { %v6358_v62 = vsel %vm5797_vm2, %v10257_v1, %v6089_v17  ;;  %v6040_v44 = vmax.f32 %v6038_v12, %v6039_v53  ;;  %v7274_v0 = vadd.f32 %v10555_v35, %v10048_v11  ;;  %v10556_v1 = vld [vmem:[#allocation23_spill] sm:$0xff]  ;;  %v7224_v48 = vadd.f32 %v10050_v29, %v10557_v43 }
 0x33e   : > { %v6371_v54 = vsel %vm6367_vm8, %v6358_v62, %v6189_v23  ;;  %v5578_v34 = vadd.f32 %v7272_v63, %v9870_v30  ;;  %v5872_v14 = vmax.f32 %v5870_v58, %v5871_v27  ;;  %v5957_v46 = vmax.f32 %v5955_v13, %v5956_v7 }
 0x33f   : > { %v6384_v22 = vsel %vm6380_vm9, %v6371_v54, %v6273_v41  ;;  %v5551_v49 = vadd.f32 %v7223_v19, %v9864_v6  ;;  %v5609_v24 = vmax.f32 %v10556_v1, 0.0  ;;  %v6041_v8 = vrot.slane %v6040_v44, 2 }
 0x340   : > { %6396 = vst [vmem:[%s10078_s19 + $0x18] sm:$0x3f] %v6384_v22  ;;  %v5630_v60 = vmax.f32 %v5578_v34, 0.0  ;;  %v5579_v26 = vadd.f32 %v7274_v0, %v9864_v6  ;;  %v5873_v2 = vrot.slane %v5872_v14, 1  ;;  %v5958_v9 = vrot.slane %v5957_v46, 1 }
 0x341   : > { %v5603_v36 = vmax.f32 %v5551_v49, 0.0  ;;  %v6042_v11 = vmax.f32 %v6040_v44, %v6041_v8  ;;  %v7276_v40 = vadd.f32 %v10558_v25, %v10052_v20  ;;  %v5552_v47 = vadd.f32 %v7224_v48, %v9870_v30 }
 0x342   : > { %v5794_v4 = vmax.f32 %v10206_v10, %v5630_v60  ;;  %v5631_v45 = vmax.f32 %v5579_v26, 0.0  ;;  %v5874_v23 = vmax.f32 %v5872_v14, %v5873_v2  ;;  %v5959_v61 = vmax.f32 %v5957_v46, %v5958_v9  ;;  %v10559_v2 = vld [vmem:[#allocation10_spill] sm:$0xff] }
 0x343   : > { %v10310_v32 = vmax.f32 %v5599_v5, %v5603_v36  ;;  %v6043_v41 = vrot.slane %v6042_v11, 1  ;;  %v6144_v20 = vsel %vm6052_vm5, %v5793_v50, -inf  ;;  %v5604_v5 = vmax.f32 %v5552_v47, 0.0 }
 0x344   : > { %v5875_v12 = vsel %vm5797_vm2, %v5794_v4, -inf  ;;  %v5960_v29 = vsel %vm5882_vm3, %v5794_v4, -inf  ;;  %v6045_v33 = vsel %vm5967_vm4, %v5794_v4, -inf  ;;  %v6340_v58 = vsel %vm6054_vm6, %v5874_v23, %v5959_v61 }
 0x345   : > { %v5876_v10 = vrot.slane %v5875_v12, 4  ;;  %v5961_v42 = vrot.slane %v5960_v29, 4  ;;  %v6046_v17 = vrot.slane %v6045_v33, 4  ;;  %v5795_v16 = vmax.f32 %v10243_v31, %v5631_v45 }
 0x346   : > { %v5580_v13 = vadd.f32 %v7276_v40, %v9870_v30  ;;  %v6044_v21 = vmax.f32 %v6042_v11, %v6043_v41  ;;  %v6153_v55 = vsel %vm6052_vm5, %v5794_v4, -inf  ;;  %v10326_v35 = vmax.f32 %v5600_v59, %v5604_v5 }
 0x347   : > { %v5877_v53 = vmax.f32 %v5875_v12, %v5876_v10  ;;  %v5962_v15 = vmax.f32 %v5960_v29, %v5961_v42  ;;  %v6047_v63 = vmax.f32 %v6045_v33, %v6046_v17  ;;  %v6145_v62 = vsel %vm6054_vm6, %v5795_v16, -inf }
 0x348   : > { %v6232_v27 = vsel %vm5797_vm2, %v5795_v16, -inf  ;;  %v6316_v7 = vsel %vm5882_vm3, %v5795_v16, -inf  ;;  %v6146_v44 = vmax.f32 %v6144_v20, %v6145_v62  ;;  %v5632_v0 = vmax.f32 %v5580_v13, 0.0 }
 0x349   : > { %v5878_v50 = vrot.slane %v5877_v53, 2  ;;  %v5963_v19 = vrot.slane %v5962_v15, 2  ;;  %v6048_v54 = vrot.slane %v6047_v63, 2  ;;  %v6233_v31 = vrot.slane %v6232_v27, 4 }
 0x34a   : > { %v6317_v34 = vrot.slane %v6316_v7, 4  ;;  %v6147_v49 = vrot.slane %v6146_v44, 4  ;;  %v5796_v26 = vmax.f32 %v10265_v38, %v5632_v0  ;;  %v7225_v9 = vadd.f32 %v10071_v37, %v10559_v2 }
 0x34b   : > { %v5879_v22 = vmax.f32 %v5877_v53, %v5878_v50  ;;  %v5964_v14 = vmax.f32 %v5962_v15, %v5963_v19  ;;  %v6049_v46 = vmax.f32 %v6047_v63, %v6048_v54  ;;  %v6234_v8 = vmax.f32 %v6232_v27, %v6233_v31 }
 0x34c   : > { %v6318_v60 = vmax.f32 %v6316_v7, %v6317_v34  ;;  %v6148_v11 = vmax.f32 %v6146_v44, %v6147_v49  ;;  %v6154_v59 = vsel %vm6054_vm6, %v5796_v26, -inf  ;;  %v6239_v45 = vsel %vm5797_vm2, %v5796_v26, -inf  ;;  %v10560_v7 = vld [vmem:[#allocation11_spill] sm:$0xff]  ;;  %v10561_v34 = vld [vmem:[#allocation12_spill] sm:$0xff] }
 0x34d   : > { %v5880_v36 = vrot.slane %v5879_v22, 1  ;;  %v5965_v43 = vrot.slane %v5964_v14, 1  ;;  %v6050_v48 = vrot.slane %v6049_v46, 1  ;;  %v6235_v4 = vrot.slane %v6234_v8, 2 }
 0x34e   : > { %v6319_v28 = vrot.slane %v6318_v60, 2  ;;  %v6149_v61 = vrot.slane %v6148_v11, 2  ;;  %v6155_v38 = vmax.f32 %v6153_v55, %v6154_v59  ;;  %v6240_v12 = vrot.slane %v6239_v45, 4 }
 0x34f   : > { %v5881_v25 = vmax.f32 %v5879_v22, %v5880_v36  ;;  %v5966_v40 = vmax.f32 %v5964_v14, %v5965_v43  ;;  %v6051_v23 = vmax.f32 %v6049_v46, %v6050_v48  ;;  %v6236_v47 = vmax.f32 %v6234_v8, %v6235_v4  ;;  %v10562_v8 = vld [vmem:[#allocation25_spill] sm:$0xff] }
 0x350   : > { %v6320_v41 = vmax.f32 %v6318_v60, %v6319_v28  ;;  %v6150_v29 = vmax.f32 %v6148_v11, %v6149_v61  ;;  %v6323_v33 = vsel %vm5882_vm3, %v5796_v26, -inf  ;;  %v5553_v10 = vadd.f32 %v7225_v9, %v9864_v6 }
 0x351   : > { %v6341_v37 = vsel %vm6054_vm6, %v5881_v25, %v5966_v40  ;;  %v6353_v42 = vsel %vm6342_vm7, %v6340_v58, %v6044_v21  ;;  %v6237_v17 = vrot.slane %v6236_v47, 1  ;;  %v6156_v16 = vrot.slane %v6155_v38, 4 }
 0x352   : > { %v6321_v20 = vrot.slane %v6320_v41, 1  ;;  %v6151_v5 = vrot.slane %v6150_v29, 1  ;;  %v6241_v13 = vmax.f32 %v6239_v45, %v6240_v12  ;;  %v6324_v53 = vrot.slane %v6323_v33, 4 }
 0x353   : > { %v5605_v15 = vmax.f32 %v5553_v10, 0.0  ;;  %v6354_v63 = vsel %vm6342_vm7, %v6341_v37, %v6051_v23  ;;  %v6238_v62 = vmax.f32 %v6236_v47, %v6237_v17  ;;  %v6157_v27 = vmax.f32 %v6155_v38, %v6156_v16 }
 0x354   : > { %v7226_v55 = vadd.f32 %v10073_v57, %v10560_v7  ;;  %v6152_v50 = vmax.f32 %v6150_v29, %v6151_v5  ;;  %v6242_v19 = vrot.slane %v6241_v13, 2  ;;  %v6325_v54 = vmax.f32 %v6323_v33, %v6324_v53  ;;  %v10564_v53 = vld [vmem:[#allocation21_spill] sm:$0xff] }
 0x355   : > { %v10341_v44 = vmax.f32 %v10270_v52, %v5605_v15  ;;  %v6322_v58 = vmax.f32 %v6320_v41, %v6321_v20  ;;  %v6158_v21 = vrot.slane %v6157_v27, 2  ;;  %v5748_v31 = vmax.f32 %v5605_v15, %v5609_v24 }
 0x356   : > { %v7227_v0 = vadd.f32 %v10090_v51, %v10561_v34  ;;  %v6365_v22 = vsel %vm5797_vm2, %v6353_v42, %v6152_v50  ;;  %v6243_v14 = vmax.f32 %v6241_v13, %v6242_v19  ;;  %v6326_v46 = vrot.slane %v6325_v54, 2 }
 0x357   : > { %v5826_v57 = vsel %vm5797_vm2, %v10341_v44, -inf  ;;  %v6378_v49 = vsel %vm6367_vm8, %v6365_v22, %v6238_v62  ;;  %v6159_v52 = vmax.f32 %v6157_v27, %v6158_v21  ;;  %v10563_v60 = vmax.f32 %v10562_v8, 0.0 }
 0x358   : > { %v5827_v2 = vrot.slane %v5826_v57, 4  ;;  %v6391_v1 = vsel %vm6380_vm9, %v6378_v49, %v6322_v58  ;;  %v6244_v24 = vrot.slane %v6243_v14, 1  ;;  %v6327_v9 = vmax.f32 %v6325_v54, %v6326_v46 }
 0x359   : > { %v10353_v26 = vmax.f32 %v5748_v31, %v10563_v60  ;;  %v5911_v51 = vsel %vm5882_vm3, %v10341_v44, -inf  ;;  %6403 = vst [vmem:[%s10078_s19 + $0x50] sm:$0x3f] %v6391_v1  ;;  %v6160_v36 = vrot.slane %v6159_v52, 1  ;;  %v5554_v45 = vadd.f32 %v7226_v55, %v9870_v30  ;;  %v10565_v55 = vld [vmem:[#allocation24_spill] sm:$0xff]  ;;  %v10566_v60 = vld [vmem:[#allocation26_spill] sm:$0xff] }
 0x35a   : > { %v5828_v43 = vmax.f32 %v5826_v57, %v5827_v2  ;;  %v5912_v11 = vrot.slane %v5911_v51, 4  ;;  %v6328_v4 = vrot.slane %v6327_v9, 1  ;;  %v6245_v40 = vmax.f32 %v6243_v14, %v6244_v24 }
 0x35b   : > { %v5840_v48 = vsel %vm5797_vm2, %v10353_v26, -inf  ;;  %v5925_v59 = vsel %vm5882_vm3, %v10353_v26, -inf  ;;  %v6161_v25 = vmax.f32 %v6159_v52, %v6160_v36  ;;  %v5996_v38 = vsel %vm5967_vm4, %v10341_v44, -inf }
 0x35c   : > { %v5841_v28 = vrot.slane %v5840_v48, 4  ;;  %v5913_v23 = vmax.f32 %v5911_v51, %v5912_v11  ;;  %v5926_v61 = vrot.slane %v5925_v59, 4  ;;  %v5829_v47 = vrot.slane %v5828_v43, 2 }
 0x35d   : > { %v6010_v12 = vsel %vm5967_vm4, %v10353_v26, -inf  ;;  %v6329_v37 = vmax.f32 %v6327_v9, %v6328_v4  ;;  %v6366_v29 = vsel %vm5797_vm2, %v6354_v63, %v6161_v25  ;;  %v5997_v20 = vrot.slane %v5996_v38, 4 }
 0x35e   : > { %v5842_v41 = vmax.f32 %v5840_v48, %v5841_v28  ;;  %v5914_v33 = vrot.slane %v5913_v23, 2  ;;  %v5927_v10 = vmax.f32 %v5925_v59, %v5926_v61  ;;  %v6379_v42 = vsel %vm6367_vm8, %v6366_v29, %v6245_v40 }
 0x35f   : > { %v6011_v16 = vrot.slane %v6010_v12, 4  ;;  %v6392_v5 = vsel %vm6380_vm9, %v6379_v42, %v6329_v37  ;;  %v5559_v15 = vadd.f32 %v10564_v53, %v9864_v6  ;;  %v5998_v62 = vmax.f32 %v5996_v38, %v5997_v20 }
 0x360   : > { %v5843_v17 = vrot.slane %v5842_v41, 2  ;;  %v5928_v13 = vrot.slane %v5927_v10, 2  ;;  %6404 = vst [vmem:[%s10078_s19 + $0x58] sm:$0x3f] %v6392_v5  ;;  %v5606_v7 = vmax.f32 %v5554_v45, 0.0  ;;  %v5610_v50 = vmax.f32 %v10565_v55, 0.0 }
 0x361   : > { %v6012_v27 = vmax.f32 %v6010_v12, %v6011_v16  ;;  %v5830_v63 = vmax.f32 %v5828_v43, %v5829_v47  ;;  %v5915_v19 = vmax.f32 %v5913_v23, %v5914_v33  ;;  %v5999_v58 = vrot.slane %v5998_v62, 2  ;;  %v10568_v12 = vld [vmem:[#allocation22_spill] sm:$0xff] }
 0x362   : > { %v5844_v54 = vmax.f32 %v5842_v41, %v5843_v17  ;;  %v10376_v31 = vmax.f32 %v10285_v39, %v5606_v7  ;;  %v5929_v34 = vmax.f32 %v5927_v10, %v5928_v13  ;;  %v5749_v22 = vmax.f32 %v5606_v7, %v5610_v50 }
 0x363   : > { %v6013_v21 = vrot.slane %v6012_v27, 2  ;;  %v5611_v14 = vmax.f32 %v5559_v15, 0.0  ;;  %v6000_v46 = vmax.f32 %v5998_v62, %v5999_v58  ;;  %v5555_v49 = vadd.f32 %v7227_v0, %v9864_v6 }
 0x364   : > { %v5833_v57 = vsel %vm5797_vm2, %v10376_v31, -inf  ;;  %v5831_v52 = vrot.slane %v5830_v63, 1  ;;  %v5916_v8 = vrot.slane %v5915_v19, 1  ;;  %v10567_v2 = vmax.f32 %v10566_v60, 0.0 }
 0x365   : > { %v5834_v24 = vrot.slane %v5833_v57, 4  ;;  %v5845_v9 = vrot.slane %v5844_v54, 1  ;;  %v6014_v51 = vmax.f32 %v6012_v27, %v6013_v21  ;;  %v5918_v39 = vsel %vm5882_vm3, %v10376_v31, -inf }
 0x366   : > { %v10383_v1 = vmax.f32 %v5749_v22, %v10567_v2  ;;  %v6003_v36 = vsel %vm5967_vm4, %v10376_v31, -inf  ;;  %v5930_v43 = vrot.slane %v5929_v34, 1  ;;  %v5919_v0 = vrot.slane %v5918_v39, 4 }
 0x367   : > { %v5835_v48 = vmax.f32 %v5833_v57, %v5834_v24  ;;  %v6001_v11 = vrot.slane %v6000_v46, 1  ;;  %v5607_v59 = vmax.f32 %v5555_v49, 0.0  ;;  %v6004_v23 = vrot.slane %v6003_v36, 4 }
 0x368   : > { %v5847_v6 = vsel %vm5797_vm2, %v10383_v1, -inf  ;;  %v5932_v28 = vsel %vm5882_vm3, %v10383_v1, -inf  ;;  %v5920_v25 = vmax.f32 %v5918_v39, %v5919_v0  ;;  %v5832_v61 = vmax.f32 %v5830_v63, %v5831_v52 }
 0x369   : > { %v5848_v4 = vrot.slane %v5847_v6, 4  ;;  %v5836_v45 = vrot.slane %v5835_v48, 2  ;;  %v5933_v40 = vrot.slane %v5932_v28, 4  ;;  %v5917_v47 = vmax.f32 %v5915_v19, %v5916_v8 }
 0x36a   : > { %v6015_v41 = vrot.slane %v6014_v51, 1  ;;  %v10395_v37 = vadd.f32 %v10568_v12, %v9870_v30  ;;  %v5846_v29 = vmax.f32 %v5844_v54, %v5845_v9  ;;  %v5931_v33 = vmax.f32 %v5929_v34, %v5930_v43 }
 0x36b   : > { %v5849_v38 = vmax.f32 %v5847_v6, %v5848_v4  ;;  %v5837_v10 = vmax.f32 %v5835_v48, %v5836_v45  ;;  %v5921_v42 = vrot.slane %v5920_v25, 2  ;;  %v6017_v17 = vsel %vm5967_vm4, %v10383_v1, -inf }
 0x36c   : > { %v5741_v20 = vmax.f32 %v10310_v32, %v5607_v59  ;;  %v5750_v16 = vmax.f32 %v5607_v59, %v5611_v14  ;;  %v6002_v5 = vmax.f32 %v6000_v46, %v6001_v11  ;;  %v5934_v13 = vmax.f32 %v5932_v28, %v5933_v40 }
 0x36d   : > { %v6005_v53 = vmax.f32 %v6003_v36, %v6004_v23  ;;  %v6016_v15 = vmax.f32 %v6014_v51, %v6015_v41  ;;  %v6334_v62 = vsel %vm6054_vm6, %v5832_v61, %v5917_v47  ;;  %v5850_v27 = vrot.slane %v5849_v38, 2 }
 0x36e   : > { %v10569_v7 = vmax.f32 %v9900_v3, 0.0  ;;  %v6336_v50 = vsel %vm6054_vm6, %v5846_v29, %v5931_v33  ;;  %v5838_v63 = vrot.slane %v5837_v10, 1  ;;  %v6018_v19 = vrot.slane %v6017_v17, 4  ;;  %v10570_v29 = vld [vmem:[#allocation13_spill] sm:$0xff] }
 0x36f   : > { %v5612_v54 = vmax.f32 %v10395_v37, 0.0  ;;  %v10405_v58 = vmax.f32 %v5920_v25, %v5921_v42  ;;  %v6090_v32 = vsel %vm6052_vm5, %v10341_v44, -inf  ;;  %v6091_v21 = vsel %vm6054_vm6, %v5741_v20, -inf }
 0x370   : > { %v5759_v55 = vmax.f32 %v5750_v16, %v10569_v7  ;;  %v6347_v34 = vsel %vm6342_vm7, %v6334_v62, %v6002_v5  ;;  %v5935_v22 = vrot.slane %v5934_v13, 2  ;;  %v6006_v14 = vrot.slane %v6005_v53, 2 }
 0x371   : > { %v6092_v46 = vmax.f32 %v6090_v32, %v6091_v21  ;;  %v10412_v3 = vsel %vm6342_vm7, %v6336_v50, %v6016_v15  ;;  %v10414_v57 = vmax.f32 %v5849_v38, %v5850_v27  ;;  %v6190_v52 = vsel %vm5797_vm2, %v5741_v20, -inf }
 0x372   : > { %v6109_v49 = vsel %vm6054_vm6, %v5759_v55, -inf  ;;  %v10418_v8 = vmax.f32 %v5837_v10, %v5838_v63  ;;  %v10420_v60 = vmax.f32 %v6017_v17, %v6018_v19  ;;  %v6108_v2 = vsel %vm6052_vm5, %v10353_v26, -inf }
 0x373   : > { %v6093_v44 = vrot.slane %v6092_v46, 4  ;;  %v5923_v24 = vrot.slane %v10405_v58, 1  ;;  %v6110_v9 = vmax.f32 %v6108_v2, %v6109_v49  ;;  %v6191_v51 = vrot.slane %v6190_v52, 4 }
 0x374   : > { %v6204_v39 = vsel %vm5797_vm2, %v5759_v55, -inf  ;;  %v10426_v36 = vmax.f32 %v5934_v13, %v5935_v22  ;;  %v10428_v43 = vmax.f32 %v6005_v53, %v6006_v14  ;;  %v5852_v0 = vrot.slane %v10414_v57, 1 }
 0x375   : > { %v6094_v48 = vmax.f32 %v6092_v46, %v6093_v44  ;;  %v6205_v6 = vrot.slane %v6204_v39, 4  ;;  %v6111_v11 = vrot.slane %v6110_v9, 4  ;;  %v6192_v4 = vmax.f32 %v6190_v52, %v6191_v51 }
 0x376   : > { %v6274_v28 = vsel %vm5882_vm3, %v5741_v20, -inf  ;;  %v6288_v25 = vsel %vm5882_vm3, %v5759_v55, -inf  ;;  %v6020_v40 = vrot.slane %v10420_v60, 2  ;;  %v7228_v33 = vadd.f32 %v10096_v56, %v10570_v29 }
 0x377   : > { %v6095_v59 = vrot.slane %v6094_v48, 2  ;;  %v6206_v26 = vmax.f32 %v6204_v39, %v6205_v6  ;;  %v6275_v45 = vrot.slane %v6274_v28, 4  ;;  %v6112_v23 = vmax.f32 %v6110_v9, %v6111_v11 }
 0x378   : > { %v6193_v61 = vrot.slane %v6192_v4, 2  ;;  %v6289_v47 = vrot.slane %v6288_v25, 4  ;;  %v5937_v10 = vrot.slane %v10426_v36, 1  ;;  %v5556_v53 = vadd.f32 %v7228_v33, %v9870_v30 }
 0x379   : > { %v6096_v41 = vmax.f32 %v6094_v48, %v6095_v59  ;;  %v6207_v38 = vrot.slane %v6206_v26, 2  ;;  %v6276_v12 = vmax.f32 %v6274_v28, %v6275_v45  ;;  %v6113_v42 = vrot.slane %v6112_v23, 2 }
 0x37a   : > { %v6194_v17 = vmax.f32 %v6192_v4, %v6193_v61  ;;  %v6290_v20 = vmax.f32 %v6288_v25, %v6289_v47  ;;  %v6099_v7 = vsel %vm6052_vm5, %v10376_v31, -inf  ;;  %v5608_v56 = vmax.f32 %v5556_v53, 0.0 }
 0x37b   : > { %v6097_v16 = vrot.slane %v6096_v41, 1  ;;  %v6208_v5 = vmax.f32 %v6206_v26, %v6207_v38  ;;  %v6277_v13 = vrot.slane %v6276_v12, 2  ;;  %v6114_v15 = vmax.f32 %v6112_v23, %v6113_v42 }
 0x37c   : > { %v6195_v62 = vrot.slane %v6194_v17, 1  ;;  %v6291_v27 = vrot.slane %v6290_v20, 2  ;;  %v6117_v22 = vsel %vm6052_vm5, %v10383_v1, -inf  ;;  %v5742_v49 = vmax.f32 %v10326_v35, %v5608_v56 }
 0x37d   : > { %v6098_v55 = vmax.f32 %v6096_v41, %v6097_v16  ;;  %v6209_v50 = vrot.slane %v6208_v5, 1  ;;  %v6278_v63 = vmax.f32 %v6276_v12, %v6277_v13  ;;  %v6115_v19 = vrot.slane %v6114_v15, 1 }
 0x37e   : > { %v6196_v32 = vmax.f32 %v6194_v17, %v6195_v62  ;;  %v6292_v21 = vmax.f32 %v6290_v20, %v6291_v27  ;;  %v5751_v2 = vmax.f32 %v5608_v56, %v5612_v54  ;;  %v6100_v51 = vsel %vm6054_vm6, %v5742_v49, -inf }
 0x37f   : > { %v6210_v14 = vmax.f32 %v6208_v5, %v6209_v50  ;;  %v6279_v46 = vrot.slane %v6278_v63, 1  ;;  %v6359_v30 = vsel %vm5797_vm2, %v6347_v34, %v6098_v55  ;;  %v6116_v52 = vmax.f32 %v6114_v15, %v6115_v19 }
 0x380   : > { %v6293_v44 = vrot.slane %v6292_v21, 1  ;;  %v6372_v31 = vsel %vm6367_vm8, %v6359_v30, %v6196_v32  ;;  %v6197_v1 = vsel %vm5797_vm2, %v5742_v49, -inf  ;;  %v6281_v39 = vsel %vm5882_vm3, %v5742_v49, -inf }
 0x381   : > { %v6280_v9 = vmax.f32 %v6278_v63, %v6279_v46  ;;  %v6361_v35 = vsel %vm5797_vm2, %v10412_v3, %v6116_v52  ;;  %v10571_v34 = vmax.f32 %v9904_v18, 0.0  ;;  %v6101_v11 = vmax.f32 %v6099_v7, %v6100_v51 }
 0x382   : > { %v6294_v48 = vmax.f32 %v6292_v21, %v6293_v44  ;;  %v6374_v4 = vsel %vm6367_vm8, %v6361_v35, %v6210_v14  ;;  %v6198_v54 = vrot.slane %v6197_v1, 4  ;;  %v6282_v28 = vrot.slane %v6281_v39, 4 }
 0x383   : > { %v5760_v6 = vmax.f32 %v5751_v2, %v10571_v34  ;;  %v6385_v37 = vsel %vm6380_vm9, %v6372_v31, %v6280_v9  ;;  %v6102_v26 = vrot.slane %v6101_v11, 4  ;;  %v6008_v47 = vrot.slane %v10428_v43, 1 }
 0x384   : > { %v6387_v59 = vsel %vm6380_vm9, %v6374_v4, %v6294_v48  ;;  %6397 = vst [vmem:[%s10078_s19 + $0x20] sm:$0x3f] %v6385_v37  ;;  %v6199_v23 = vmax.f32 %v6197_v1, %v6198_v54  ;;  %v6283_v61 = vmax.f32 %v6281_v39, %v6282_v28  ;;  %v6021_v41 = vmax.f32 %v10420_v60, %v6020_v40 }
 0x385   : > { %v6118_v45 = vsel %vm6054_vm6, %v5760_v6, -inf  ;;  %v6211_v25 = vsel %vm5797_vm2, %v5760_v6, -inf  ;;  %6399 = vst [vmem:[%s10078_s19 + $0x30] sm:$0x3f] %v6387_v59  ;;  %v6103_v38 = vmax.f32 %v6101_v11, %v6102_v26  ;;  %v6295_v12 = vsel %vm5882_vm3, %v5760_v6, -inf }
 0x386   : > { %v6119_v3 = vmax.f32 %v6117_v22, %v6118_v45  ;;  %v6212_v18 = vrot.slane %v6211_v25, 4  ;;  %v6200_v33 = vrot.slane %v6199_v23, 2  ;;  %v6284_v17 = vrot.slane %v6283_v61, 2 }
 0x387   : > { %v5853_v20 = vmax.f32 %v10414_v57, %v5852_v0  ;;  %v5924_v16 = vmax.f32 %v10405_v58, %v5923_v24  ;;  %v6104_v5 = vrot.slane %v6103_v38, 2  ;;  %v6296_v13 = vrot.slane %v6295_v12, 4 }
 0x388   : > { %v6120_v29 = vrot.slane %v6119_v3, 4  ;;  %v6213_v42 = vmax.f32 %v6211_v25, %v6212_v18  ;;  %v6201_v15 = vmax.f32 %v6199_v23, %v6200_v33  ;;  %v6285_v40 = vmax.f32 %v6283_v61, %v6284_v17 }
 0x389   : > { %v5938_v62 = vmax.f32 %v10426_v36, %v5937_v10  ;;  %v6022_v27 = vrot.slane %v6021_v41, 1  ;;  %v6105_v7 = vmax.f32 %v6103_v38, %v6104_v5  ;;  %v6297_v55 = vmax.f32 %v6295_v12, %v6296_v13 }
 0x38a   : > { %v6121_v53 = vmax.f32 %v6119_v3, %v6120_v29  ;;  %v6214_v60 = vrot.slane %v6213_v42, 2  ;;  %v6009_v50 = vmax.f32 %v10428_v43, %v6008_v47  ;;  %v6202_v0 = vrot.slane %v6201_v15, 1 }
 0x38b   : > { %v6335_v58 = vsel %vm6054_vm6, %v10418_v8, %v5924_v16  ;;  %v6106_v24 = vrot.slane %v6105_v7, 1  ;;  %v6286_v56 = vrot.slane %v6285_v40, 1  ;;  %v6298_v19 = vrot.slane %v6297_v55, 2 }
 0x38c   : > { %v6122_v57 = vrot.slane %v6121_v53, 2  ;;  %v6215_v63 = vmax.f32 %v6213_v42, %v6214_v60  ;;  %v6023_v21 = vmax.f32 %v6021_v41, %v6022_v27  ;;  %v6337_v10 = vsel %vm6054_vm6, %v5853_v20, %v5938_v62 }
 0x38d   : > { %v6107_v22 = vmax.f32 %v6105_v7, %v6106_v24  ;;  %v6299_v36 = vmax.f32 %v6297_v55, %v6298_v19  ;;  %v6348_v46 = vsel %vm6342_vm7, %v6335_v58, %v6009_v50  ;;  %v6203_v30 = vmax.f32 %v6201_v15, %v6202_v0 }
 0x38e   : > { %v6123_v32 = vmax.f32 %v6121_v53, %v6122_v57  ;;  %v6216_v14 = vrot.slane %v6215_v63, 1  ;;  %v6287_v49 = vmax.f32 %v6285_v40, %v6286_v56  ;;  %v6350_v2 = vsel %vm6342_vm7, %v6337_v10, %v6023_v21 }
 0x38f   : > { %v6300_v52 = vrot.slane %v6299_v36, 1  ;;  %v6360_v8 = vsel %vm5797_vm2, %v6348_v46, %v6107_v22 }
 0x390   : > { %v6124_v43 = vrot.slane %v6123_v32, 1  ;;  %v6373_v31 = vsel %vm6367_vm8, %v6360_v8, %v6203_v30  ;;  %v6217_v9 = vmax.f32 %v6215_v63, %v6216_v14 }
 0x391   : > { %v6386_v51 = vsel %vm6380_vm9, %v6373_v31, %v6287_v49  ;;  %v6301_v1 = vmax.f32 %v6299_v36, %v6300_v52 }
 0x392   : > { %v6125_v44 = vmax.f32 %v6123_v32, %v6124_v43  ;;  %6398 = vst [vmem:[%s10078_s19 + $0x28] sm:$0x3f] %v6386_v51 }
 0x394   : > { %v6362_v39 = vsel %vm5797_vm2, %v6350_v2, %v6125_v44 }
 0x395   : > { %v6375_v48 = vsel %vm6367_vm8, %v6362_v39, %v6217_v9 }
 0x396   : > { %v6388_v35 = vsel %vm6380_vm9, %v6375_v48, %v6301_v1 }
 0x397   : > { %6400 = vst [vmem:[%s10078_s19 + $0x38] sm:$0x3f] %v6388_v35 }
 0x398 PF: > { %s14_s15 = sadd.s32 1, %s8178_s15  }
 0x399   : > { %p11_p4 = scmp.ge.s32.totalorder %s14_s15, 4  }
 0x39b   :  { %13 = sbr.rel (!%p11_p4) target bundleno = 1 (0x1), region = 89 }

</bundles_post_ra>
